<compile_context>
chip_gen: v5e
topology: v5e:2x2
jax: 0.10.0
libtpu: 0.0.40
codegen_flags: <defaults>
</compile_context>

<pallas_src>
import functools

import jax
import jax.numpy as jnp
import numpy as np
from jax.experimental import pallas as pl
from jax.experimental.pallas import tpu as pltpu

# ---------------------------------------------------------------------------
# Config (small, consistent with the module)
# ---------------------------------------------------------------------------
DIM = 32                      # C
NUM_HEADS = 4
HEAD_DIM = DIM // NUM_HEADS
WINDOW_SIZE = (4, 4)          # (Wh, Ww)
N_TOK = WINDOW_SIZE[0] * WINDOW_SIZE[1]   # N = Wh*Ww = 16
B_WIN = 4                     # num_windows * batch

# Precision policy (review item: HIGHEST only where rounding feeds exp()).
_PREC_LOGIT = jax.lax.Precision.HIGHEST   # QKV projection + QK^T logits
_PREC_FAST = jax.lax.Precision.DEFAULT    # norm matmuls, PV, output projection


# ---------------------------------------------------------------------------
# Pallas kernel: one grid step handles `win_per_blk` whole windows
# ---------------------------------------------------------------------------
def _wattn_kernel(x_ref, wmats_ref, consts_ref, bias_ref, o_ref, oacc_ref, *,
                  num_heads, head_dim, win_per_blk, n_tok):
    # x_ref:      (R, C)   VMEM, R = win_per_blk * n_tok (window-major rows)
    # wmats_ref:  (C, 5C)  VMEM: [:, :3C]=W_qkv^T, [:, 3C:4C]=W_proj^T,
    #                            [:, 4C:5C]=S (block-diagonal 0/1 norm matrix)
    # consts_ref: (3, 3C)  VMEM: row0=cat(q_bias,0,v_bias), row1[:C]=per-channel
    #                            logit scale, row2[:C]=proj bias
    # bias_ref:   (H, N, N) VMEM: 16*sigmoid(cpb bias), precomputed in wrapper
    # o_ref:      (R, C)   VMEM output
    # oacc_ref:   (R, C)   f32 VMEM scratch (per-head lane-offset accumulator)
    C = num_heads * head_dim
    R = win_per_blk * n_tok

    x = x_ref[...]                                           # (R, C)
    wqkvT = wmats_ref[:, 0:3 * C]                            # (C, 3C)
    wprojT = wmats_ref[:, 3 * C:4 * C]                       # (C, C)
    S = wmats_ref[:, 4 * C:5 * C]                            # (C, C) block-diag 0/1
    bqkv = consts_ref[0:1, :]                                # (1, 3C)
    scale_row = consts_ref[1:2, 0:C]                         # (1, C) per-channel
    bproj = consts_ref[2:3, 0:C]                             # (1, C)

    # QKV projection for all windows at once: x @ W_qkv^T + b   (HIGHEST: feeds exp)
    qkv = jnp.dot(x, wqkvT, preferred_element_type=jnp.float32,
                  precision=_PREC_LOGIT) + bqkv               # (R, 3C)
    q = qkv[:, 0 * C:1 * C]
    k = qkv[:, 1 * C:2 * C]
    v = qkv[:, 2 * C:3 * C]

    # Per-head squared L2 norms, broadcast back to every channel of the head in a
    # single matmul each via the block-diagonal 0/1 matrix S (review item 5).
    ssq_q = jnp.dot(q * q, S, preferred_element_type=jnp.float32,
                    precision=_PREC_FAST)                     # (R, C)
    ssq_k = jnp.dot(k * k, S, preferred_element_type=jnp.float32,
                    precision=_PREC_FAST)                     # (R, C)
    # F.normalize eps: x / max(||x||, 1e-12)  ==  x * rsqrt(max(||x||^2, 1e-24));
    # the clamped/exp'd logit scale is folded into q as a per-channel row.
    qn = q * (jax.lax.rsqrt(jnp.maximum(ssq_q, 1e-24)) * scale_row)
    kn = k * jax.lax.rsqrt(jnp.maximum(ssq_k, 1e-24))

    for h in range(num_heads):                                # static unroll, H small
        s = h * head_dim
        # major-dim-only reshapes (no lane/sublane relayout): rows -> (WB, N, hd)
        qh = qn[:, s:s + head_dim].reshape(win_per_blk, n_tok, head_dim)
        kh = kn[:, s:s + head_dim].reshape(win_per_blk, n_tok, head_dim)
        vh = v[:, s:s + head_dim].reshape(win_per_blk, n_tok, head_dim)
        # windows-batched cosine-attention logits (no kh.T ever materialized)
        sc = jax.lax.dot_general(
            qh, kh, dimension_numbers=(((2,), (2,)), ((0,), (0,))),
            preferred_element_type=jnp.float32, precision=_PREC_LOGIT)
        sc = sc + bias_ref[h]                                 # CPB bias, (N, N) bcast
        # softmax along last dim (attn_drop p=0.0 -> identity); denom on the EUP
        sc = sc - jnp.max(sc, axis=-1, keepdims=True)
        p = jnp.exp(sc)
        p = p * pl.reciprocal(jnp.sum(p, axis=-1, keepdims=True), approx=True)
        oh = jax.lax.dot_general(                             # (WB, N, hd)
            p, vh, dimension_numbers=(((2,), (1,)), ((0,), (0,))),
            preferred_element_type=jnp.float32, precision=_PREC_FAST)
        # masked lane write of this head's output into the (R, C) accumulator
        oacc_ref[:, s:s + head_dim] = oh.reshape(R, head_dim)

    # ONE output projection for all heads (review item 3), proj_drop=0 -> identity
    out = jnp.dot(oacc_ref[...], wprojT, preferred_element_type=jnp.float32,
                  precision=_PREC_FAST) + bproj
    o_ref[...] = out.astype(o_ref.dtype)


# ---------------------------------------------------------------------------
# Wrapper
# ---------------------------------------------------------------------------
def _tensorcores_per_chip():
    """2 on v7x (dual TensorCore), otherwise 1 (v5e/v6e and fallback)."""
    try:
        kind = jax.devices()[0].device_kind.lower()
    except Exception:  # pragma: no cover - defensive
        return 1
    return 2 if "v7" in kind else 1


def window_attention_pallas(x, w_qkv, qkv_bias, logit_scale, rel_bias,
                            w_proj, b_proj, *, num_heads):
    B_, N, C = x.shape
    head_dim = C // num_heads

    # ---- trace-time constant preparation (all hoisted out of the kernel) ----
    # clamp(logit_scale, max=log(1/0.01)).exp() -> per-channel row (1, C)
    scale_h = jnp.exp(jnp.minimum(logit_scale.reshape(-1),
                                  jnp.log(jnp.float32(1.0 / 0.01))))
    scale_row = jnp.repeat(scale_h.astype(jnp.float32), head_dim)      # (C,)

    # block-diagonal 0/1 matrix S[c, c'] = 1 iff c, c' belong to the same head
    ch = np.arange(C)
    S = (ch[:, None] // head_dim == ch[None, :] // head_dim).astype(np.float32)

    # one weight slab: [W_qkv^T | W_proj^T | S]  -> (C, 5C)
    w_qkv_t = jnp.transpose(w_qkv).astype(jnp.float32)                 # (C, 3C)
    w_proj_t = jnp.transpose(w_proj).astype(jnp.float32)               # (C, C)
    wmats = jnp.concatenate([w_qkv_t, w_proj_t, jnp.asarray(S)], axis=1)

    # one constants slab: qkv bias / per-channel scale / proj bias -> (3, 3C)
    consts = jnp.zeros((3, 3 * C), jnp.float32)
    consts = consts.at[0, :].set(qkv_bias.astype(jnp.float32))
    consts = consts.at[1, :C].set(scale_row)
    consts = consts.at[2, :C].set(b_proj.astype(jnp.float32))

    # ---- chip-aware grid (review items 1/2/8/10) ----
    n_tc = _tensorcores_per_chip()
    if B_ >= 4 * max(8, n_tc):
        target = max(8, n_tc)      # realistic window counts: let the DMAs pipeline
    else:
        target = n_tc              # tiny B_: one grid step per TensorCore only
    # cap rows per block so f32 temporaries stay far under VMEM even on v7x (64 MiB)
    MAX_WIN_PER_BLOCK = 256
    target = max(target, -(-B_ // MAX_WIN_PER_BLOCK))
    target = min(max(target, 1), B_)
    num_blocks = B_
    for cand in range(target, B_ + 1):     # smallest divisor of B_ >= target
        if B_ % cand == 0:
            num_blocks = cand
            break
    win_per_blk = B_ // num_blocks
    rows_per_blk = win_per_blk * N

    # VMEM budget check (review item 10): per-step working set is tiny vs. 32 MiB
    # scoped default / 64 MiB v7x physical, so vmem_limit_bytes is left at default.
    vmem_est = 4 * (rows_per_blk * C * 16          # x/out blocks + f32 temporaries
                    + 5 * C * C + 3 * 3 * C        # resident weight/const slabs
                    + num_heads * N * N            # CPB bias
                    + win_per_blk * N * N * 4)     # per-head attention matrices
    assert vmem_est < 24 * (1 << 20), f"VMEM estimate too large: {vmem_est} bytes"

    if num_blocks == 1:
        dims = ("arbitrary",)
    elif n_tc > 1 and num_blocks == n_tc:
        # guarantee a real split across both v7x TensorCores
        dims = (pltpu.CORE_PARALLEL,)
    else:
        dims = ("parallel",)

    x2 = x.reshape(B_ * N, C)       # full-row blocks, no size-1 leading dims

    kernel = functools.partial(_wattn_kernel, num_heads=num_heads,
                               head_dim=head_dim, win_per_blk=win_per_blk,
                               n_tok=N)
    out2 = pl.pallas_call(
        kernel,
        out_shape=jax.ShapeDtypeStruct((B_ * N, C), x.dtype),
        grid_spec=pltpu.PrefetchScalarGridSpec(
            num_scalar_prefetch=0,
            grid=(num_blocks,),
            in_specs=[
                pl.BlockSpec((rows_per_blk, C), lambda b: (b, 0)),       # x rows
                pl.BlockSpec((C, 5 * C), lambda b: (0, 0)),              # weight slab
                pl.BlockSpec((3, 3 * C), lambda b: (0, 0)),              # const slab
                pl.BlockSpec((num_heads, N, N), lambda b: (0, 0, 0)),    # CPB bias
            ],
            out_specs=pl.BlockSpec((rows_per_blk, C), lambda b: (b, 0)),
            scratch_shapes=[pltpu.VMEM((rows_per_blk, C), jnp.float32)],
        ),
        compiler_params=pltpu.CompilerParams(dimension_semantics=dims),
    )(x2, wmats, consts, rel_bias)
    return out2.reshape(B_, N, C)


# ---------------------------------------------------------------------------
# Glue: CPB relative-position bias (parameter-derived, window-independent;
# computed once in plain JAX — shared by every window/grid step)
# ---------------------------------------------------------------------------
def _relative_position_index(window_size):
    Wh, Ww = window_size
    coords = np.stack(np.meshgrid(np.arange(Wh), np.arange(Ww), indexing="ij"))
    coords_flatten = coords.reshape(2, -1)                         # (2, N)
    rel = coords_flatten[:, :, None] - coords_flatten[:, None, :]  # (2, N, N)
    rel = rel.transpose(1, 2, 0).astype(np.int64)
    rel[..., 0] += Wh - 1
    rel[..., 1] += Ww - 1
    rel[..., 0] *= 2 * Ww - 1
    return rel.sum(-1)                                             # (N, N) int


def _relative_coords_table(window_size):
    Wh, Ww = window_size
    rch = np.arange(-(Wh - 1), Wh, dtype=np.float32)
    rcw = np.arange(-(Ww - 1), Ww, dtype=np.float32)
    gh, gw = np.meshgrid(rch, rcw, indexing="ij")
    table = np.stack([gh, gw], axis=-1)                            # (2Wh-1, 2Ww-1, 2)
    table[..., 0] /= Wh - 1
    table[..., 1] /= Ww - 1
    table *= 8
    table = np.sign(table) * np.log2(np.abs(table) + 1.0) / np.log2(8)
    return table.astype(np.float32)


def compute_cpb_bias(cpb_w1, cpb_b1, cpb_w2, window_size, num_heads):
    Wh, Ww = window_size
    N = Wh * Ww
    table = jnp.asarray(_relative_coords_table(window_size)).reshape(-1, 2)
    hidden = jax.nn.relu(table @ cpb_w1.T + cpb_b1)                # (L, 512)
    bias_table = hidden @ cpb_w2.T                                 # (L, num_heads)
    rpi = jnp.asarray(_relative_position_index(window_size).reshape(-1))
    bias = bias_table[rpi].reshape(N, N, num_heads).transpose(2, 0, 1)
    bias = 16.0 * jax.nn.sigmoid(bias)
    return bias.astype(jnp.float32)                                # (num_heads, N, N)


# ---------------------------------------------------------------------------
# Plain-JAX reference (mirrors the PyTorch forward, mask=None, eval mode)
# ---------------------------------------------------------------------------
def window_attention_ref(x, w_qkv, qkv_bias, logit_scale, rel_bias,
                         w_proj, b_proj, *, num_heads):
    with jax.default_matmul_precision("highest"):
        B_, N, C = x.shape
        hd = C // num_heads
        qkv = x @ w_qkv.T + qkv_bias                                  # (B_, N, 3C)
        qkv = qkv.reshape(B_, N, 3, num_heads, hd).transpose(2, 0, 3, 1, 4)
        q, k, v = qkv[0], qkv[1], qkv[2]                              # (B_, H, N, hd)
        qn = q / jnp.maximum(jnp.linalg.norm(q, axis=-1, keepdims=True), 1e-12)
        kn = k / jnp.maximum(jnp.linalg.norm(k, axis=-1, keepdims=True), 1e-12)
        attn = jnp.einsum("bhnd,bhmd->bhnm", qn, kn)
        scale = jnp.exp(jnp.minimum(logit_scale, jnp.log(jnp.float32(1.0 / 0.01))))
        attn = attn * scale[None]                                     # (B_, H, N, N)
        attn = attn + rel_bias[None]
        attn = jax.nn.softmax(attn, axis=-1)
        out = jnp.einsum("bhnm,bhmd->bhnd", attn, v)
        out = out.transpose(0, 2, 1, 3).reshape(B_, N, C)
        return out @ w_proj.T + b_proj


# ---------------------------------------------------------------------------
# Main
# ---------------------------------------------------------------------------
if __name__ == "__main__":
    key = jax.random.PRNGKey(0)
    ks = jax.random.split(key, 8)

    # --- deterministic parameter init (shapes per WindowAttention.__init__) ---
    w_qkv = jax.random.normal(ks[0], (3 * DIM, DIM), jnp.float32) * 0.02
    q_bias = jax.random.normal(ks[1], (DIM,), jnp.float32) * 0.02
    v_bias = jax.random.normal(ks[2], (DIM,), jnp.float32) * 0.02
    qkv_bias = jnp.concatenate([q_bias, jnp.zeros_like(v_bias), v_bias])
    logit_scale = jnp.log(10.0 * jnp.ones((NUM_HEADS, 1, 1), jnp.float32))
    w_proj = jax.random.normal(ks[3], (DIM, DIM), jnp.float32) * 0.02
    b_proj = jax.random.normal(ks[4], (DIM,), jnp.float32) * 0.02
    # cpb_mlp: Linear(2, 512, bias=True) -> ReLU -> Linear(512, num_heads, bias=False)
    cpb_w1 = jax.random.normal(ks[5], (512, 2), jnp.float32) * 0.02
    cpb_b1 = jax.random.normal(ks[6], (512,), jnp.float32) * 0.02
    cpb_w2 = jax.random.normal(ks[7], (NUM_HEADS, 512), jnp.float32) * 0.02

    rel_bias = compute_cpb_bias(cpb_w1, cpb_b1, cpb_w2, WINDOW_SIZE, NUM_HEADS)

    # --- input: (num_windows*B, N, C) ---
    x = jax.random.normal(jax.random.PRNGKey(42), (B_WIN, N_TOK, DIM), jnp.float32)

    out = window_attention_pallas(x, w_qkv, qkv_bias, logit_scale, rel_bias,
                                  w_proj, b_proj, num_heads=NUM_HEADS)
    out = jax.block_until_ready(out)

    ref = window_attention_ref(x, w_qkv, qkv_bias, logit_scale, rel_bias,
                               w_proj, b_proj, num_heads=NUM_HEADS)
    ref = jax.block_until_ready(ref)

    # Error budget vs. the f32 reference: approx-reciprocal softmax denominator
    # (~2e-4 abs in the output) + bf16 operand rounding in the DEFAULT-precision
    # norm/PV/proj matmuls (~2-3e-4 abs worst case); atol=1e-3 leaves ~2x headroom.
    np.testing.assert_allclose(np.asarray(out), np.asarray(ref),
                               rtol=5e-3, atol=1e-3)
    print("KERNEL_OK")
</pallas_src>

<mosaic_0001>
module attributes {stable_mosaic.version = 11 : i64} {
  func.func @_wattn_kernel(%arg0: i32, %arg1: memref<64x32xf32, #tpu.memory_space<vmem>>, %arg2: memref<32x160xf32, #tpu.memory_space<vmem>>, %arg3: memref<3x96xf32, #tpu.memory_space<vmem>>, %arg4: memref<4x16x16xf32, #tpu.memory_space<vmem>>, %arg5: memref<64x32xf32, #tpu.memory_space<vmem>>, %arg6: memref<64x32xf32, #tpu.memory_space<vmem>>) attributes {dimension_semantics = [#tpu.dimension_semantics<arbitrary>], iteration_bounds = array<i64: 1>, scalar_prefetch = 0 : i64, scratch_operands = 1 : i64, tpu.core_type = #tpu.core_type<tc>, window_params = [{transform_indices = @transform_0, window_bounds = array<i64: 64, 32>}, {pipeline_mode = #tpu.pipeline_mode<synchronous>, transform_indices = @transform_1, window_bounds = array<i64: 32, 160>}, {pipeline_mode = #tpu.pipeline_mode<synchronous>, transform_indices = @transform_2, window_bounds = array<i64: 3, 96>}, {pipeline_mode = #tpu.pipeline_mode<synchronous>, transform_indices = @transform_3, window_bounds = array<i64: 4, 16, 16>}, {transform_indices = @transform_4, window_bounds = array<i64: 64, 32>}]} {
    %c0 = arith.constant 0 : index
    %c0_0 = arith.constant 0 : index
    %0 = vector.load %arg1[%c0, %c0_0] : memref<64x32xf32, #tpu.memory_space<vmem>>, vector<64x32xf32>
    %c0_1 = arith.constant 0 : index
    %c0_2 = arith.constant 0 : index
    %1 = vector.load %arg2[%c0_1, %c0_2] : memref<32x160xf32, #tpu.memory_space<vmem>>, vector<32x96xf32>
    %c0_3 = arith.constant 0 : index
    %c96 = arith.constant 96 : index
    %2 = vector.load %arg2[%c0_3, %c96] : memref<32x160xf32, #tpu.memory_space<vmem>>, vector<32x32xf32>
    %c0_4 = arith.constant 0 : index
    %c128 = arith.constant 128 : index
    %3 = vector.load %arg2[%c0_4, %c128] : memref<32x160xf32, #tpu.memory_space<vmem>>, vector<32x32xf32>
    %c0_5 = arith.constant 0 : index
    %c0_6 = arith.constant 0 : index
    %4 = vector.load %arg3[%c0_5, %c0_6] : memref<3x96xf32, #tpu.memory_space<vmem>>, vector<1x96xf32>
    %c1 = arith.constant 1 : index
    %c0_7 = arith.constant 0 : index
    %5 = vector.load %arg3[%c1, %c0_7] : memref<3x96xf32, #tpu.memory_space<vmem>>, vector<1x32xf32>
    %c2 = arith.constant 2 : index
    %c0_8 = arith.constant 0 : index
    %6 = vector.load %arg3[%c2, %c0_8] : memref<3x96xf32, #tpu.memory_space<vmem>>, vector<1x32xf32>
    %cst = arith.constant dense<0.000000e+00> : vector<64x96xf32>
    %7 = tpu.matmul %0, %1, %cst {dimension_numbers = #tpu.dot_dimension_numbers<[1], [0], [0], [1], [0, 0, 1, 1], [], []>, precision = #tpu.contract_precision<fp32>} : vector<64x32xf32>, vector<32x96xf32>, vector<64x96xf32> -> vector<64x96xf32>
    %8 = vector.broadcast %4 : vector<1x96xf32> to vector<64x96xf32>
    %9 = arith.addf %7, %8 : vector<64x96xf32>
    %10 = vector.extract_strided_slice %9 {offsets = [0, 0], sizes = [64, 32], strides = [1, 1]} : vector<64x96xf32> to vector<64x32xf32>
    %11 = vector.extract_strided_slice %9 {offsets = [0, 32], sizes = [64, 32], strides = [1, 1]} : vector<64x96xf32> to vector<64x32xf32>
    %12 = vector.extract_strided_slice %9 {offsets = [0, 64], sizes = [64, 32], strides = [1, 1]} : vector<64x96xf32> to vector<64x32xf32>
    %13 = arith.mulf %10, %10 : vector<64x32xf32>
    %cst_9 = arith.constant dense<0.000000e+00> : vector<64x32xf32>
    %14 = tpu.matmul %13, %3, %cst_9 {dimension_numbers = #tpu.dot_dimension_numbers<[1], [0], [0], [1], [0, 0, 1, 1], [], []>} : vector<64x32xf32>, vector<32x32xf32>, vector<64x32xf32> -> vector<64x32xf32>
    %15 = arith.mulf %11, %11 : vector<64x32xf32>
    %cst_10 = arith.constant dense<0.000000e+00> : vector<64x32xf32>
    %16 = tpu.matmul %15, %3, %cst_10 {dimension_numbers = #tpu.dot_dimension_numbers<[1], [0], [0], [1], [0, 0, 1, 1], [], []>} : vector<64x32xf32>, vector<32x32xf32>, vector<64x32xf32> -> vector<64x32xf32>
    %cst_11 = arith.constant 1.000000e-24 : f32
    %17 = vector.broadcast %cst_11 : f32 to vector<64x32xf32>
    %18 = arith.maximumf %14, %17 : vector<64x32xf32>
    %19 = math.rsqrt %18 : vector<64x32xf32>
    %20 = vector.broadcast %5 : vector<1x32xf32> to vector<64x32xf32>
    %21 = arith.mulf %19, %20 : vector<64x32xf32>
    %22 = arith.mulf %10, %21 : vector<64x32xf32>
    %cst_12 = arith.constant 1.000000e-24 : f32
    %23 = vector.broadcast %cst_12 : f32 to vector<64x32xf32>
    %24 = arith.maximumf %16, %23 : vector<64x32xf32>
    %25 = math.rsqrt %24 : vector<64x32xf32>
    %26 = arith.mulf %11, %25 : vector<64x32xf32>
    %27 = vector.extract_strided_slice %22 {offsets = [0, 0], sizes = [64, 8], strides = [1, 1]} : vector<64x32xf32> to vector<64x8xf32>
    %28 = vector.shape_cast %27 : vector<64x8xf32> to vector<4x16x8xf32>
    %29 = vector.extract_strided_slice %26 {offsets = [0, 0], sizes = [64, 8], strides = [1, 1]} : vector<64x32xf32> to vector<64x8xf32>
    %30 = vector.shape_cast %29 : vector<64x8xf32> to vector<4x16x8xf32>
    %31 = vector.extract_strided_slice %12 {offsets = [0, 0], sizes = [64, 8], strides = [1, 1]} : vector<64x32xf32> to vector<64x8xf32>
    %32 = vector.shape_cast %31 : vector<64x8xf32> to vector<4x16x8xf32>
    %cst_13 = arith.constant dense<0.000000e+00> : vector<4x16x16xf32>
    %33 = tpu.matmul %28, %30, %cst_13 {dimension_numbers = #tpu.dot_dimension_numbers<[2], [2], [1], [1], [0, 0, 0, 1, 1, 1], [0], [0]>, precision = #tpu.contract_precision<fp32>} : vector<4x16x8xf32>, vector<4x16x8xf32>, vector<4x16x16xf32> -> vector<4x16x16xf32>
    %c0_14 = arith.constant 0 : index
    %c0_15 = arith.constant 0 : index
    %c0_16 = arith.constant 0 : index
    %34 = vector.load %arg4[%c0_14, %c0_15, %c0_16] : memref<4x16x16xf32, #tpu.memory_space<vmem>>, vector<1x16x16xf32>
    %35 = vector.shape_cast %34 : vector<1x16x16xf32> to vector<16x16xf32>
    %36 = vector.shape_cast %35 : vector<16x16xf32> to vector<1x16x16xf32>
    %37 = vector.broadcast %36 : vector<1x16x16xf32> to vector<4x16x16xf32>
    %38 = arith.addf %33, %37 : vector<4x16x16xf32>
    %cst_17 = arith.constant dense<0xFF800000> : vector<4x16xf32>
    %39 = vector.multi_reduction <maximumf>, %38, %cst_17 [2] : vector<4x16x16xf32> to vector<4x16xf32>
    %40 = vector.shape_cast %39 : vector<4x16xf32> to vector<4x16x1xf32>
    %41 = vector.broadcast %40 : vector<4x16x1xf32> to vector<4x16x16xf32>
    %42 = arith.subf %38, %41 : vector<4x16x16xf32>
    %43 = math.exp %42 : vector<4x16x16xf32>
    %cst_18 = arith.constant dense<0.000000e+00> : vector<4x16xf32>
    %44 = vector.multi_reduction <add>, %43, %cst_18 [2] : vector<4x16x16xf32> to vector<4x16xf32>
    %45 = vector.shape_cast %44 : vector<4x16xf32> to vector<4x16x1xf32>
    %46 = tpu.reciprocal %45 {approx = true} : vector<4x16x1xf32> -> vector<4x16x1xf32>
    %47 = vector.broadcast %46 : vector<4x16x1xf32> to vector<4x16x16xf32>
    %48 = arith.mulf %43, %47 : vector<4x16x16xf32>
    %cst_19 = arith.constant dense<0.000000e+00> : vector<4x16x8xf32>
    %49 = tpu.matmul %48, %32, %cst_19 {dimension_numbers = #tpu.dot_dimension_numbers<[2], [1], [1], [2], [0, 0, 0, 1, 1, 2], [0], [0]>} : vector<4x16x16xf32>, vector<4x16x8xf32>, vector<4x16x8xf32> -> vector<4x16x8xf32>
    %50 = vector.shape_cast %49 : vector<4x16x8xf32> to vector<64x8xf32>
    %c0_20 = arith.constant 0 : index
    %c0_21 = arith.constant 0 : index
    %51 = vector.load %arg6[%c0_20, %c0_21] : memref<64x32xf32, #tpu.memory_space<vmem>>, vector<64x8xf32>
    tpu.vector_store %arg6[%c0_20, %c0_21], %50 {strides = array<i32>} : memref<64x32xf32, #tpu.memory_space<vmem>>, vector<64x8xf32>,
    %52 = vector.extract_strided_slice %22 {offsets = [0, 8], sizes = [64, 8], strides = [1, 1]} : vector<64x32xf32> to vector<64x8xf32>
    %53 = vector.shape_cast %52 : vector<64x8xf32> to vector<4x16x8xf32>
    %54 = vector.extract_strided_slice %26 {offsets = [0, 8], sizes = [64, 8], strides = [1, 1]} : vector<64x32xf32> to vector<64x8xf32>
    %55 = vector.shape_cast %54 : vector<64x8xf32> to vector<4x16x8xf32>
    %56 = vector.extract_strided_slice %12 {offsets = [0, 8], sizes = [64, 8], strides = [1, 1]} : vector<64x32xf32> to vector<64x8xf32>
    %57 = vector.shape_cast %56 : vector<64x8xf32> to vector<4x16x8xf32>
    %cst_22 = arith.constant dense<0.000000e+00> : vector<4x16x16xf32>
    %58 = tpu.matmul %53, %55, %cst_22 {dimension_numbers = #tpu.dot_dimension_numbers<[2], [2], [1], [1], [0, 0, 0, 1, 1, 1], [0], [0]>, precision = #tpu.contract_precision<fp32>} : vector<4x16x8xf32>, vector<4x16x8xf32>, vector<4x16x16xf32> -> vector<4x16x16xf32>
    %c1_23 = arith.constant 1 : index
    %c0_24 = arith.constant 0 : index
    %c0_25 = arith.constant 0 : index
    %59 = vector.load %arg4[%c1_23, %c0_24, %c0_25] : memref<4x16x16xf32, #tpu.memory_space<vmem>>, vector<1x16x16xf32>
    %60 = vector.shape_cast %59 : vector<1x16x16xf32> to vector<16x16xf32>
    %61 = vector.shape_cast %60 : vector<16x16xf32> to vector<1x16x16xf32>
    %62 = vector.broadcast %61 : vector<1x16x16xf32> to vector<4x16x16xf32>
    %63 = arith.addf %58, %62 : vector<4x16x16xf32>
    %cst_26 = arith.constant dense<0xFF800000> : vector<4x16xf32>
    %64 = vector.multi_reduction <maximumf>, %63, %cst_26 [2] : vector<4x16x16xf32> to vector<4x16xf32>
    %65 = vector.shape_cast %64 : vector<4x16xf32> to vector<4x16x1xf32>
    %66 = vector.broadcast %65 : vector<4x16x1xf32> to vector<4x16x16xf32>
    %67 = arith.subf %63, %66 : vector<4x16x16xf32>
    %68 = math.exp %67 : vector<4x16x16xf32>
    %cst_27 = arith.constant dense<0.000000e+00> : vector<4x16xf32>
    %69 = vector.multi_reduction <add>, %68, %cst_27 [2] : vector<4x16x16xf32> to vector<4x16xf32>
    %70 = vector.shape_cast %69 : vector<4x16xf32> to vector<4x16x1xf32>
    %71 = tpu.reciprocal %70 {approx = true} : vector<4x16x1xf32> -> vector<4x16x1xf32>
    %72 = vector.broadcast %71 : vector<4x16x1xf32> to vector<4x16x16xf32>
    %73 = arith.mulf %68, %72 : vector<4x16x16xf32>
    %cst_28 = arith.constant dense<0.000000e+00> : vector<4x16x8xf32>
    %74 = tpu.matmul %73, %57, %cst_28 {dimension_numbers = #tpu.dot_dimension_numbers<[2], [1], [1], [2], [0, 0, 0, 1, 1, 2], [0], [0]>} : vector<4x16x16xf32>, vector<4x16x8xf32>, vector<4x16x8xf32> -> vector<4x16x8xf32>
    %75 = vector.shape_cast %74 : vector<4x16x8xf32> to vector<64x8xf32>
    %c0_29 = arith.constant 0 : index
    %c8 = arith.constant 8 : index
    %76 = vector.load %arg6[%c0_29, %c8] : memref<64x32xf32, #tpu.memory_space<vmem>>, vector<64x8xf32>
    tpu.vector_store %arg6[%c0_29, %c8], %75 {strides = array<i32>} : memref<64x32xf32, #tpu.memory_space<vmem>>, vector<64x8xf32>,
    %77 = vector.extract_strided_slice %22 {offsets = [0, 16], sizes = [64, 8], strides = [1, 1]} : vector<64x32xf32> to vector<64x8xf32>
    %78 = vector.shape_cast %77 : vector<64x8xf32> to vector<4x16x8xf32>
    %79 = vector.extract_strided_slice %26 {offsets = [0, 16], sizes = [64, 8], strides = [1, 1]} : vector<64x32xf32> to vector<64x8xf32>
    %80 = vector.shape_cast %79 : vector<64x8xf32> to vector<4x16x8xf32>
    %81 = vector.extract_strided_slice %12 {offsets = [0, 16], sizes = [64, 8], strides = [1, 1]} : vector<64x32xf32> to vector<64x8xf32>
    %82 = vector.shape_cast %81 : vector<64x8xf32> to vector<4x16x8xf32>
    %cst_30 = arith.constant dense<0.000000e+00> : vector<4x16x16xf32>
    %83 = tpu.matmul %78, %80, %cst_30 {dimension_numbers = #tpu.dot_dimension_numbers<[2], [2], [1], [1], [0, 0, 0, 1, 1, 1], [0], [0]>, precision = #tpu.contract_precision<fp32>} : vector<4x16x8xf32>, vector<4x16x8xf32>, vector<4x16x16xf32> -> vector<4x16x16xf32>
    %c2_31 = arith.constant 2 : index
    %c0_32 = arith.constant 0 : index
    %c0_33 = arith.constant 0 : index
    %84 = vector.load %arg4[%c2_31, %c0_32, %c0_33] : memref<4x16x16xf32, #tpu.memory_space<vmem>>, vector<1x16x16xf32>
    %85 = vector.shape_cast %84 : vector<1x16x16xf32> to vector<16x16xf32>
    %86 = vector.shape_cast %85 : vector<16x16xf32> to vector<1x16x16xf32>
    %87 = vector.broadcast %86 : vector<1x16x16xf32> to vector<4x16x16xf32>
    %88 = arith.addf %83, %87 : vector<4x16x16xf32>
    %cst_34 = arith.constant dense<0xFF800000> : vector<4x16xf32>
    %89 = vector.multi_reduction <maximumf>, %88, %cst_34 [2] : vector<4x16x16xf32> to vector<4x16xf32>
    %90 = vector.shape_cast %89 : vector<4x16xf32> to vector<4x16x1xf32>
    %91 = vector.broadcast %90 : vector<4x16x1xf32> to vector<4x16x16xf32>
    %92 = arith.subf %88, %91 : vector<4x16x16xf32>
    %93 = math.exp %92 : vector<4x16x16xf32>
    %cst_35 = arith.constant dense<0.000000e+00> : vector<4x16xf32>
    %94 = vector.multi_reduction <add>, %93, %cst_35 [2] : vector<4x16x16xf32> to vector<4x16xf32>
    %95 = vector.shape_cast %94 : vector<4x16xf32> to vector<4x16x1xf32>
    %96 = tpu.reciprocal %95 {approx = true} : vector<4x16x1xf32> -> vector<4x16x1xf32>
    %97 = vector.broadcast %96 : vector<4x16x1xf32> to vector<4x16x16xf32>
    %98 = arith.mulf %93, %97 : vector<4x16x16xf32>
    %cst_36 = arith.constant dense<0.000000e+00> : vector<4x16x8xf32>
    %99 = tpu.matmul %98, %82, %cst_36 {dimension_numbers = #tpu.dot_dimension_numbers<[2], [1], [1], [2], [0, 0, 0, 1, 1, 2], [0], [0]>} : vector<4x16x16xf32>, vector<4x16x8xf32>, vector<4x16x8xf32> -> vector<4x16x8xf32>
    %100 = vector.shape_cast %99 : vector<4x16x8xf32> to vector<64x8xf32>
    %c0_37 = arith.constant 0 : index
    %c16 = arith.constant 16 : index
    %101 = vector.load %arg6[%c0_37, %c16] : memref<64x32xf32, #tpu.memory_space<vmem>>, vector<64x8xf32>
    tpu.vector_store %arg6[%c0_37, %c16], %100 {strides = array<i32>} : memref<64x32xf32, #tpu.memory_space<vmem>>, vector<64x8xf32>,
    %102 = vector.extract_strided_slice %22 {offsets = [0, 24], sizes = [64, 8], strides = [1, 1]} : vector<64x32xf32> to vector<64x8xf32>
    %103 = vector.shape_cast %102 : vector<64x8xf32> to vector<4x16x8xf32>
    %104 = vector.extract_strided_slice %26 {offsets = [0, 24], sizes = [64, 8], strides = [1, 1]} : vector<64x32xf32> to vector<64x8xf32>
    %105 = vector.shape_cast %104 : vector<64x8xf32> to vector<4x16x8xf32>
    %106 = vector.extract_strided_slice %12 {offsets = [0, 24], sizes = [64, 8], strides = [1, 1]} : vector<64x32xf32> to vector<64x8xf32>
    %107 = vector.shape_cast %106 : vector<64x8xf32> to vector<4x16x8xf32>
    %cst_38 = arith.constant dense<0.000000e+00> : vector<4x16x16xf32>
    %108 = tpu.matmul %103, %105, %cst_38 {dimension_numbers = #tpu.dot_dimension_numbers<[2], [2], [1], [1], [0, 0, 0, 1, 1, 1], [0], [0]>, precision = #tpu.contract_precision<fp32>} : vector<4x16x8xf32>, vector<4x16x8xf32>, vector<4x16x16xf32> -> vector<4x16x16xf32>
    %c3 = arith.constant 3 : index
    %c0_39 = arith.constant 0 : index
    %c0_40 = arith.constant 0 : index
    %109 = vector.load %arg4[%c3, %c0_39, %c0_40] : memref<4x16x16xf32, #tpu.memory_space<vmem>>, vector<1x16x16xf32>
    %110 = vector.shape_cast %109 : vector<1x16x16xf32> to vector<16x16xf32>
    %111 = vector.shape_cast %110 : vector<16x16xf32> to vector<1x16x16xf32>
    %112 = vector.broadcast %111 : vector<1x16x16xf32> to vector<4x16x16xf32>
    %113 = arith.addf %108, %112 : vector<4x16x16xf32>
    %cst_41 = arith.constant dense<0xFF800000> : vector<4x16xf32>
    %114 = vector.multi_reduction <maximumf>, %113, %cst_41 [2] : vector<4x16x16xf32> to vector<4x16xf32>
    %115 = vector.shape_cast %114 : vector<4x16xf32> to vector<4x16x1xf32>
    %116 = vector.broadcast %115 : vector<4x16x1xf32> to vector<4x16x16xf32>
    %117 = arith.subf %113, %116 : vector<4x16x16xf32>
    %118 = math.exp %117 : vector<4x16x16xf32>
    %cst_42 = arith.constant dense<0.000000e+00> : vector<4x16xf32>
    %119 = vector.multi_reduction <add>, %118, %cst_42 [2] : vector<4x16x16xf32> to vector<4x16xf32>
    %120 = vector.shape_cast %119 : vector<4x16xf32> to vector<4x16x1xf32>
    %121 = tpu.reciprocal %120 {approx = true} : vector<4x16x1xf32> -> vector<4x16x1xf32>
    %122 = vector.broadcast %121 : vector<4x16x1xf32> to vector<4x16x16xf32>
    %123 = arith.mulf %118, %122 : vector<4x16x16xf32>
    %cst_43 = arith.constant dense<0.000000e+00> : vector<4x16x8xf32>
    %124 = tpu.matmul %123, %107, %cst_43 {dimension_numbers = #tpu.dot_dimension_numbers<[2], [1], [1], [2], [0, 0, 0, 1, 1, 2], [0], [0]>} : vector<4x16x16xf32>, vector<4x16x8xf32>, vector<4x16x8xf32> -> vector<4x16x8xf32>
    %125 = vector.shape_cast %124 : vector<4x16x8xf32> to vector<64x8xf32>
    %c0_44 = arith.constant 0 : index
    %c24 = arith.constant 24 : index
    %126 = vector.load %arg6[%c0_44, %c24] : memref<64x32xf32, #tpu.memory_space<vmem>>, vector<64x8xf32>
    tpu.vector_store %arg6[%c0_44, %c24], %125 {strides = array<i32>} : memref<64x32xf32, #tpu.memory_space<vmem>>, vector<64x8xf32>,
    %c0_45 = arith.constant 0 : index
    %c0_46 = arith.constant 0 : index
    %127 = vector.load %arg6[%c0_45, %c0_46] : memref<64x32xf32, #tpu.memory_space<vmem>>, vector<64x32xf32>
    %cst_47 = arith.constant dense<0.000000e+00> : vector<64x32xf32>
    %128 = tpu.matmul %127, %2, %cst_47 {dimension_numbers = #tpu.dot_dimension_numbers<[1], [0], [0], [1], [0, 0, 1, 1], [], []>} : vector<64x32xf32>, vector<32x32xf32>, vector<64x32xf32> -> vector<64x32xf32>
    %129 = vector.broadcast %6 : vector<1x32xf32> to vector<64x32xf32>
    %130 = arith.addf %128, %129 : vector<64x32xf32>
    %c0_48 = arith.constant 0 : index
    %c0_49 = arith.constant 0 : index
    %131 = vector.load %arg5[%c0_48, %c0_49] : memref<64x32xf32, #tpu.memory_space<vmem>>, vector<64x32xf32>
    tpu.vector_store %arg5[%c0_48, %c0_49], %130 {strides = array<i32>} : memref<64x32xf32, #tpu.memory_space<vmem>>, vector<64x32xf32>,
    return
  }
  func.func @transform_0(%arg0: i32) -> (i32, i32) {
    %c0_i32 = arith.constant 0 : i32
    %c0_i32_0 = arith.constant 0 : i32
    return %arg0, %c0_i32 : i32, i32
  }
  func.func @transform_1(%arg0: i32) -> (i32, i32) {
    %c0_i32 = arith.constant 0 : i32
    %c0_i32_0 = arith.constant 0 : i32
    %c0_i32_1 = arith.constant 0 : i32
    return %c0_i32, %c0_i32_0 : i32, i32
  }
  func.func @transform_2(%arg0: i32) -> (i32, i32) {
    %c0_i32 = arith.constant 0 : i32
    %c0_i32_0 = arith.constant 0 : i32
    %c0_i32_1 = arith.constant 0 : i32
    return %c0_i32, %c0_i32_0 : i32, i32
  }
  func.func @transform_3(%arg0: i32) -> (i32, i32, i32) {
    %c0_i32 = arith.constant 0 : i32
    %c0_i32_0 = arith.constant 0 : i32
    %c0_i32_1 = arith.constant 0 : i32
    %c0_i32_2 = arith.constant 0 : i32
    return %c0_i32, %c0_i32_0, %c0_i32_1 : i32, i32, i32
  }
  func.func @transform_4(%arg0: i32) -> (i32, i32) {
    %c0_i32 = arith.constant 0 : i32
    %c0_i32_0 = arith.constant 0 : i32
    return %arg0, %c0_i32 : i32, i32
  }
}

</mosaic_0001>

<bundles_post_ra>
// kernel: tpu_custom_call.1
= control target key start
LH: loop header
LB: loop body
LE: loop exit
PB: predicated region body
PF: predicated region fallthrough
CT: control target
= control target key end

     0   :  { %9 = vsyncpa [#allocation4], 0  ;;  %s5690_s18 = smov [#allocation3]   ;;  %s5691_s20 = smov 128   ;;  %s7318_s0 = inlined_call_operand.vmem [shape: f32[64,32], index: 0, kind: input, shape index: {}]   ;;  %s7319_s1 = inlined_call_operand.vmem [shape: f32[32,160], index: 1, kind: input, shape index: {}]   ;;  %s7320_s2 = inlined_call_operand.vmem [shape: f32[3,96], index: 2, kind: input, shape index: {}]   ;;  %s7321_s3 = inlined_call_operand.hbm [shape: f32[4,16,16], index: 3, kind: input, shape index: {}]   ;;  %s7322_s4 = inlined_call_operand.vmem [shape: f32[64,32], index: 4, kind: output, shape index: {}]  }
   0x1   :  { %s20_s17 = sshll.u32 %s7321_s3, 4  ;;  %s22_s19 = sshll.u32 %s5690_s18, 4  ;;  %s21_s17 = int_to_ptr.hbm [resolvable:$true] %s20_s17  ;;  %s23_s19 = int_to_ptr.vmem [resolvable:$true] %s22_s19 }
   0x2   :  { %s5692_s21 = smov 8  }
   0x3   :  { %28 = dma.hbm_to_vmem [thread:$0]  %s21_s17, 1024, %s23_s19, [#allocation4], %s5691_s20, %s5691_s20, %s5692_s21  }
   0x4   :  { %5688 = dma.done.wait [#allocation4], 1024  }
   0x5   :  { %5689 = vsyncadd [#allocation4], 4294966272  ;;  %vm53_vm0 = vcmask 261120   ;;  %v44_v0 = vld [vmem:[%s7319_s1 + $0x30] sm:$0xff]  ;;  %v43_v1 = vld [vmem:[%s7319_s1 + $0x20] sm:$0xff]  ;;  %s5693_s28 = smov 96  }
   0x6   :  { %v5745_v2 = vld [vmem:[%s7319_s1 + $0x10] sm:$0xff]  ;;  %v5747_v3 = vand.u32 4294901760, %v44_v0  ;;  %v5749_v4 = vand.u32 4294901760, %v43_v1  ;;  %v5757_v6 = vld [vmem:[%s7319_s1] sm:$0xff]  ;;  %v36_v13 = vld [vmem:[%s7318_s0 + $0x18] sm:$0xff]  ;;  %s5694_s29 = smov 32  }
   0x7   :  { %v5752_v5 = vand.u32 4294901760, %v5745_v2  ;;  %v35_v7 = vld [vmem:[%s7318_s0 + $0x10] sm:$0xff]  ;;  %v37_v8 = vld [vmem:[%s7318_s0 + $0x20] sm:$0xff]  ;;  %v5766_v9 = vand.u32 4294901760, %v5757_v6  ;;  %v38_v14 = vld [vmem:[%s7318_s0 + $0x28] sm:$0xff]  ;;  %v64_v21 = vsel %vm53_vm0, %v36_v13, 0 }
   0x8   :  { %v61_v10 = vsel %vm53_vm0, %v35_v7, 0  ;;  %v67_v11 = vsel %vm53_vm0, %v37_v8, 0  ;;  %v39_v12 = vld [vmem:[%s7318_s0 + $0x30] sm:$0xff]  ;;  %5378 = vmatpush.msra.mxu1 %v5747_v3  ;;  %5379 = vmatpush.msra.mxu2 %v5747_v3  ;;  %v176_v18 = vsub.f32 %v44_v0, %v5747_v3  ;;  %v33_v19 = vld [vmem:[%s7318_s0] sm:$0xff]  ;;  %v70_v22 = vsel %vm53_vm0, %v38_v14, 0  ;;  %v40_v40 = vld [vmem:[%s7318_s0 + $0x38] sm:$0xff] }
   0x9   :  { %v5781_v15 = vand.u32 4294901760, %v61_v10  ;;  %v5783_v16 = vand.u32 4294901760, %v67_v11  ;;  %v73_v17 = vsel %vm53_vm0, %v39_v12, 0  ;;  %5380 = vmatpush.msra.mxu3 %v5747_v3  ;;  %91 = vmatpush.msra.mxu0 %v5747_v3  ;;  %v5797_v23 = vsub.f32 %v43_v1, %v5749_v4  ;;  %v34_v49 = vld [vmem:[%s7318_s0 + $0x8] sm:$0xff]  ;;  %s5695_s6 = smov 64   ;;  %s5696_s7 = smov 120  }
   0xa   :  { %v5791_v20 = vand.u32 4294901760, %v73_v17  ;;  %5381 = vmatpush.msra.mxu1 %v5749_v4  ;;  %5382 = vmatpush.msra.mxu2 %v5749_v4  ;;  %v177_v26 = vand.u32 4294901760, %v176_v18  ;;  %v5807_v27 = vand.u32 4294901760, %v64_v21  ;;  %v5814_v29 = vand.u32 4294901760, %v70_v22  ;;  %s5697_s8 = smov 88   ;;  %s5698_s9 = smov 56  }
   0xb   :  { %v5802_v24 = vsub.f32 %v61_v10, %v5781_v15  ;;  %v5805_v25 = vsub.f32 %v67_v11, %v5783_v16  ;;  %5383 = vmatpush.msra.mxu3 %v5749_v4  ;;  %93 = vmatpush.msra.mxu0 %v5749_v4  ;;  %v183_v30 = vand.u32 4294901760, %v5797_v23  ;;  %v55_v31 = vsel %vm53_vm0, %v33_v19, 0  ;;  %s5699_s10 = smov 80   ;;  %s5700_s11 = smov 112  }
   0xc   :  { %v5811_v28 = vsub.f32 %v73_v17, %v5791_v20  ;;  %5384 = vmatpush.msra.mxu1 %v5752_v5  ;;  %5385 = vmatpush.msra.mxu2 %v5752_v5  ;;  %v178_v34 = vsub.f32 %v176_v18, %v177_v26  ;;  %v5823_v35 = vsub.f32 %v64_v21, %v5807_v27  ;;  %v5832_v39 = vand.u32 4294901760, %v55_v31  ;;  %s5701_s12 = smov 48   ;;  %s5702_s13 = smov 104  }
   0xd   :  { %v116_v32 = vand.u32 4294901760, %v5802_v24  ;;  %v132_v33 = vand.u32 4294901760, %v5805_v25  ;;  %5386 = vmatpush.msra.mxu3 %v5752_v5  ;;  %95 = vmatpush.msra.mxu0 %v5752_v5  ;;  %v5829_v37 = vsub.f32 %v70_v22, %v5814_v29  ;;  %v184_v38 = vsub.f32 %v5797_v23, %v183_v30  ;;  %s5703_s14 = smov 72   ;;  %s5704_s15 = smov 40  }
   0xe   :  { %v148_v36 = vand.u32 4294901760, %v5811_v28  ;;  %5387 = vmatpush.msra.mxu1 %v5766_v9  ;;  %5388 = vmatpush.msra.mxu2 %v5766_v9  ;;  %v179_v43 = vand.u32 4294901760, %v178_v34  ;;  %v124_v44 = vand.u32 4294901760, %v5823_v35  ;;  %v99_v48 = vsub.f32 %v55_v31, %v5832_v39  ;;  %v45_v31 = vld [vmem:[%s7319_s1 + $0x8] sm:$0xff]  ;;  %s5705_s19 = smov 16  }
   0xf   :  { %v117_v41 = vsub.f32 %v5802_v24, %v116_v32  ;;  %v133_v42 = vsub.f32 %v5805_v25, %v132_v33  ;;  %5389 = vmatpush.msra.mxu3 %v5766_v9  ;;  %v140_v46 = vand.u32 4294901760, %v5829_v37  ;;  %97 = vmatpush.msra.mxu0 %v5766_v9  ;;  %v185_v47 = vand.u32 4294901760, %v184_v38 }
  0x10   :  { %v149_v45 = vsub.f32 %v5811_v28, %v148_v36  ;;  %180 = vmatpush.msrb.mxu1 %v179_v43  ;;  %246 = vmatpush.msrb.mxu2 %v176_v18  ;;  %v76_v52 = vsel %vm53_vm0, %v40_v40, 0  ;;  %v125_v54 = vsub.f32 %v5823_v35, %v124_v44  ;;  %v100_v55 = vand.u32 4294901760, %v99_v48 }
  0x11   :  { %v118_v50 = vand.u32 4294901760, %v117_v41  ;;  %v134_v51 = vand.u32 4294901760, %v133_v42  ;;  %v5860_v56 = vand.u32 4294901760, %v76_v52  ;;  %310 = vmatpush.msrb.mxu3 %v5747_v3  ;;  %381 = vmatpush.msrb.mxu0 %v177_v26  ;;  %v141_v57 = vsub.f32 %v5829_v37, %v140_v46 }
  0x12   :  { %v150_v53 = vand.u32 4294901760, %v149_v45  ;;  %v188_v58 = vsub.f32 %v5745_v2, %v5752_v5  ;;  %v194_v59 = vsub.f32 %v5757_v6, %v5766_v9  ;;  %v58_v60 = vsel %vm53_vm0, %v34_v49, 0  ;;  %186 = vmatpush.msrb.mxu1 %v185_v47  ;;  %249 = vmatpush.msrb.mxu2 %v5797_v23 }
  0x13   :  { %119 = vmatmul.f32.vlgmr.msra.gmra.mxu1 %v118_v50  ;;  %135 = vmatmul.f32.vlgmr.msra.gmra.mxu2 %v134_v51  ;;  %v101_v61 = vsub.f32 %v99_v48, %v100_v55  ;;  %v5872_v62 = vsub.f32 %v76_v52, %v5860_v56  ;;  %v5874_v63 = vand.u32 4294901760, %v58_v60  ;;  %v126_v8 = vand.u32 4294901760, %v125_v54 }
  0x14   :  { %151 = vmatmul.f32.vlgmr.msra.gmra.mxu3 %v150_v53  ;;  %v189_v0 = vand.u32 4294901760, %v188_v58  ;;  %v195_v1 = vand.u32 4294901760, %v194_v59  ;;  %385 = vmatpush.msrb.mxu0 %v183_v30  ;;  %v142_v10 = vand.u32 4294901760, %v141_v57  ;;  %v46_v30 = vld [vmem:[%s7319_s1 + $0x18] sm:$0xff] }
  0x15   :  { %312 = vmatpush.msrb.mxu3 %v5749_v4  ;;  %v102_v2 = vand.u32 4294901760, %v101_v61  ;;  %v156_v7 = vand.u32 4294901760, %v5872_v62  ;;  %v107_v6 = vsub.f32 %v58_v60, %v5874_v63  ;;  %252 = vmatpush.msrb.mxu2 %v188_v58 }
  0x16   :  { %v190_v11 = vsub.f32 %v188_v58, %v189_v0  ;;  %v196_v12 = vsub.f32 %v194_v59, %v195_v1  ;;  %389 = vmatpush.msrb.mxu0 %v189_v0 }
  0x17   :  { %314 = vmatpush.msrb.mxu3 %v5752_v5  ;;  %103 = vmatmul.f32.vlgmr.msra.gmra.mxu0 %v102_v2  ;;  %v157_v13 = vsub.f32 %v5872_v62, %v156_v7  ;;  %v108_v14 = vand.u32 4294901760, %v107_v6 }
  0x18   :  { %v191_v17 = vand.u32 4294901760, %v190_v11  ;;  %255 = vmatpush.msrb.mxu2 %v194_v59  ;;  %v197_v19 = vand.u32 4294901760, %v196_v12  ;;  %393 = vmatpush.msrb.mxu0 %v195_v1 }
  0x19   :  { %316 = vmatpush.msrb.mxu3 %v5766_v9  ;;  %v158_v18 = vand.u32 4294901760, %v157_v13  ;;  %v109_v21 = vsub.f32 %v107_v6, %v108_v14 }
  0x1a   :  { %192 = vmatpush.msrb.mxu1 %v191_v17 }
  0x1b   :  { %127 = vmatmul.f32.gmra.mxu1 %v126_v8  ;;  %143 = vmatmul.f32.gmra.mxu2 %v142_v10  ;;  %v110_v22 = vand.u32 4294901760, %v109_v21 }
  0x1c   :  { %159 = vmatmul.f32.gmra.mxu3 %v158_v18  ;;  %198 = vmatpush.msrb.mxu1 %v197_v19 }
  0x1e   :  { %440 = vmatpush.msra.mxu1 %v5747_v3 }
  0x1f   :  { %111 = vmatmul.f32.gmra.mxu0 %v110_v22 }
  0x20   :  { %442 = vmatpush.msra.mxu1 %v5749_v4 }
  0x22   :  { %444 = vmatpush.msra.mxu1 %v5752_v5 }
  0x23   :  { %200 = vmatmul.f32.vlgmr.msrb.gmra.mxu1 %v5832_v39  ;;  %258 = vmatmul.f32.vlgmr.msrb.gmra.mxu2 %v99_v48 }
  0x24   :  { %320 = vmatmul.f32.vlgmr.msrb.gmra.mxu3 %v100_v55  ;;  %446 = vmatpush.msra.mxu1 %v5766_v9 }
  0x27   :  { %395 = vmatmul.f32.vlgmr.msrb.gmra.mxu0 %v5832_v39 }
  0x2b   :  { %204 = vmatmul.f32.gmra.mxu1 %v5874_v63  ;;  %263 = vmatmul.f32.gmra.mxu2 %v107_v6 }
  0x2c   :  { %326 = vmatmul.f32.gmra.mxu3 %v108_v14 }
  0x2f   :  { %399 = vmatmul.f32.gmra.mxu0 %v5874_v63 }
  0x33   :  { %208 = vmatmul.f32.gmra.mxu1 %v5781_v15  ;;  %268 = vmatmul.f32.gmra.mxu2 %v5802_v24 }
  0x34   :  { %332 = vmatmul.f32.gmra.mxu3 %v116_v32 }
  0x37   :  { %403 = vmatmul.f32.gmra.mxu0 %v5781_v15 }
  0x3b   :  { %212 = vmatmul.f32.gmra.mxu1 %v5807_v27  ;;  %273 = vmatmul.f32.gmra.mxu2 %v5823_v35 }
  0x3c   :  { %338 = vmatmul.f32.gmra.mxu3 %v124_v44 }
  0x3f   :  { %407 = vmatmul.f32.gmra.mxu0 %v5807_v27 }
  0x43   :  { %216 = vmatmul.f32.gmra.mxu1 %v5783_v16  ;;  %278 = vmatmul.f32.gmra.mxu2 %v5805_v25 }
  0x44   :  { %344 = vmatmul.f32.gmra.mxu3 %v132_v33 }
  0x47   :  { %411 = vmatmul.f32.gmra.mxu0 %v5783_v16 }
  0x4b   :  { %220 = vmatmul.f32.gmra.mxu1 %v5814_v29  ;;  %283 = vmatmul.f32.gmra.mxu2 %v5829_v37  ;;  %v5952_v37 = vld [vmem:[%s7320_s2] ss:$0 sm:$0xff] }
  0x4c   :  { %350 = vmatmul.f32.gmra.mxu3 %v140_v46 }
  0x4f   :  { %415 = vmatmul.f32.gmra.mxu0 %v5814_v29 }
  0x53   :  { %224 = vmatmul.f32.gmra.mxu1 %v5791_v20  ;;  %288 = vmatmul.f32.gmra.mxu2 %v5811_v28 }
  0x54   :  { %356 = vmatmul.f32.gmra.mxu3 %v148_v36 }
  0x57   :  { %419 = vmatmul.f32.gmra.mxu0 %v5791_v20 }
  0x5b   :  { %228 = vmatmul.f32.gmra.mxu1 %v5860_v56  ;;  %293 = vmatmul.f32.gmra.mxu2 %v5872_v62 }
  0x5c   :  { %362 = vmatmul.f32.gmra.mxu3 %v156_v7 }
  0x5f   :  { %423 = vmatmul.f32.gmra.mxu0 %v5860_v56 }
  0x63   :  { %448 = vmatmul.f32.vlgmr.msra.gmra.mxu1 %v5832_v39 }
  0x6b   :  { %452 = vmatmul.f32.gmra.mxu1 %v5874_v63 }
  0x73   :  { %456 = vmatmul.f32.gmra.mxu1 %v5781_v15 }
  0x7b   :  { %460 = vmatmul.f32.gmra.mxu1 %v5807_v27 }
  0x83   :  { %464 = vmatmul.f32.gmra.mxu1 %v5783_v16  ;;  %v48_v16 = vld [vmem:[%s7319_s1 + $0x38] sm:$0xff] }
  0x84   :  { %524 = vmatpush.msra.mxu2 %v48_v16  ;;  %597 = vmatpush.msra.mxu3 %v48_v16 }
  0x8b   :  { %468 = vmatmul.f32.gmra.mxu1 %v5814_v29 }
  0x90   :  { %v120_v3 = vpop.f32.mrf.mxu1 }
  0x93   :  { %472 = vmatmul.f32.gmra.mxu1 %v5791_v20  ;;  %v47_v20 = vld [vmem:[%s7319_s1 + $0x28] sm:$0xff] }
  0x94   :  { %v104_v26 = vpop.f32.mrf.mxu0  ;;  %525 = vmatpush.msra.mxu2 %v47_v20  ;;  %598 = vmatpush.msra.mxu3 %v47_v20 }
  0x95   :  { %v105_v40 = vadd.f32 %v5952_v37, %v104_v26 }
  0x96   :  { %v5927_v24 = vpop.f32.mrf.mxu2  ;;  %526 = vmatpush.msra.mxu2 %v46_v30  ;;  %599 = vmatpush.msra.mxu3 %v46_v30 }
  0x97   :  { %v5929_v25 = vpop.f32.mrf.mxu3  ;;  %v137_v17 = vadd.f32 %v5952_v37, %v5927_v24 }
  0x98   :  { %v128_v4 = vpop.f32.mrf.mxu1  ;;  %527 = vmatpush.msra.mxu2 %v45_v31  ;;  %600 = vmatpush.msra.mxu3 %v45_v31 }
  0x99   :  { %v129_v2 = vadd.f32 %v5952_v37, %v128_v4 }
  0x9b   :  { %476 = vmatmul.f32.gmra.mxu1 %v5860_v56  ;;  %v121_v56 = vadd.f32 %v5952_v37, %v120_v3 }
  0x9c   :  { %v112_v32 = vpop.f32.mrf.mxu0 }
  0x9d   :  { %v113_v46 = vadd.f32 %v5952_v37, %v112_v32 }
  0x9e   :  { %v5931_v27 = vpop.f32.mrf.mxu2 }
  0x9f   :  { %v5939_v28 = vpop.f32.mrf.mxu3  ;;  %v145_v24 = vadd.f32 %v5952_v37, %v5931_v27 }
  0xa0   :  { %v201_v5 = vpop.f32.mrf.mxu1 }
  0xa1   :  { %v202_v42 = vadd.f32 %v201_v5, %v105_v40 }
  0xa4   :  { %v396_v36 = vpop.f32.mrf.mxu0 }
  0xa6   :  { %v259_v33 = vpop.f32.mrf.mxu2 }
  0xa7   :  { %v321_v35 = vpop.f32.mrf.mxu3  ;;  %v260_v43 = vadd.f32 %v259_v33, %v202_v42 }
  0xa8   :  { %v205_v9 = vpop.f32.mrf.mxu1 }
  0xa9   :  { %v322_v48 = vadd.f32 %v321_v35, %v260_v43  ;;  %v206_v49 = vadd.f32 %v205_v9, %v113_v46 }
  0xab   :  { %v397_v51 = vadd.f32 %v396_v36, %v322_v48 }
  0xac   :  { %v400_v44 = vpop.f32.mrf.mxu0 }
  0xae   :  { %v264_v38 = vpop.f32.mrf.mxu2 }
  0xaf   :  { %v327_v41 = vpop.f32.mrf.mxu3  ;;  %v265_v52 = vadd.f32 %v264_v38, %v206_v49  ;;  %v153_v38 = vadd.f32 %v5952_v37, %v5929_v25  ;;  %v161_v25 = vadd.f32 %v5952_v37, %v5939_v28 }
  0xb0   :  { %v209_v23 = vpop.f32.mrf.mxu1 }
  0xb1   :  { %v328_v57 = vadd.f32 %v327_v41, %v265_v52  ;;  %v210_v60 = vadd.f32 %v209_v23, %v121_v56 }
  0xb3   :  { %v401_v61 = vadd.f32 %v400_v44, %v328_v57 }
  0xb4   :  { %v404_v55 = vpop.f32.mrf.mxu0 }
  0xb6   :  { %v269_v47 = vpop.f32.mrf.mxu2 }
  0xb7   :  { %v333_v50 = vpop.f32.mrf.mxu3  ;;  %v270_v62 = vadd.f32 %v269_v47, %v210_v60 }
  0xb8   :  { %v213_v15 = vpop.f32.mrf.mxu1 }
  0xb9   :  { %v334_v7 = vadd.f32 %v333_v50, %v270_v62  ;;  %v214_v10 = vadd.f32 %v213_v15, %v129_v2 }
  0xbb   :  { %v405_v12 = vadd.f32 %v404_v55, %v334_v7 }
  0xbc   :  { %v408_v8 = vpop.f32.mrf.mxu0 }
  0xbe   :  { %v274_v59 = vpop.f32.mrf.mxu2 }
  0xbf   :  { %v339_v63 = vpop.f32.mrf.mxu3  ;;  %v275_v13 = vadd.f32 %v274_v59, %v214_v10 }
  0xc0   :  { %v217_v29 = vpop.f32.mrf.mxu1 }
  0xc1   :  { %v340_v21 = vadd.f32 %v339_v63, %v275_v13  ;;  %v218_v3 = vadd.f32 %v217_v29, %v137_v17 }
  0xc3   :  { %v409_v5 = vadd.f32 %v408_v8, %v340_v21 }
  0xc4   :  { %v412_v4 = vpop.f32.mrf.mxu0 }
  0xc6   :  { %v279_v11 = vpop.f32.mrf.mxu2 }
  0xc7   :  { %v345_v19 = vpop.f32.mrf.mxu3  ;;  %v280_v9 = vadd.f32 %v279_v11, %v218_v3 }
  0xc8   :  { %v5947_v34 = vpop.f32.mrf.mxu1 }
  0xc9   :  { %v346_v16 = vadd.f32 %v345_v19, %v280_v9  ;;  %v222_v29 = vadd.f32 %v5947_v34, %v145_v24 }
  0xcb   :  { %v413_v31 = vadd.f32 %v412_v4, %v346_v16 }
  0xcc   :  { %v416_v33 = vpop.f32.mrf.mxu0 }
  0xce   :  { %v284_v23 = vpop.f32.mrf.mxu2 }
  0xcf   :  { %v351_v30 = vpop.f32.mrf.mxu3  ;;  %v285_v32 = vadd.f32 %v284_v23, %v222_v29 }
  0xd0   :  { %v5954_v39 = vpop.f32.mrf.mxu1 }
  0xd1   :  { %v352_v40 = vadd.f32 %v351_v30, %v285_v32  ;;  %v226_v34 = vadd.f32 %v5954_v39, %v153_v38 }
  0xd3   :  { %v417_v43 = vadd.f32 %v416_v33, %v352_v40 }
  0xd4   :  { %v420_v48 = vpop.f32.mrf.mxu0 }
  0xd6   :  { %v289_v27 = vpop.f32.mrf.mxu2 }
  0xd7   :  { %v357_v42 = vpop.f32.mrf.mxu3  ;;  %v290_v44 = vadd.f32 %v289_v27, %v226_v34 }
  0xd8   :  { %v5957_v45 = vpop.f32.mrf.mxu1 }
  0xd9   :  { %v358_v49 = vadd.f32 %v357_v42, %v290_v44  ;;  %v230_v39 = vadd.f32 %v5957_v45, %v161_v25 }
  0xdb   :  { %v421_v52 = vadd.f32 %v420_v48, %v358_v49 }
  0xdc   :  { %v424_v37 = vpop.f32.mrf.mxu0 }
  0xdf   :  { %v363_v55 = vpop.f32.mrf.mxu3 }
  0xe0   :  { %v449_v53 = vpop.f32.mrf.mxu1 }
  0xe1   :  { %v5960_v54 = vadd.f32 %v449_v53, %v397_v51  ;;  %v294_v51 = vpop.f32.mrf.mxu2 }
  0xe2   :  { %v295_v53 = vadd.f32 %v294_v51, %v230_v39 }
  0xe3   :  { %v480_v58 = vmul.f32 %v5960_v54, %v5960_v54 }
  0xe5   :  { %553 = vrot.lane.b32.xlu0 %v480_v58, %s5693_s28  ;;  %5322 = vmatmul.msk.f32.vlgmr.msra.gmra.mxu2 %vm53_vm0, %v480_v58  ;;  %v364_v58 = vadd.f32 %v363_v55, %v295_v53 }
  0xe7   :  { %v425_v45 = vadd.f32 %v424_v37, %v364_v58 }
  0xe8   :  { %v453_v0 = vpop.f32.mrf.mxu1 }
  0xe9   :  { %v5967_v1 = vadd.f32 %v453_v0, %v401_v61 }
  0xeb   :  { %v481_v6 = vmul.f32 %v5967_v1, %v5967_v1 }
  0xed   :  { %555 = vrot.lane.b32.xlu0 %v481_v6, %s5693_s28  ;;  %5323 = vmatmul.msk.f32.gmra.mxu2 %vm53_vm0, %v481_v6 }
  0xf0   :  { %v457_v14 = vpop.f32.mrf.mxu1 }
  0xf1   :  { %v5976_v18 = vadd.f32 %v457_v14, %v405_v12 }
  0xf3   :  { %v482_v22 = vmul.f32 %v5976_v18, %v5976_v18 }
  0xf5   :  { %557 = vrot.lane.b32.xlu1 %v482_v22, %s5693_s28  ;;  %5324 = vmatmul.msk.f32.gmra.mxu2 %vm53_vm0, %v482_v22 }
  0xf8   :  { %v461_v15 = vpop.f32.mrf.mxu1 }
  0xf9   :  { %v5984_v26 = vadd.f32 %v461_v15, %v409_v5 }
  0xfb   :  { %v483_v20 = vmul.f32 %v5984_v26, %v5984_v26 }
  0xfd   :  { %559 = vrot.lane.b32.xlu1 %v483_v20, %s5693_s28  ;;  %5325 = vmatmul.msk.f32.gmra.mxu2 %vm53_vm0, %v483_v20 }
 0x100   :  { %v465_v35 = vpop.f32.mrf.mxu1 }
 0x101   :  { %v5991_v36 = vadd.f32 %v465_v35, %v413_v31 }
 0x103   :  { %v484_v41 = vmul.f32 %v5991_v36, %v5991_v36 }
 0x105   :  { %561 = vrot.lane.b32.xlu2 %v484_v41, %s5693_s28  ;;  %5326 = vmatmul.msk.f32.gmra.mxu2 %vm53_vm0, %v484_v41 }
 0x108   :  { %v469_v46 = vpop.f32.mrf.mxu1 }
 0x109   :  { %v6000_v47 = vadd.f32 %v469_v46, %v417_v43 }
 0x10b   :  { %v485_v50 = vmul.f32 %v6000_v47, %v6000_v47 }
 0x10d   :  { %563 = vrot.lane.b32.xlu2 %v485_v50, %s5693_s28  ;;  %5327 = vmatmul.msk.f32.gmra.mxu2 %vm53_vm0, %v485_v50 }
 0x110   :  { %v473_v56 = vpop.f32.mrf.mxu1 }
 0x111   :  { %v6009_v57 = vadd.f32 %v473_v56, %v421_v52 }
 0x113   :  { %v486_v28 = vmul.f32 %v6009_v57, %v6009_v57 }
 0x115   :  { %565 = vrot.lane.b32.xlu0 %v486_v28, %s5693_s28  ;;  %5328 = vmatmul.msk.f32.gmra.mxu2 %vm53_vm0, %v486_v28 }
 0x118   :  { %v477_v59 = vpop.f32.mrf.mxu1 }
 0x119   :  { %v6015_v60 = vadd.f32 %v477_v59, %v425_v45 }
 0x11b   :  { %v487_v61 = vmul.f32 %v6015_v60, %v6015_v60 }
 0x11d   :  { %567 = vrot.lane.b32.xlu1 %v487_v61, %s5693_s28  ;;  %5329 = vmatmul.msk.f32.gmra.mxu2 %vm53_vm0, %v487_v61 }
 0x157   :  { %v554_v62 = vpop.permute.xlu0 %553 }
 0x158   :  { %5330 = vmatmul.msk.f32.vlgmr.msra.gmra.mxu3 %vm53_vm0, %v554_v62 }
 0x15f   :  { %v556_v63 = vpop.permute.xlu0 %555  ;;  %v562_v7 = vpop.permute.xlu2 %561 }
 0x160   :  { %5331 = vmatmul.msk.f32.gmra.mxu3 %vm53_vm0, %v556_v63 }
 0x167   :  { %v558_v0 = vpop.permute.xlu1 %557  ;;  %v564_v6 = vpop.permute.xlu2 %563 }
 0x168   :  { %5332 = vmatmul.msk.f32.gmra.mxu3 %vm53_vm0, %v558_v0 }
 0x16f   :  { %v560_v2 = vpop.permute.xlu1 %559 }
 0x170   :  { %5333 = vmatmul.msk.f32.gmra.mxu3 %vm53_vm0, %v560_v2 }
 0x178   :  { %5334 = vmatmul.msk.f32.gmra.mxu3 %vm53_vm0, %v562_v7 }
 0x180   :  { %5335 = vmatmul.msk.f32.gmra.mxu3 %vm53_vm0, %v564_v6 }
 0x187   :  { %v566_v8 = vpop.permute.xlu0 %565 }
 0x188   :  { %5336 = vmatmul.msk.f32.gmra.mxu3 %vm53_vm0, %v566_v8 }
 0x18f   :  { %v568_v10 = vpop.permute.xlu1 %567 }
 0x190   :  { %5337 = vmatmul.msk.f32.gmra.mxu3 %vm53_vm0, %v568_v10 }
 0x1db   :  { %v602_v11 = vpop.f32.mrf.mxu3 }
 0x1dc   :  { %v731_v12 = vmax.f32 %v602_v11, 1e-24 }
 0x1de   :  { %5500 = vrsqrt.f32 %v731_v12  ;;  %vm745_vm2 = vweird.f32 %v731_v12 }
 0x1e3   :  { %v605_v13 = vpop.f32.mrf.mxu3 }
 0x1e4   :  { %v5501_v14 = vpop.eup %5500  ;;  %v732_v17 = vmax.f32 %v605_v13, 1e-24 }
 0x1e5   :  { %v740_v19 = vmul.f32 %v5501_v14, %v731_v12  ;;  %vm746_vm1 = vweird.f32 %v5501_v14 }
 0x1e6   :  { %5502 = vrsqrt.f32 %v732_v17  ;;  %vm747_vm3 = vmor %vm745_vm2, %vm746_vm1  ;;  %vm755_vm5 = vweird.f32 %v732_v17 }
 0x1e7   :  { %v741_v21 = vmul.f32 %v5501_v14, %v740_v19 }
 0x1e9   :  { %v742_v22 = vmul.f32 0.5, %v741_v21 }
 0x1eb   :  { %v608_v3 = vpop.f32.mrf.mxu3  ;;  %v743_v4 = vsub.f32 1.5, %v742_v22 }
 0x1ec   :  { %v5503_v5 = vpop.eup %5502  ;;  %v733_v9 = vmax.f32 %v608_v3, 1e-24 }
 0x1ed   :  { %v750_v23 = vmul.f32 %v5503_v5, %v732_v17  ;;  %v744_v15 = vmul.f32 %v5501_v14, %v743_v4  ;;  %vm756_vm4 = vweird.f32 %v5503_v5 }
 0x1ee   :  { %5504 = vrsqrt.f32 %v733_v9  ;;  %vm757_vm6 = vmor %vm755_vm5, %vm756_vm4  ;;  %vm765_vm8 = vweird.f32 %v733_v9 }
 0x1ef   :  { %v751_v24 = vmul.f32 %v5503_v5, %v750_v23  ;;  %v748_v16 = vsel %vm747_vm3, %v5501_v14, %v744_v15 }
 0x1f0   :  { %827 = vrot.lane.b32.xlu0 %v748_v16, %s5694_s29 }
 0x1f1   :  { %v752_v20 = vmul.f32 0.5, %v751_v24 }
 0x1f3   :  { %v611_v30 = vpop.f32.mrf.mxu3  ;;  %v753_v29 = vsub.f32 1.5, %v752_v20 }
 0x1f4   :  { %v5505_v31 = vpop.eup %5504  ;;  %v734_v32 = vmax.f32 %v611_v30, 1e-24 }
 0x1f5   :  { %v760_v33 = vmul.f32 %v5505_v31, %v733_v9  ;;  %v754_v35 = vmul.f32 %v5503_v5, %v753_v29  ;;  %vm766_vm7 = vweird.f32 %v5505_v31 }
 0x1f6   :  { %5506 = vrsqrt.f32 %v734_v32  ;;  %vm767_vm9 = vmor %vm765_vm8, %vm766_vm7  ;;  %vm775_vm11 = vweird.f32 %v734_v32 }
 0x1f7   :  { %v761_v27 = vmul.f32 %v5505_v31, %v760_v33  ;;  %v758_v38 = vsel %vm757_vm6, %v5503_v5, %v754_v35 }
 0x1f8   :  { %829 = vrot.lane.b32.xlu2 %v758_v38, %s5694_s29 }
 0x1f9   :  { %v762_v40 = vmul.f32 0.5, %v761_v27 }
 0x1fb   :  { %v614_v41 = vpop.f32.mrf.mxu3  ;;  %v763_v34 = vsub.f32 1.5, %v762_v40 }
 0x1fc   :  { %v5507_v42 = vpop.eup %5506  ;;  %v735_v61 = vmax.f32 %v614_v41, 1e-24  ;;  %v529_v41 = vpop.f32.mrf.mxu2 }
 0x1fd   :  { %v770_v43 = vmul.f32 %v5507_v42, %v734_v32  ;;  %v764_v44 = vmul.f32 %v5505_v31, %v763_v34  ;;  %vm776_vm10 = vweird.f32 %v5507_v42  ;;  %v626_v34 = vmax.f32 %v529_v41, 1e-24 }
 0x1fe   :  { %vm777_vm12 = vmor %vm775_vm11, %vm776_vm10  ;;  %vm785_vm2 = vweird.f32 %v735_v61 }
 0x1ff   :  { %v771_v46 = vmul.f32 %v5507_v42, %v770_v43  ;;  %v768_v48 = vsel %vm767_vm9, %v5505_v31, %v764_v44  ;;  %vm640_vm11 = vweird.f32 %v626_v34 }
 0x200   :  { %831 = vrot.lane.b32.xlu2 %v768_v48, %s5694_s29 }
 0x201   :  { %v772_v25 = vmul.f32 0.5, %v771_v46 }
 0x203   :  { %v617_v49 = vpop.f32.mrf.mxu3  ;;  %v773_v50 = vsub.f32 1.5, %v772_v25 }
 0x204   :  { %v736_v51 = vmax.f32 %v617_v49, 1e-24 }
 0x205   :  { %v774_v39 = vmul.f32 %v5507_v42, %v773_v50 }
 0x206   :  { %5508 = vrsqrt.f32 %v736_v51  ;;  %vm795_vm14 = vweird.f32 %v736_v51 }
 0x207   :  { %v778_v52 = vsel %vm777_vm12, %v5507_v42, %v774_v39  ;;  %5510 = vrsqrt.f32 %v735_v61  ;;  %v532_v42 = vpop.f32.mrf.mxu2 }
 0x208   :  { %833 = vrot.lane.b32.xlu1 %v778_v52, %s5694_s29  ;;  %v627_v43 = vmax.f32 %v532_v42, 1e-24 }
 0x20b   :  { %v620_v59 = vpop.f32.mrf.mxu3 }
 0x20c   :  { %v5509_v53 = vpop.eup %5508  ;;  %v737_v23 = vmax.f32 %v620_v59, 1e-24 }
 0x20d   :  { %v790_v55 = vmul.f32 %v5509_v53, %v736_v51  ;;  %vm796_vm13 = vweird.f32 %v5509_v53  ;;  %v5511_v0 = vpop.eup %5510 }
 0x20e   :  { %vm797_vm15 = vmor %vm795_vm14, %vm796_vm13  ;;  %v780_v2 = vmul.f32 %v5511_v0, %v735_v61  ;;  %vm786_vm1 = vweird.f32 %v5511_v0  ;;  %vm805_vm8 = vweird.f32 %v737_v23  ;;  %vm650_vm14 = vweird.f32 %v627_v43 }
 0x20f   :  { %v791_v56 = vmul.f32 %v5509_v53, %v790_v55  ;;  %vm787_vm3 = vmor %vm785_vm2, %vm786_vm1  ;;  %v535_v51 = vpop.f32.mrf.mxu2  ;;  %vm867_vm1 = vcmask 64512  }
 0x210   :  { %v781_v7 = vmul.f32 %v5511_v0, %v780_v2 }
 0x211   :  { %v792_v58 = vmul.f32 0.5, %v791_v56 }
 0x212   :  { %v782_v10 = vmul.f32 0.5, %v781_v7 }
 0x213   :  { %v793_v28 = vsub.f32 1.5, %v792_v58  ;;  %v623_v62 = vpop.f32.mrf.mxu3  ;;  %v6065_v58 = vld [vmem:[%s7320_s2 + $0x1] ss:$0 sm:$0xff] }
 0x214   :  { %v738_v63 = vmax.f32 %v623_v62, 1e-24  ;;  %v783_v14 = vsub.f32 1.5, %v782_v10 }
 0x215   :  { %v794_v37 = vmul.f32 %v5509_v53, %v793_v28 }
 0x216   :  { %5512 = vrsqrt.f32 %v738_v63  ;;  %v784_v17 = vmul.f32 %v5511_v0, %v783_v14  ;;  %vm815_vm5 = vweird.f32 %v738_v63 }
 0x217   :  { %v798_v45 = vsel %vm797_vm15, %v5509_v53, %v794_v37  ;;  %5514 = vrsqrt.f32 %v737_v23  ;;  %v628_v53 = vmax.f32 %v535_v51, 1e-24 }
 0x218   :  { %837 = vrot.lane.b32.xlu2 %v798_v45, %s5694_s29  ;;  %v788_v3 = vsel %vm787_vm3, %v5511_v0, %v784_v17  ;;  %5516 = vrsqrt.f32 %v626_v34  ;;  %v538_v45 = vpop.f32.mrf.mxu2 }
 0x219   :  { %5518 = vrsqrt.f32 %v627_v43  ;;  %v6068_v61 = vmax.f32 %v538_v45, 1e-24  ;;  %vm660_vm3 = vweird.f32 %v628_v53 }
 0x21a   :  { %5520 = vrsqrt.f32 %v628_v53 }
 0x21b   :  { %5522 = vrsqrt.f32 %v6068_v61 }
 0x21c   :  { %v5513_v6 = vpop.eup %5512 }
 0x21d   :  { %v810_v8 = vmul.f32 %v5513_v6, %v738_v63  ;;  %vm816_vm4 = vweird.f32 %v5513_v6  ;;  %v5515_v16 = vpop.eup %5514 }
 0x21e   :  { %vm817_vm6 = vmor %vm815_vm5, %vm816_vm4  ;;  %v800_v20 = vmul.f32 %v5515_v16, %v737_v23  ;;  %vm806_vm7 = vweird.f32 %v5515_v16  ;;  %v5517_v44 = vpop.eup %5516 }
 0x21f   :  { %v811_v13 = vmul.f32 %v5513_v6, %v810_v8  ;;  %vm807_vm9 = vmor %vm805_vm8, %vm806_vm7  ;;  %v635_v46 = vmul.f32 %v5517_v44, %v626_v34  ;;  %v5519_v25 = vpop.eup %5518  ;;  %vm641_vm10 = vweird.f32 %v5517_v44 }
 0x220   :  { %v801_v31 = vmul.f32 %v5515_v16, %v800_v20  ;;  %v645_v50 = vmul.f32 %v5519_v25, %v627_v43  ;;  %vm642_vm12 = vmor %vm640_vm11, %vm641_vm10  ;;  %vm651_vm13 = vweird.f32 %v5519_v25  ;;  %v5521_v63 = vpop.eup %5520 }
 0x221   :  { %v812_v19 = vmul.f32 0.5, %v811_v13  ;;  %v636_v48 = vmul.f32 %v5517_v44, %v635_v46  ;;  %vm652_vm15 = vmor %vm650_vm14, %vm651_vm13  ;;  %v655_v7 = vmul.f32 %v5521_v63, %v628_v53  ;;  %v6080_v17 = vpop.eup %5522  ;;  %vm661_vm2 = vweird.f32 %v5521_v63 }
 0x222   :  { %v802_v32 = vmul.f32 0.5, %v801_v31  ;;  %v646_v52 = vmul.f32 %v5519_v25, %v645_v50  ;;  %vm662_vm4 = vmor %vm660_vm3, %vm661_vm2  ;;  %vm671_vm5 = vweird.f32 %v6080_v17 }
 0x223   :  { %v813_v4 = vsub.f32 1.5, %v812_v19  ;;  %v637_v49 = vmul.f32 0.5, %v636_v48  ;;  %v656_v14 = vmul.f32 %v5521_v63, %v655_v7 }
 0x224   :  { %v803_v27 = vsub.f32 1.5, %v802_v32  ;;  %v647_v56 = vmul.f32 0.5, %v646_v52 }
 0x225   :  { %v814_v5 = vmul.f32 %v5513_v6, %v813_v4  ;;  %v638_v39 = vsub.f32 1.5, %v637_v49 }
 0x226   :  { %v804_v38 = vmul.f32 %v5515_v16, %v803_v27  ;;  %v648_v37 = vsub.f32 1.5, %v647_v56 }
 0x227   :  { %v818_v24 = vsel %vm817_vm6, %v5513_v6, %v814_v5  ;;  %v639_v55 = vmul.f32 %v5517_v44, %v638_v39  ;;  %v657_v5 = vmul.f32 0.5, %v656_v14  ;;  %vm670_vm6 = vweird.f32 %v6068_v61 }
 0x228   :  { %v808_v40 = vsel %vm807_vm9, %v5515_v16, %v804_v38  ;;  %v649_v62 = vmul.f32 %v5519_v25, %v648_v37  ;;  %vm672_vm7 = vmor %vm670_vm6, %vm671_vm5  ;;  %vm1686_vm6 = vcmask 130048  }
 0x229   :  { %v643_v28 = vsel %vm642_vm12, %v5517_v44, %v639_v55  ;;  %v658_v32 = vsub.f32 1.5, %v657_v5 }
 0x22a   :  { %v715_v59 = vmul.f32 %v6065_v58, %v643_v28  ;;  %v653_v2 = vsel %vm652_vm15, %v5519_v25, %v649_v62 }
 0x22b   :  { %v716_v10 = vmul.f32 %v6065_v58, %v653_v2 }
 0x22c   :  { %v6071_v0 = vmul.f32 %v715_v59, %v5960_v54 }
 0x22e   :  { %v869_v13 = vsel %vm867_vm1, %v6071_v0, 0 }
 0x252   :  { %v830_v11 = vpop.permute.xlu2 %829 }
 0x253   :  { %v6035_v12 = vmul.f32 %v830_v11, %v5967_v1 }
 0x255   :  { %865 = vrot.lane.b32.xlu0 %v6035_v12, %s5693_s28 }
 0x25a   :  { %v832_v21 = vpop.permute.xlu2 %831 }
 0x25b   :  { %v6040_v22 = vmul.f32 %v832_v21, %v5976_v18  ;;  %v6085_v21 = vand.u32 4294901760, %v869_v13 }
 0x25d   :  { %835 = vrot.lane.b32.xlu0 %v788_v3, %s5694_s29  ;;  %1070 = vrot.lane.b32.xlu2 %v6040_v22, %s5693_s28  ;;  %v6088_v3 = vmul.f32 %v716_v10, %v5967_v1  ;;  %v897_v20 = vsub.f32 %v869_v13, %v6085_v21 }
 0x25f   :  { %v872_v31 = vsel %vm867_vm1, %v6088_v3, 0  ;;  %v898_v27 = vand.u32 4294901760, %v897_v20 }
 0x260   :  { %v6101_v38 = vand.u32 4294901760, %v872_v31 }
 0x261   :  { %v899_v48 = vsub.f32 %v897_v20, %v898_v27 }
 0x262   :  { %v828_v9 = vpop.permute.xlu0 %827  ;;  %v905_v25 = vsub.f32 %v872_v31, %v6101_v38 }
 0x263   :  { %v6046_v15 = vmul.f32 %v828_v9, %v5960_v54  ;;  %v665_v9 = vmul.f32 %v6080_v17, %v6068_v61  ;;  %v900_v52 = vand.u32 4294901760, %v899_v48 }
 0x264   :  { %v906_v53 = vand.u32 4294901760, %v905_v25 }
 0x265   :  { %841 = vrot.lane.b32.xlu0 %v818_v24, %s5694_s29  ;;  %863 = vrot.lane.b32.xlu1 %v6046_v15, %s5693_s28 }
 0x266   :  { %v907_v59 = vsub.f32 %v905_v25, %v906_v53 }
 0x272   :  { %v838_v30 = vpop.permute.xlu2 %837 }
 0x273   :  { %v6052_v29 = vmul.f32 %v838_v30, %v6000_v47 }
 0x275   :  { %1278 = vrot.lane.b32.xlu2 %v6052_v29, %s5693_s28 }
 0x27a   :  { %v834_v33 = vpop.permute.xlu1 %833 }
 0x27b   :  { %v6057_v35 = vmul.f32 %v834_v33, %v5984_v26  ;;  %v666_v33 = vmul.f32 %v6080_v17, %v665_v9 }
 0x27d   :  { %1072 = vrot.lane.b32.xlu1 %v6057_v35, %s5693_s28  ;;  %v667_v41 = vmul.f32 0.5, %v666_v33 }
 0x27f   :  { %v668_v51 = vsub.f32 1.5, %v667_v41 }
 0x281   :  { %v669_v28 = vmul.f32 %v6080_v17, %v668_v51 }
 0x283   :  { %v673_v2 = vsel %vm672_vm7, %v6080_v17, %v669_v28  ;;  %vm4114_vm7 = vcmask 195712  }
 0x285   :  { %839 = vrot.lane.b32.xlu1 %v808_v40, %s5694_s29  ;;  %v659_v40 = vmul.f32 %v5521_v63, %v658_v32 }
 0x287   :  { %v663_v50 = vsel %vm662_vm4, %v5521_v63, %v659_v40 }
 0x288   :  { %v717_v55 = vmul.f32 %v6065_v58, %v663_v50 }
 0x28a   :  { %v6115_v62 = vmul.f32 %v717_v55, %v5976_v18 }
 0x28c   :  { %v1075_v61 = vsel %vm867_vm1, %v6115_v62, 0 }
 0x28d   :  { %v6126_v13 = vand.u32 4294901760, %v1075_v61 }
 0x2b7   :  { %v1071_v43 = vpop.permute.xlu2 %1070 }
 0x2c7   :  { %v866_v6 = vpop.permute.xlu0 %865 }
 0x2c8   :  { %v876_v8 = vsel %vm867_vm1, %v866_v6, 0  ;;  %v908_v6 = vand.u32 4294901760, %v907_v59 }
 0x2c9   :  { %v6076_v11 = vand.u32 4294901760, %v876_v8 }
 0x2cb   :  { %v928_v19 = vsub.f32 %v876_v8, %v6076_v11  ;;  %893 = vmatpush.xpose.msra.mxu0 %v6076_v11  ;;  %994 = vmatpush.xpose.msrb.mxu3 %v6076_v11  ;;  %v718_v8 = vmul.f32 %v6065_v58, %v673_v2 }
 0x2cd   :  { %v929_v4 = vand.u32 4294901760, %v928_v19  ;;  %964 = vmatpush.xpose.msrb.mxu2 %v928_v19  ;;  %v6129_v14 = vmul.f32 %v718_v8, %v5984_v26 }
 0x2cf   :  { %v930_v23 = vsub.f32 %v928_v19, %v929_v4  ;;  %v836_v24 = vpop.permute.xlu0 %835  ;;  %v1279_v45 = vpop.permute.xlu2 %1278  ;;  %v1103_v19 = vsub.f32 %v1075_v61, %v6126_v13  ;;  %v1078_v5 = vsel %vm867_vm1, %v6129_v14, 0 }
 0x2d0   :  { %v6093_v16 = vmul.f32 %v836_v24, %v5991_v36  ;;  %v1288_v7 = vsel %vm867_vm1, %v1279_v45, 0 }
 0x2d1   :  { %v931_v30 = vand.u32 4294901760, %v930_v23  ;;  %v6123_v10 = vand.u32 4294901760, %v1288_v7 }
 0x2d2   :  { %1276 = vrot.lane.b32.xlu0 %v6093_v16, %s5693_s28 }
 0x2d3   :  { %932 = vmatpush.xpose.msrb.mxu1 %v931_v30  ;;  %v6133_v17 = vsub.f32 %v1288_v7, %v6123_v10  ;;  %v6142_v30 = vand.u32 4294901760, %v1078_v5 }
 0x2d5   :  { %v1341_v9 = vand.u32 4294901760, %v6133_v17  ;;  %v1111_v41 = vsub.f32 %v1078_v5, %v6142_v30 }
 0x2d7   :  { %v864_v34 = vpop.permute.xlu1 %863  ;;  %v842_v42 = vpop.permute.xlu0 %841  ;;  %v1342_v33 = vsub.f32 %v6133_v17, %v1341_v9  ;;  %v1112_v50 = vand.u32 4294901760, %v1111_v41 }
 0x2d8   :  { %v874_v44 = vsel %vm867_vm1, %v864_v34, 0  ;;  %v6105_v46 = vmul.f32 %v842_v42, %v6015_v60 }
 0x2d9   :  { %v894_v49 = vand.u32 4294901760, %v874_v44 }
 0x2da   :  { %1484 = vrot.lane.b32.xlu1 %v6105_v46, %s5693_s28 }
 0x2db   :  { %v934_v39 = vsub.f32 %v874_v44, %v894_v49  ;;  %895 = vmatpush.xpose.msra.mxu0 %v894_v49  ;;  %996 = vmatpush.xpose.msrb.mxu3 %v894_v49 }
 0x2dd   :  { %967 = vmatpush.xpose.msrb.mxu2 %v934_v39  ;;  %v935_v56 = vand.u32 4294901760, %v934_v39 }
 0x2de   :  { %901 = vmatmul.f32.vlgmr.msra.gmra.mxu0 %v900_v52  ;;  %1000 = vmatmul.f32.vlgmr.msrb.gmra.mxu3 %v898_v27 }
 0x2df   :  { %1027 = vmatpush.xpose.msrb.mxu0 %v929_v4  ;;  %v936_v37 = vsub.f32 %v934_v39, %v935_v56 }
 0x2e0   :  { %970 = vmatmul.f32.vlgmr.msrb.gmra.mxu2 %v897_v20  ;;  %v1104_v20 = vand.u32 4294901760, %v1103_v19 }
 0x2e1   :  { %v937_v63 = vand.u32 4294901760, %v936_v37 }
 0x2e2   :  { %v1105_v40 = vsub.f32 %v1103_v19, %v1104_v20 }
 0x2e3   :  { %1031 = vmatpush.xpose.msrb.mxu0 %v935_v56  ;;  %938 = vmatpush.xpose.msrb.mxu1 %v937_v63  ;;  %v541_v56 = vpop.f32.mrf.mxu2 }
 0x2e6   :  { %909 = vmatmul.f32.gmra.mxu0 %v908_v6  ;;  %940 = vmatmul.f32.vlgmr.msrb.gmra.mxu1 %v6085_v21 }
 0x2e7   :  { %1056 = vmatpush.xpose.msra.mxu1 %v6076_v11  ;;  %1006 = vmatmul.f32.gmra.mxu3 %v906_v53  ;;  %v1080_v11 = vsel %vm867_vm1, %v1071_v43, 0  ;;  %v1343_v43 = vand.u32 4294901760, %v1342_v33  ;;  %v6160_v53 = vpack.i.bf16 %v5967_v1, %v6000_v47 }
 0x2e8   :  { %975 = vmatmul.f32.gmra.mxu2 %v905_v25  ;;  %v1100_v4 = vand.u32 4294901760, %v1080_v11 }
 0x2ea   :  { %v1140_v31 = vsub.f32 %v1080_v11, %v1100_v4 }
 0x2eb   :  { %1058 = vmatpush.xpose.msra.mxu1 %v894_v49  ;;  %v1106_v49 = vand.u32 4294901760, %v1105_v40  ;;  %v544_v28 = vpop.f32.mrf.mxu2 }
 0x2ec   :  { %v1141_v42 = vand.u32 4294901760, %v1140_v31  ;;  %v631_v37 = vmax.f32 %v544_v28, 1e-24 }
 0x2ee   :  { %944 = vmatmul.f32.gmra.mxu1 %v6101_v38  ;;  %1033 = vmatmul.f32.vlgmr.msrb.gmra.mxu0 %v6085_v21  ;;  %v1142_v39 = vsub.f32 %v1140_v31, %v1141_v42  ;;  %vm690_vm12 = vweird.f32 %v631_v37 }
 0x2ef   :  { %v1073_v23 = vpop.permute.xlu1 %1072 }
 0x2f0   :  { %v1082_v24 = vsel %vm867_vm1, %v1073_v23, 0  ;;  %v1143_v52 = vand.u32 4294901760, %v1142_v39 }
 0x2f1   :  { %v1098_v32 = vand.u32 4294901760, %v1082_v24 }
 0x2f3   :  { %v1134_v27 = vsub.f32 %v1082_v24, %v1098_v32  ;;  %1099 = vmatpush.xpose.msra.mxu2 %v1098_v32  ;;  %1200 = vmatpush.xpose.msrb.mxu1 %v1098_v32  ;;  %v547_v63 = vpop.f32.mrf.mxu2 }
 0x2f4   :  { %v632_v6 = vmax.f32 %v547_v63, 1e-24 }
 0x2f5   :  { %v1135_v34 = vand.u32 4294901760, %v1134_v27  ;;  %1170 = vmatpush.xpose.msra.mxu0 %v1134_v27 }
 0x2f6   :  { %1037 = vmatmul.f32.gmra.mxu0 %v6101_v38  ;;  %1060 = vmatmul.f32.vlgmr.msra.gmra.mxu1 %v6085_v21  ;;  %v1113_v21 = vsub.f32 %v1111_v41, %v1112_v50  ;;  %vm700_vm15 = vweird.f32 %v632_v6 }
 0x2f7   :  { %v1136_v44 = vsub.f32 %v1134_v27, %v1135_v34  ;;  %v840_v48 = vpop.permute.xlu1 %839  ;;  %1101 = vmatpush.xpose.msra.mxu2 %v1100_v4  ;;  %1202 = vmatpush.xpose.msrb.mxu1 %v1100_v4 }
 0x2f8   :  { %v6151_v25 = vmul.f32 %v840_v48, %v6009_v57  ;;  %v1114_v55 = vand.u32 4294901760, %v1113_v21 }
 0x2f9   :  { %v1137_v51 = vand.u32 4294901760, %v1136_v44  ;;  %1173 = vmatpush.xpose.msra.mxu0 %v1140_v31 }
 0x2fa   :  { %1482 = vrot.lane.b32.xlu2 %v6151_v25, %s5693_s28  ;;  %1107 = vmatmul.f32.vlgmr.msra.gmra.mxu2 %v1106_v49 }
 0x2fb   :  { %1233 = vmatpush.xpose.msrb.mxu2 %v1135_v34  ;;  %1344 = vmatpush.xpose.msra.mxu1 %v1343_v43  ;;  %v550_v11 = vpop.f32.mrf.mxu2 }
 0x2fc   :  { %1138 = vmatpush.xpose.msra.mxu3 %v1137_v51  ;;  %v633_v5 = vmax.f32 %v550_v11, 1e-24 }
 0x2fd   :  { %1305 = vmatpush.xpose.msrb.mxu0 %v6123_v10 }
 0x2fe   :  { %1064 = vmatmul.f32.gmra.mxu1 %v6101_v38  ;;  %1176 = vmatmul.f32.vlgmr.msra.gmra.mxu0 %v1103_v19  ;;  %v630_v38 = vmax.f32 %v541_v56, 1e-24  ;;  %vm710_vm4 = vweird.f32 %v633_v5 }
 0x2ff   :  { %1237 = vmatpush.xpose.msrb.mxu2 %v1141_v42 }
 0x300   :  { %1144 = vmatpush.xpose.msra.mxu3 %v1143_v52  ;;  %5524 = vrsqrt.f32 %v630_v38  ;;  %vm680_vm9 = vweird.f32 %v630_v38 }
 0x301   :  { %5526 = vrsqrt.f32 %v631_v37 }
 0x302   :  { %5408 = vrot.lane.b32.xlu2 %v6160_v53, %s5695_s6  ;;  %1115 = vmatmul.f32.gmra.mxu2 %v1114_v55  ;;  %5528 = vrsqrt.f32 %v632_v6 }
 0x303   :  { %1376 = vmatpush.xpose.msra.mxu2 %v6133_v17  ;;  %1146 = vmatmul.f32.vlgmr.msra.gmra.mxu3 %v6126_v13  ;;  %5530 = vrsqrt.f32 %v633_v5 }
 0x304   :  { %1262 = vmatpush.xpose.msrb.mxu3 %v1098_v32 }
 0x306   :  { %1181 = vmatmul.f32.gmra.mxu0 %v1111_v41  ;;  %1206 = vmatmul.f32.vlgmr.msrb.gmra.mxu1 %v1104_v20  ;;  %v5525_v45 = vpop.eup %5524 }
 0x307   :  { %v675_v59 = vmul.f32 %v5525_v45, %v630_v38  ;;  %v5527_v7 = vpop.eup %5526  ;;  %vm681_vm8 = vweird.f32 %v5525_v45 }
 0x308   :  { %1264 = vmatpush.xpose.msrb.mxu3 %v1100_v4  ;;  %v685_v61 = vmul.f32 %v5527_v7, %v631_v37  ;;  %v5529_v23 = vpop.eup %5528  ;;  %vm682_vm10 = vmor %vm680_vm9, %vm681_vm8  ;;  %vm691_vm11 = vweird.f32 %v5527_v7  ;;  %vm5210_vm8 = vcmask 261312  }
 0x309   :  { %v676_v2 = vmul.f32 %v5525_v45, %v675_v59  ;;  %v695_v20 = vmul.f32 %v5529_v23, %v632_v6  ;;  %v5531_v33 = vpop.eup %5530  ;;  %vm692_vm13 = vmor %vm690_vm12, %vm691_vm11  ;;  %vm701_vm14 = vweird.f32 %v5529_v23 }
 0x30a   :  { %1239 = vmatmul.f32.vlgmr.msrb.gmra.mxu2 %v6126_v13  ;;  %v686_v4 = vmul.f32 %v5527_v7, %v685_v61  ;;  %v705_v34 = vmul.f32 %v5531_v33, %v633_v5  ;;  %vm702_vm2 = vmor %vm700_vm15, %vm701_vm14  ;;  %vm711_vm3 = vweird.f32 %v5531_v33 }
 0x30b   :  { %1150 = vmatmul.f32.gmra.mxu3 %v6142_v30  ;;  %v677_v8 = vmul.f32 0.5, %v676_v2  ;;  %vm712_vm5 = vmor %vm710_vm4, %vm711_vm3 }
 0x30c   :  { %1406 = vmatpush.xpose.msra.mxu3 %v6123_v10  ;;  %v706_v48 = vmul.f32 %v5531_v33, %v705_v34 }
 0x30d   :  { %v678_v19 = vsub.f32 1.5, %v677_v8 }
 0x30e   :  { %1212 = vmatmul.f32.gmra.mxu1 %v1112_v50  ;;  %v707_v39 = vmul.f32 0.5, %v706_v48 }
 0x30f   :  { %v679_v24 = vmul.f32 %v5525_v45, %v678_v19 }
 0x310   :  { %v708_v56 = vsub.f32 1.5, %v707_v39 }
 0x311   :  { %v683_v31 = vsel %vm682_vm10, %v5525_v45, %v679_v24 }
 0x312   :  { %1243 = vmatmul.f32.gmra.mxu2 %v6142_v30  ;;  %v719_v27 = vmul.f32 %v6065_v58, %v683_v31  ;;  %v709_v45 = vmul.f32 %v5531_v33, %v708_v56 }
 0x313   :  { %1266 = vmatmul.f32.vlgmr.msrb.gmra.mxu3 %v6126_v13  ;;  %v687_v13 = vmul.f32 0.5, %v686_v4 }
 0x314   :  { %v6173_v42 = vmul.f32 %v719_v27, %v5991_v36  ;;  %v713_v6 = vsel %vm712_vm5, %v5531_v33, %v709_v45 }
 0x315   :  { %v688_v32 = vsub.f32 1.5, %v687_v13  ;;  %v722_v4 = vmul.f32 %v6065_v58, %v713_v6 }
 0x316   :  { %v1281_v50 = vsel %vm867_vm1, %v6173_v42, 0 }
 0x317   :  { %v689_v40 = vmul.f32 %v5527_v7, %v688_v32  ;;  %v6178_v21 = vand.u32 4294901760, %v1281_v50  ;;  %v6202_v32 = vmul.f32 %v722_v4, %v6015_v60 }
 0x319   :  { %v693_v43 = vsel %vm692_vm13, %v5527_v7, %v689_v40  ;;  %v1309_v38 = vsub.f32 %v1281_v50, %v6178_v21  ;;  %v1490_v34 = vsel %vm867_vm1, %v6202_v32, 0 }
 0x31a   :  { %v720_v49 = vmul.f32 %v6065_v58, %v693_v43 }
 0x31b   :  { %1270 = vmatmul.f32.gmra.mxu3 %v6142_v30  ;;  %v696_v30 = vmul.f32 %v5529_v23, %v695_v20  ;;  %v1310_v59 = vand.u32 4294901760, %v1309_v38 }
 0x31c   :  { %v6181_v52 = vmul.f32 %v720_v49, %v6000_v47  ;;  %v6213_v49 = vand.u32 4294901760, %v1490_v34 }
 0x31d   :  { %v697_v41 = vmul.f32 0.5, %v696_v30  ;;  %v1311_v61 = vsub.f32 %v1309_v38, %v1310_v59 }
 0x31e   :  { %v1284_v28 = vsel %vm867_vm1, %v6181_v52, 0 }
 0x31f   :  { %v698_v44 = vsub.f32 1.5, %v697_v41  ;;  %v6187_v63 = vand.u32 4294901760, %v1284_v28  ;;  %v1312_v24 = vand.u32 4294901760, %v1311_v61 }
 0x321   :  { %v699_v51 = vmul.f32 %v5529_v23, %v698_v44  ;;  %v1317_v11 = vsub.f32 %v1284_v28, %v6187_v63 }
 0x323   :  { %v703_v55 = vsel %vm702_vm2, %v5529_v23, %v699_v51  ;;  %v1318_v13 = vand.u32 4294901760, %v1317_v11 }
 0x324   :  { %v721_v37 = vmul.f32 %v6065_v58, %v703_v55 }
 0x325   :  { %v1319_v27 = vsub.f32 %v1317_v11, %v1318_v13 }
 0x326   :  { %v6190_v2 = vmul.f32 %v721_v37, %v6009_v57 }
 0x327   :  { %v1320_v43 = vand.u32 4294901760, %v1319_v27 }
 0x328   :  { %v1487_v5 = vsel %vm867_vm1, %v6190_v2, 0 }
 0x329   :  { %v6199_v31 = vand.u32 4294901760, %v1487_v5 }
 0x32b   :  { %v6206_v40 = vsub.f32 %v1487_v5, %v6199_v31 }
 0x32d   :  { %v1516_v48 = vand.u32 4294901760, %v6206_v40 }
 0x344   :  { %v1277_v7 = vpop.permute.xlu0 %1276 }
 0x345   :  { %v1286_v8 = vsel %vm867_vm1, %v1277_v7, 0 }
 0x346   :  { %v1306_v19 = vand.u32 4294901760, %v1286_v8 }
 0x348   :  { %v1346_v23 = vsub.f32 %v1286_v8, %v1306_v19  ;;  %1307 = vmatpush.xpose.msrb.mxu0 %v1306_v19  ;;  %1408 = vmatpush.xpose.msra.mxu3 %v1306_v19 }
 0x34a   :  { %1379 = vmatpush.xpose.msra.mxu2 %v1346_v23  ;;  %v1347_v20 = vand.u32 4294901760, %v1346_v23 }
 0x34b   :  { %1313 = vmatmul.f32.vlgmr.msrb.gmra.mxu0 %v1312_v24  ;;  %1412 = vmatmul.f32.vlgmr.msra.gmra.mxu3 %v1310_v59 }
 0x34c   :  { %1439 = vmatpush.xpose.msra.mxu0 %v1341_v9  ;;  %v1485_v58 = vpop.permute.xlu1 %1484  ;;  %v1348_v30 = vsub.f32 %v1346_v23, %v1347_v20  ;;  %v6226_v23 = vld [vmem:[#allocation3] sm:$0xff] }
 0x34d   :  { %v1494_v33 = vsel %vm867_vm1, %v1485_v58, 0  ;;  %1382 = vmatmul.f32.vlgmr.msra.gmra.mxu2 %v1309_v38  ;;  %v6220_v38 = vsub.f32 %v1490_v34, %v6213_v49 }
 0x34e   :  { %v1510_v17 = vand.u32 4294901760, %v1494_v33  ;;  %v1349_v9 = vand.u32 4294901760, %v1348_v30 }
 0x34f   :  { %v1524_v7 = vand.u32 4294901760, %v6220_v38 }
 0x350   :  { %1443 = vmatpush.xpose.msra.mxu0 %v1347_v20  ;;  %v1546_v41 = vsub.f32 %v1494_v33, %v1510_v17  ;;  %1350 = vmatpush.xpose.msra.mxu1 %v1349_v9  ;;  %v6232_v33 = vld [vmem:[#allocation3 + $0x8] sm:$0xff] }
 0x351   :  { %1511 = vmatpush.xpose.msrb.mxu2 %v1510_v17  ;;  %v1525_v4 = vsub.f32 %v6220_v38, %v1524_v7 }
 0x352   :  { %v1547_v44 = vand.u32 4294901760, %v1546_v41 }
 0x353   :  { %1321 = vmatmul.f32.gmra.mxu0 %v1320_v43  ;;  %1352 = vmatmul.f32.vlgmr.msra.gmra.mxu1 %v6178_v21 }
 0x354   :  { %1468 = vmatpush.xpose.msrb.mxu1 %v6123_v10  ;;  %1582 = vmatpush.xpose.msrb.mxu0 %v1546_v41  ;;  %v1548_v50 = vsub.f32 %v1546_v41, %v1547_v44  ;;  %v1483_v51 = vpop.permute.xlu2 %1482  ;;  %v1517_v10 = vsub.f32 %v6206_v40, %v1516_v48 }
 0x355   :  { %1418 = vmatmul.f32.gmra.mxu3 %v1318_v13  ;;  %v1492_v39 = vsel %vm867_vm1, %v1483_v51, 0  ;;  %1387 = vmatmul.f32.gmra.mxu2 %v1317_v11  ;;  %v1526_v13 = vand.u32 4294901760, %v1525_v4 }
 0x356   :  { %v1549_v55 = vand.u32 4294901760, %v1548_v50  ;;  %v1512_v56 = vand.u32 4294901760, %v1492_v39  ;;  %v1518_v59 = vand.u32 4294901760, %v1517_v10 }
 0x358   :  { %1470 = vmatpush.xpose.msrb.mxu1 %v1306_v19  ;;  %v1552_v28 = vsub.f32 %v1492_v39, %v1512_v56  ;;  %1513 = vmatpush.xpose.msrb.mxu2 %v1512_v56 }
 0x359   :  { %1550 = vmatpush.xpose.msrb.mxu3 %v1549_v55 }
 0x35a   :  { %1585 = vmatpush.xpose.msrb.mxu0 %v1552_v28  ;;  %v1553_v37 = vand.u32 4294901760, %v1552_v28 }
 0x35b   :  { %v902_v45 = vpop.f32.mrf.mxu0  ;;  %1356 = vmatmul.f32.gmra.mxu1 %v6187_v63  ;;  %1445 = vmatmul.f32.vlgmr.msra.gmra.mxu0 %v6178_v21 }
 0x35c   :  { %1612 = vmatpush.xpose.msra.mxu1 %v1510_v17  ;;  %1645 = vmatpush.xpose.msra.mxu2 %v1547_v44  ;;  %v5409_v6 = vpop.permute.xlu2 %5408  ;;  %v1554_v8 = vsub.f32 %v1552_v28, %v1553_v37  ;;  %v903_v20 = vadd.f32 %v902_v45, %v6226_v23 }
 0x35d   :  { %v5411_v61 = vunpack.i.h.bf16 %v5409_v6  ;;  %v5410_v11 = vunpack.i.l.bf16 %v5409_v6  ;;  %1519 = vmatmul.f32.vlgmr.msrb.gmra.mxu2 %v1518_v59 }
 0x35e   :  { %v1555_v19 = vand.u32 4294901760, %v1554_v8 }
 0x35f   :  { %1803 = vmatpush.msra.mxu0 %v5411_v61 }
 0x360   :  { %1614 = vmatpush.xpose.msra.mxu1 %v1512_v56  ;;  %1649 = vmatpush.xpose.msra.mxu2 %v1553_v37 }
 0x361   :  { %1556 = vmatpush.xpose.msrb.mxu3 %v1555_v19 }
 0x363   :  { %v910_v5 = vpop.f32.mrf.mxu0  ;;  %v941_v24 = vpop.f32.mrf.mxu1  ;;  %1449 = vmatmul.f32.gmra.mxu0 %v6187_v63  ;;  %1472 = vmatmul.f32.vlgmr.msrb.gmra.mxu1 %v6178_v21 }
 0x364   :  { %1877 = vmatpush.msrb.mxu2 %v5410_v11  ;;  %1558 = vmatmul.f32.vlgmr.msrb.gmra.mxu3 %v6199_v31  ;;  %v942_v58 = vadd.f32 %v941_v24, %v903_v20  ;;  %v971_v30 = vpop.f32.mrf.mxu2  ;;  %v1001_v21 = vpop.f32.mrf.mxu3  ;;  %v911_v41 = vadd.f32 %v910_v5, %v6232_v33 }
 0x365   :  { %1674 = vmatpush.xpose.msra.mxu3 %v1510_v17  ;;  %1527 = vmatmul.f32.gmra.mxu2 %v1526_v13 }
 0x366   :  { %v972_v17 = vadd.f32 %v971_v30, %v942_v58 }
 0x368   :  { %v1002_v43 = vadd.f32 %v1001_v21, %v972_v17 }
 0x369   :  { %1676 = vmatpush.xpose.msra.mxu3 %v1512_v56 }
 0x36b   :  { %v945_v27 = vpop.f32.mrf.mxu1  ;;  %1476 = vmatmul.f32.gmra.mxu1 %v6187_v63  ;;  %1588 = vmatmul.f32.vlgmr.msrb.gmra.mxu0 %v6206_v40  ;;  %v1034_v9 = vpop.f32.mrf.mxu0 }
 0x36c   :  { %1562 = vmatmul.f32.gmra.mxu3 %v6213_v49  ;;  %v946_v34 = vadd.f32 %v945_v27, %v911_v41  ;;  %v1035_v44 = vadd.f32 %v1034_v9, %v1002_v43  ;;  %v976_v50 = vpop.f32.mrf.mxu2  ;;  %v1007_v56 = vpop.f32.mrf.mxu3 }
 0x36d   :  { %1651 = vmatmul.f32.vlgmr.msra.gmra.mxu2 %v6199_v31 }
 0x36e   :  { %v977_v63 = vadd.f32 %v976_v50, %v946_v34 }
 0x370   :  { %v1008_v28 = vadd.f32 %v1007_v56, %v977_v63 }
 0x373   :  { %v1061_v51 = vpop.f32.mrf.mxu1  ;;  %1593 = vmatmul.f32.gmra.mxu0 %v6220_v38  ;;  %1618 = vmatmul.f32.vlgmr.msra.gmra.mxu1 %v1516_v48  ;;  %v1038_v10 = vpop.f32.mrf.mxu0 }
 0x374   :  { %v6242_v39 = vadd.f32 %v1061_v51, %v1035_v44  ;;  %1678 = vmatmul.f32.vlgmr.msra.gmra.mxu3 %v6199_v31  ;;  %v1039_v37 = vadd.f32 %v1038_v10, %v1008_v28 }
 0x375   :  { %1655 = vmatmul.f32.gmra.mxu2 %v6213_v49 }
 0x376   :  { %v1687_v55 = vsel %vm1686_vm6, %v6242_v39, -inf }
 0x377   :  { %1688 = vmax.xlane.f32.xlu1 %v1687_v55 }
 0x37b   :  { %v1065_v38 = vpop.f32.mrf.mxu1  ;;  %1624 = vmatmul.f32.gmra.mxu1 %v1524_v7  ;;  %v1177_v61 = vpop.f32.mrf.mxu0 }
 0x37c   :  { %v6248_v40 = vadd.f32 %v1065_v38, %v1039_v37  ;;  %1682 = vmatmul.f32.gmra.mxu3 %v6213_v49 }
 0x37d   :  { %v1108_v48 = vpop.f32.mrf.mxu2 }
 0x37e   :  { %v1690_v31 = vsel %vm1686_vm6, %v6248_v40, -inf  ;;  %v1109_v6 = vadd.f32 %v1108_v48, %v6226_v23 }
 0x37f   :  { %1691 = vmax.xlane.f32.xlu1 %v1690_v31 }
 0x383   :  { %v1207_v4 = vpop.f32.mrf.mxu1  ;;  %v1182_v20 = vpop.f32.mrf.mxu0 }
 0x385   :  { %v1116_v45 = vpop.f32.mrf.mxu2 }
 0x386   :  { %v1147_v59 = vpop.f32.mrf.mxu3  ;;  %v1117_v7 = vadd.f32 %v1116_v45, %v6232_v33 }
 0x387   :  { %v1148_v8 = vadd.f32 %v1147_v59, %v1109_v6 }
 0x389   :  { %v1178_v19 = vadd.f32 %v1177_v61, %v1148_v8 }
 0x38b   :  { %v1208_v13 = vadd.f32 %v1207_v4, %v1178_v19  ;;  %v1213_v21 = vpop.f32.mrf.mxu1 }
 0x38d   :  { %v1240_v5 = vpop.f32.mrf.mxu2 }
 0x38e   :  { %v1151_v11 = vpop.f32.mrf.mxu3  ;;  %v1241_v49 = vadd.f32 %v1240_v5, %v1208_v13 }
 0x38f   :  { %v1152_v24 = vadd.f32 %v1151_v11, %v1117_v7 }
 0x391   :  { %v1183_v30 = vadd.f32 %v1182_v20, %v1152_v24 }
 0x393   :  { %v1214_v41 = vadd.f32 %v1213_v21, %v1183_v30 }
 0x395   :  { %v1244_v9 = vpop.f32.mrf.mxu2 }
 0x396   :  { %v1267_v58 = vpop.f32.mrf.mxu3  ;;  %v1245_v34 = vadd.f32 %v1244_v9, %v1214_v41 }
 0x397   :  { %v6255_v27 = vadd.f32 %v1267_v58, %v1241_v49 }
 0x399   :  { %v1693_v17 = vsel %vm1686_vm6, %v6255_v27, -inf }
 0x39a   :  { %1694 = vmax.xlane.f32.xlu2 %v1693_v17 }
 0x39e   :  { %v1271_v43 = vpop.f32.mrf.mxu3 }
 0x39f   :  { %v6259_v44 = vadd.f32 %v1271_v43, %v1245_v34 }
 0x3a1   :  { %v1696_v50 = vsel %vm1686_vm6, %v6259_v44, -inf }
 0x3a2   :  { %1697 = vmax.xlane.f32.xlu0 %v1696_v50 }
 0x3c8   :  { %v1314_v51 = vpop.f32.mrf.mxu0 }
 0x3c9   :  { %v1315_v10 = vadd.f32 %v1314_v51, %v6226_v23 }
 0x3ce   :  { %v1413_v28 = vpop.f32.mrf.mxu3 }
 0x3d0   :  { %v1322_v63 = vpop.f32.mrf.mxu0  ;;  %v1353_v55 = vpop.f32.mrf.mxu1 }
 0x3d1   :  { %v1383_v56 = vpop.f32.mrf.mxu2  ;;  %v1354_v37 = vadd.f32 %v1353_v55, %v1315_v10  ;;  %v1323_v59 = vadd.f32 %v1322_v63, %v6232_v33 }
 0x3d3   :  { %v1384_v31 = vadd.f32 %v1383_v56, %v1354_v37 }
 0x3d5   :  { %v1414_v8 = vadd.f32 %v1413_v28, %v1384_v31 }
 0x3d8   :  { %v1357_v38 = vpop.f32.mrf.mxu1  ;;  %v1446_v48 = vpop.f32.mrf.mxu0 }
 0x3d9   :  { %v1388_v45 = vpop.f32.mrf.mxu2  ;;  %v1358_v6 = vadd.f32 %v1357_v38, %v1323_v59  ;;  %v1419_v61 = vpop.f32.mrf.mxu3  ;;  %v1447_v11 = vadd.f32 %v1446_v48, %v1414_v8 }
 0x3db   :  { %v1389_v4 = vadd.f32 %v1388_v45, %v1358_v6 }
 0x3dd   :  { %v1420_v49 = vadd.f32 %v1419_v61, %v1389_v4 }
 0x3e0   :  { %v1473_v19 = vpop.f32.mrf.mxu1  ;;  %v1450_v5 = vpop.f32.mrf.mxu0 }
 0x3e1   :  { %v6265_v7 = vadd.f32 %v1473_v19, %v1447_v11  ;;  %v1520_v24 = vpop.f32.mrf.mxu2  ;;  %v1451_v20 = vadd.f32 %v1450_v5, %v1420_v49 }
 0x3e2   :  { %v1521_v9 = vadd.f32 %v1520_v24, %v6226_v23 }
 0x3e3   :  { %v1699_v13 = vsel %vm1686_vm6, %v6265_v7, -inf }
 0x3e4   :  { %1700 = vmax.xlane.f32.xlu0 %v1699_v13 }
 0x3e7   :  { %v1559_v58 = vpop.f32.mrf.mxu3 }
 0x3e8   :  { %v1477_v30 = vpop.f32.mrf.mxu1  ;;  %v1589_v34 = vpop.f32.mrf.mxu0  ;;  %v1560_v50 = vadd.f32 %v1559_v58, %v1521_v9 }
 0x3e9   :  { %v6269_v17 = vadd.f32 %v1477_v30, %v1451_v20  ;;  %v1528_v21 = vpop.f32.mrf.mxu2 }
 0x3ea   :  { %v1689_v41 = vpop.xlane.xlu1 %1688  ;;  %v1590_v63 = vadd.f32 %v1589_v34, %v1560_v50  ;;  %v1529_v56 = vadd.f32 %v1528_v21, %v6232_v33  ;;  %v6290_v34 = vpack.i.bf16 %v5976_v18, %v6009_v57 }
 0x3eb   :  { %v1702_v43 = vsel %vm1686_vm6, %v6269_v17, -inf  ;;  %v1711_v11 = vsub.f32 %v6242_v39, %v1689_v41 }
 0x3ec   :  { %1703 = vmax.xlane.f32.xlu0 %v1702_v43 }
 0x3ed   :  { %v1719_v5 = vmul.f32 1.442695, %v1711_v11 }
 0x3ef   :  { %v1563_v51 = vpop.f32.mrf.mxu3 }
 0x3f0   :  { %v1619_v55 = vpop.f32.mrf.mxu1  ;;  %v1564_v48 = vadd.f32 %v1563_v51, %v1529_v56  ;;  %v1594_v31 = vpop.f32.mrf.mxu0 }
 0x3f1   :  { %v1620_v10 = vadd.f32 %v1619_v55, %v1590_v63  ;;  %v1652_v37 = vpop.f32.mrf.mxu2 }
 0x3f2   :  { %v1692_v28 = vpop.xlane.xlu1 %1691  ;;  %v1595_v6 = vadd.f32 %v1594_v31, %v1564_v48 }
 0x3f3   :  { %v1712_v38 = vsub.f32 %v6248_v40, %v1692_v28  ;;  %v1653_v45 = vadd.f32 %v1652_v37, %v1620_v10 }
 0x3f5   :  { %v1721_v23 = vmul.f32 1.442695, %v1712_v38 }
 0x3f7   :  { %5532 = vpow2.f32 %v1721_v23  ;;  %v1679_v59 = vpop.f32.mrf.mxu3 }
 0x3f8   :  { %v1680_v8 = vadd.f32 %v1679_v59, %v1653_v45  ;;  %v1625_v61 = vpop.f32.mrf.mxu1  ;;  %5534 = vpow2.f32 %v1719_v5 }
 0x3f9   :  { %v1626_v19 = vadd.f32 %v1625_v61, %v1595_v6  ;;  %v1656_v24 = vpop.f32.mrf.mxu2 }
 0x3fa   :  { %v1705_v4 = vsel %vm1686_vm6, %v1680_v8, -inf }
 0x3fb   :  { %1706 = vmax.xlane.f32.xlu2 %v1705_v4  ;;  %v1657_v40 = vadd.f32 %v1656_v24, %v1626_v19  ;;  %v6342_v4 = vpack.i.bf16 %v6015_v60, %v5991_v36 }
 0x3fd   :  { %v6278_v33 = vpop.eup %5532 }
 0x3fe   :  { %v1738_v13 = vsel %vm1686_vm6, %v6278_v33, 0.0  ;;  %v6283_v39 = vpop.eup %5534 }
 0x3ff   :  { %v1683_v49 = vpop.f32.mrf.mxu3  ;;  %1739 = vadd.xlane.f32.xlu0 %v1738_v13  ;;  %v1735_v30 = vsel %vm1686_vm6, %v6283_v39, 0.0 }
 0x400   :  { %v1684_v20 = vadd.f32 %v1683_v49, %v1657_v40 }
 0x402   :  { %v1708_v58 = vsel %vm1686_vm6, %v1684_v20, -inf }
 0x403   :  { %1709 = vmax.xlane.f32.xlu2 %v1708_v58 }
 0x40b   :  { %1736 = vadd.xlane.f32.xlu2 %v1735_v30 }
 0x40d   :  { %v1695_v21 = vpop.xlane.xlu2 %1694 }
 0x40e   :  { %v1713_v9 = vsub.f32 %v6255_v27, %v1695_v21  ;;  %v6302_v27 = vpack.i.bf16 %v5984_v26, %v5960_v54 }
 0x410   :  { %v1723_v41 = vmul.f32 1.442695, %v1713_v9 }
 0x412   :  { %5536 = vpow2.f32 %v1723_v41 }
 0x413   :  { %5423 = vrot.lane.b32.xlu0 %v6290_v34, %s5695_s6 }
 0x415   :  { %v6318_v51 = vpop.xlane.xlu0 %1697 }
 0x418   :  { %v6294_v43 = vpop.eup %5536 }
 0x419   :  { %v1741_v50 = vsel %vm1686_vm6, %v6294_v43, 0.0 }
 0x41a   :  { %1742 = vadd.xlane.f32.xlu1 %v1741_v50 }
 0x41b   :  { %1934 = vrot.lane.b32.xlu0 %v6071_v0, %s5696_s7 }
 0x423   :  { %5418 = vrot.lane.b32.xlu2 %v6302_v27, %s5695_s6  ;;  %2146 = vrot.lane.b32.xlu0 %v6057_v35, %s5697_s8 }
 0x42b   :  { %1940 = vrot.lane.b32.xlu2 %v6035_v12, %s5697_s8 }
 0x433   :  { %1938 = vrot.lane.b32.xlu2 %v6046_v15, %s5697_s8 }
 0x43b   :  { %1936 = vrot.lane.b32.xlu2 %v6088_v3, %s5696_s7 }
 0x443   :  { %2144 = vrot.lane.b32.xlu2 %v6040_v22, %s5697_s8 }
 0x44b   :  { %2142 = vrot.lane.b32.xlu2 %v6129_v14, %s5696_s7 }
 0x453   :  { %2346 = vrot.lane.b32.xlu2 %v6173_v42, %s5696_s7 }
 0x457   :  { %v1701_v63 = vpop.xlane.xlu0 %1700 }
 0x458   :  { %v1715_v55 = vsub.f32 %v6265_v7, %v1701_v63 }
 0x45a   :  { %v1727_v56 = vmul.f32 1.442695, %v1715_v55 }
 0x45b   :  { %2558 = vrot.lane.b32.xlu2 %v6105_v46, %s5697_s8 }
 0x45c   :  { %5538 = vpow2.f32 %v1727_v56 }
 0x45f   :  { %v1704_v10 = vpop.xlane.xlu0 %1703 }
 0x460   :  { %v1716_v28 = vsub.f32 %v6269_v17, %v1704_v10 }
 0x462   :  { %v6326_v37 = vpop.eup %5538  ;;  %v1729_v38 = vmul.f32 1.442695, %v1716_v28 }
 0x463   :  { %2552 = vrot.lane.b32.xlu2 %v6190_v2, %s5696_s7  ;;  %v1747_v48 = vsel %vm1686_vm6, %v6326_v37, 0.0 }
 0x464   :  { %5540 = vpow2.f32 %v1729_v38  ;;  %1748 = vadd.xlane.f32.xlu1 %v1747_v48 }
 0x46a   :  { %v6332_v7 = vpop.eup %5540 }
 0x46b   :  { %v1750_v31 = vsel %vm1686_vm6, %v6332_v7, 0.0 }
 0x46c   :  { %1751 = vadd.xlane.f32.xlu0 %v1750_v31 }
 0x46e   :  { %v1707_v23 = vpop.xlane.xlu2 %1706 }
 0x46f   :  { %v1717_v45 = vsub.f32 %v1680_v8, %v1707_v23 }
 0x471   :  { %v1731_v17 = vmul.f32 1.442695, %v1717_v45 }
 0x472   :  { %v1740_v5 = vpop.xlane.xlu0 %1739 }
 0x473   :  { %5542 = vpow2.f32 %v1731_v17 }
 0x476   :  { %v1710_v59 = vpop.xlane.xlu2 %1709 }
 0x477   :  { %v1718_v6 = vsub.f32 %v1684_v20, %v1710_v59 }
 0x479   :  { %v6336_v61 = vpop.eup %5542  ;;  %v1733_v11 = vmul.f32 1.442695, %v1718_v6 }
 0x47a   :  { %v1753_v19 = vsel %vm1686_vm6, %v6336_v61, 0.0 }
 0x47b   :  { %5544 = vpow2.f32 %v1733_v11  ;;  %1754 = vadd.xlane.f32.xlu0 %v1753_v19 }
 0x47d   :  { %5413 = vrot.lane.b32.xlu1 %v6342_v4, %s5695_s6 }
 0x47e   :  { %v1737_v8 = vpop.xlane.xlu2 %1736 }
 0x47f   :  { %5546 = vrcp.f32 %v1737_v8 }
 0x480   :  { %5548 = vrcp.f32 %v1740_v5 }
 0x481   :  { %v6346_v24 = vpop.eup %5544 }
 0x482   :  { %v1756_v40 = vsel %vm1686_vm6, %v6346_v24, 0.0 }
 0x483   :  { %1757 = vadd.xlane.f32.xlu0 %v1756_v40 }
 0x485   :  { %v5547_v13 = vpop.eup %5546  ;;  %v6350_v49 = vpop.permute.xlu0 %5423 }
 0x486   :  { %v5419_v20 = vpop.permute.xlu2 %5418  ;;  %v1767_v21 = vmul.f32 %v5547_v13, %v6283_v39  ;;  %v5426_v9 = vunpack.i.h.bf16 %v6350_v49  ;;  %v5549_v41 = vpop.eup %5548 }
 0x487   :  { %v5421_v58 = vunpack.i.h.bf16 %v5419_v20  ;;  %v5420_v30 = vunpack.i.l.bf16 %v5419_v20  ;;  %v1768_v39 = vmul.f32 %v5549_v41, %v6278_v33  ;;  %v1714_v33 = vsub.f32 %v6259_v44, %v6318_v51 }
 0x489   :  { %1804 = vmatpush.msra.mxu0 %v5420_v30  ;;  %1840 = vmatpush.msrb.mxu1 %v5421_v58  ;;  %v1725_v44 = vmul.f32 1.442695, %v1714_v33 }
 0x48a   :  { %5338 = vmatmul.msk.f32.vlgmr.msra.gmra.mxu0 %vm1686_vm6, %v1767_v21 }
 0x48b   :  { %1841 = vmatpush.msrb.mxu1 %v5426_v9 }
 0x48d   :  { %v1743_v50 = vpop.xlane.xlu1 %1742  ;;  %v1935_v63 = vpop.permute.xlu0 %1934 }
 0x48e   :  { %5550 = vrcp.f32 %v1743_v50  ;;  %v1942_v55 = vsel %vm867_vm1, %v1935_v63, 0  ;;  %v1941_v56 = vpop.permute.xlu2 %1940 }
 0x48f   :  { %v6356_v10 = vand.u32 4294901760, %v1942_v55  ;;  %v1948_v28 = vsel %vm867_vm1, %v1941_v56, 0  ;;  %5552 = vpow2.f32 %v1725_v44 }
 0x490   :  { %v6359_v38 = vand.u32 4294901760, %v1948_v28 }
 0x491   :  { %v6363_v48 = vsub.f32 %v1942_v55, %v6356_v10 }
 0x492   :  { %v6366_v31 = vsub.f32 %v1948_v28, %v6359_v38  ;;  %5339 = vmatmul.msk.f32.gmra.mxu0 %vm1686_vm6, %v1768_v39 }
 0x493   :  { %v1970_v23 = vand.u32 4294901760, %v6363_v48  ;;  %1965 = vmatpush.xpose.msrb.mxu0 %v6359_v38 }
 0x494   :  { %v5551_v45 = vpop.eup %5550  ;;  %v2001_v17 = vand.u32 4294901760, %v6366_v31 }
 0x495   :  { %v1769_v59 = vmul.f32 %v5551_v45, %v6294_v43  ;;  %v2147_v6 = vpop.permute.xlu0 %2146  ;;  %v1971_v5 = vsub.f32 %v6363_v48, %v1970_v23  ;;  %v6407_v28 = vpop.eup %5552 }
 0x496   :  { %v2002_v11 = vsub.f32 %v6366_v31, %v2001_v17  ;;  %v1939_v19 = vpop.permute.xlu2 %1938  ;;  %v2154_v8 = vsel %vm867_vm1, %v2147_v6, 0  ;;  %v1744_v6 = vsel %vm1686_vm6, %v6407_v28, 0.0 }
 0x497   :  { %v1946_v40 = vsel %vm867_vm1, %v1939_v19, 0  ;;  %2140 = vrot.lane.b32.xlu0 %v6115_v62, %s5696_s7  ;;  %5340 = vmatmul.msk.f32.vlgmr.msrb.gmra.mxu1 %vm1686_vm6, %v1769_v59  ;;  %v6386_v51 = vand.u32 4294901760, %v2154_v8  ;;  %v1972_v58 = vand.u32 4294901760, %v1971_v5 }
 0x498   :  { %v6384_v43 = vand.u32 4294901760, %v1946_v40  ;;  %v2003_v13 = vand.u32 4294901760, %v2002_v11 }
 0x499   :  { %v6394_v21 = vsub.f32 %v2154_v8, %v6386_v51 }
 0x49a   :  { %v6389_v20 = vsub.f32 %v1946_v40, %v6384_v43  ;;  %1967 = vmatpush.xpose.msrb.mxu0 %v6384_v43  ;;  %2004 = vmatpush.xpose.msra.mxu1 %v2003_v13 }
 0x49c   :  { %v2007_v30 = vand.u32 4294901760, %v6389_v20 }
 0x49d   :  { %1973 = vmatmul.f32.vlgmr.msrb.gmra.mxu0 %v1972_v58  ;;  %v2207_v58 = vand.u32 4294901760, %v6394_v21 }
 0x49e   :  { %2099 = vmatpush.xpose.msra.mxu0 %v2001_v17  ;;  %v1937_v9 = vpop.permute.xlu2 %1936  ;;  %v2008_v41 = vsub.f32 %v6389_v20, %v2007_v30 }
 0x49f   :  { %v1944_v50 = vsel %vm867_vm1, %v1937_v9, 0  ;;  %2350 = vrot.lane.b32.xlu0 %v6093_v16, %s5697_s8 }
 0x4a0   :  { %v6400_v63 = vand.u32 4294901760, %v1944_v50  ;;  %v2009_v55 = vand.u32 4294901760, %v2008_v41 }
 0x4a2   :  { %2103 = vmatpush.xpose.msra.mxu0 %v2007_v30  ;;  %v6404_v56 = vsub.f32 %v1944_v50, %v6400_v63  ;;  %2010 = vmatpush.xpose.msra.mxu1 %v2009_v55  ;;  %v5425_v50 = vunpack.i.l.bf16 %v6350_v49  ;;  %v2208_v55 = vsub.f32 %v6394_v21, %v2207_v58 }
 0x4a4   :  { %v1978_v39 = vand.u32 4294901760, %v6404_v56 }
 0x4a6   :  { %2242 = vmatpush.xpose.msrb.mxu0 %v6394_v21  ;;  %2128 = vmatpush.xpose.msrb.mxu1 %v6359_v38  ;;  %v2145_v45 = vpop.permute.xlu2 %2144  ;;  %v1979_v17 = vsub.f32 %v6404_v56, %v1978_v39 }
 0x4a7   :  { %v2152_v59 = vsel %vm867_vm1, %v2145_v45, 0  ;;  %2348 = vrot.lane.b32.xlu0 %v6181_v52, %s5696_s7  ;;  %1745 = vadd.xlane.f32.xlu1 %v1744_v6 }
 0x4a8   :  { %v6419_v33 = vand.u32 4294901760, %v2152_v59  ;;  %v1980_v11 = vand.u32 4294901760, %v1979_v17 }
 0x4aa   :  { %2130 = vmatpush.xpose.msrb.mxu1 %v6384_v43  ;;  %v2212_v19 = vsub.f32 %v2152_v59, %v6419_v33  ;;  %1981 = vmatmul.f32.gmra.mxu0 %v1980_v11 }
 0x4ac   :  { %2245 = vmatpush.xpose.msrb.mxu0 %v2212_v19  ;;  %v2213_v45 = vand.u32 4294901760, %v2212_v19 }
 0x4ae   :  { %v2214_v49 = vsub.f32 %v2212_v19, %v2213_v45 }
 0x4af   :  { %2556 = vrot.lane.b32.xlu0 %v6151_v25, %s5697_s8 }
 0x4b2   :  { %2105 = vmatmul.f32.vlgmr.msra.gmra.mxu0 %v6356_v10 }
 0x4b7   :  { %2554 = vrot.lane.b32.xlu0 %v6202_v32, %s5696_s7 }
 0x4ba   :  { %2109 = vmatmul.f32.gmra.mxu0 %v6400_v63 }
 0x4c0   :  { %2352 = vrot.lane.b32.xlu1 %v6052_v29, %s5697_s8 }
 0x4c8   :  { %5428 = vrot.lane.b32.xlu1 %v6160_v53, %s5698_s9 }
 0x4d7   :  { %v1749_v5 = vpop.xlane.xlu1 %1748 }
 0x4d8   :  { %5554 = vrcp.f32 %v1749_v5 }
 0x4de   :  { %v5555_v40 = vpop.eup %5554 }
 0x4df   :  { %v1752_v8 = vpop.xlane.xlu0 %1751  ;;  %v1771_v41 = vmul.f32 %v5555_v40, %v6326_v37  ;;  %v2209_v37 = vand.u32 4294901760, %v2208_v55 }
 0x4ee   :  { %v1755_v13 = vpop.xlane.xlu0 %1754 }
 0x4ef   :  { %5556 = vrcp.f32 %v1755_v13  ;;  %v5414_v44 = vpop.permute.xlu1 %5413 }
 0x4f0   :  { %5558 = vrcp.f32 %v1752_v8  ;;  %v5416_v30 = vunpack.i.h.bf16 %v5414_v44  ;;  %v5415_v9 = vunpack.i.l.bf16 %v5414_v44 }
 0x4f2   :  { %1878 = vmatpush.msrb.mxu2 %v5415_v9  ;;  %1914 = vmatpush.msrb.mxu3 %v5416_v30 }
 0x4f3   :  { %5342 = vmatmul.msk.f32.vlgmr.msrb.gmra.mxu2 %vm1686_vm6, %v1771_v41 }
 0x4f4   :  { %2036 = vmatpush.xpose.msra.mxu2 %v6366_v31  ;;  %1915 = vmatpush.msrb.mxu3 %v5425_v50 }
 0x4f5   :  { %v5557_v17 = vpop.eup %5556 }
 0x4f6   :  { %2066 = vmatpush.xpose.msra.mxu3 %v6359_v38  ;;  %v5559_v59 = vpop.eup %5558  ;;  %v1773_v6 = vmul.f32 %v5557_v17, %v6336_v61  ;;  %v1758_v11 = vpop.xlane.xlu0 %1757  ;;  %v2215_v38 = vand.u32 4294901760, %v2214_v49 }
 0x4f7   :  { %5560 = vrcp.f32 %v1758_v11  ;;  %v1772_v31 = vmul.f32 %v5559_v59, %v6332_v7 }
 0x4f8   :  { %5344 = vmatmul.msk.f32.vlgmr.msrb.gmra.mxu3 %vm1686_vm6, %v1773_v6  ;;  %2039 = vmatpush.xpose.msra.mxu2 %v6389_v20  ;;  %v2143_v20 = vpop.permute.xlu2 %2142 }
 0x4fa   :  { %2068 = vmatpush.xpose.msra.mxu3 %v6384_v43  ;;  %v2150_v43 = vsel %vm867_vm1, %v2143_v20, 0 }
 0x4fb   :  { %5343 = vmatmul.msk.f32.gmra.mxu2 %vm1686_vm6, %v1772_v31  ;;  %v2182_v5 = vand.u32 4294901760, %v2150_v43 }
 0x4fc   :  { %2171 = vmatpush.xpose.msrb.mxu2 %v6386_v51 }
 0x4fd   :  { %v5561_v21 = vpop.eup %5560  ;;  %v6460_v13 = vsub.f32 %v2150_v43, %v2182_v5 }
 0x4fe   :  { %2210 = vmatpush.xpose.msrb.mxu3 %v2209_v37  ;;  %v1774_v61 = vmul.f32 %v5561_v21, %v6346_v24 }
 0x500   :  { %2173 = vmatpush.xpose.msrb.mxu2 %v6419_v33  ;;  %5345 = vmatmul.msk.f32.gmra.mxu3 %vm1686_vm6, %v1774_v61 }
 0x502   :  { %2216 = vmatpush.xpose.msrb.mxu3 %v2215_v38 }
 0x503   :  { %2042 = vmatmul.f32.vlgmr.msra.gmra.mxu2 %v6363_v48 }
 0x504   :  { %2305 = vmatpush.xpose.msra.mxu2 %v2207_v58  ;;  %v2184_v58 = vand.u32 4294901760, %v6460_v13 }
 0x506   :  { %v2185_v50 = vsub.f32 %v6460_v13, %v2184_v58 }
 0x507   :  { %v1806_v19 = vpop.f32.mrf.mxu0 }
 0x508   :  { %1923 = vst.msk [vmem:[#allocation2] sm:$0xff] %vm867_vm1, %v1806_v19  ;;  %2072 = vmatmul.f32.vlgmr.msra.gmra.mxu3 %v1970_v23  ;;  %2309 = vmatpush.xpose.msra.mxu2 %v2213_v45  ;;  %v2186_v55 = vand.u32 4294901760, %v2185_v50 }
 0x509   :  { %2334 = vmatpush.xpose.msra.mxu3 %v6386_v51  ;;  %v2141_v7 = vpop.permute.xlu0 %2140 }
 0x50a   :  { %v2148_v24 = vsel %vm867_vm1, %v2141_v7, 0 }
 0x50b   :  { %v2174_v8 = vand.u32 4294901760, %v2148_v24  ;;  %2047 = vmatmul.f32.gmra.mxu2 %v6404_v56  ;;  %v2347_v56 = vpop.permute.xlu2 %2346 }
 0x50c   :  { %v2354_v37 = vsel %vm867_vm1, %v2347_v56, 0 }
 0x50d   :  { %v6457_v40 = vsub.f32 %v2148_v24, %v2174_v8  ;;  %2336 = vmatpush.xpose.msra.mxu3 %v6419_v33  ;;  %v6482_v38 = vand.u32 4294901760, %v2354_v37 }
 0x50f   :  { %v2176_v44 = vand.u32 4294901760, %v6457_v40  ;;  %v1809_v48 = vpop.f32.mrf.mxu0  ;;  %2248 = vmatmul.f32.vlgmr.msrb.gmra.mxu0 %v6457_v40  ;;  %v2381_v19 = vsub.f32 %v2354_v37, %v6482_v38 }
 0x510   :  { %1924 = vst.msk [vmem:[#allocation2 + $0x8] sm:$0xff] %vm867_vm1, %v1809_v48  ;;  %2078 = vmatmul.f32.gmra.mxu3 %v1978_v39 }
 0x511   :  { %v2177_v23 = vsub.f32 %v6457_v40, %v2176_v44  ;;  %v2351_v41 = vpop.permute.xlu0 %2350 }
 0x512   :  { %v2358_v61 = vsel %vm867_vm1, %v2351_v41, 0 }
 0x513   :  { %v2178_v30 = vand.u32 4294901760, %v2177_v23  ;;  %v2559_v6 = vpop.permute.xlu2 %2558  ;;  %v6492_v43 = vand.u32 4294901760, %v2358_v61  ;;  %v2382_v23 = vand.u32 4294901760, %v2381_v19 }
 0x514   :  { %v1843_v9 = vpop.f32.mrf.mxu1  ;;  %v2566_v11 = vsel %vm867_vm1, %v2559_v6, 0 }
 0x515   :  { %1925 = vst.msk [vmem:[#allocation2 + $0x10] sm:$0xff] %vm867_vm1, %v1843_v9  ;;  %2179 = vmatmul.f32.vlgmr.msrb.gmra.mxu2 %v2178_v30  ;;  %v6480_v31 = vand.u32 4294901760, %v2566_v11  ;;  %v2418_v9 = vsub.f32 %v2358_v61, %v6492_v43 }
 0x517   :  { %2253 = vmatmul.f32.gmra.mxu0 %v6460_v13 }
 0x518   :  { %2218 = vmatmul.f32.vlgmr.msrb.gmra.mxu3 %v2174_v8 }
 0x519   :  { %v2349_v45 = vpop.permute.xlu0 %2348 }
 0x51a   :  { %v1746_v39 = vpop.xlane.xlu1 %1745  ;;  %v2356_v7 = vsel %vm867_vm1, %v2349_v45, 0 }
 0x51b   :  { %5562 = vrcp.f32 %v1746_v39  ;;  %v6497_v30 = vand.u32 4294901760, %v2356_v7  ;;  %v2383_v39 = vsub.f32 %v2381_v19, %v2382_v23 }
 0x51d   :  { %2187 = vmatmul.f32.gmra.mxu2 %v2186_v55  ;;  %v2553_v55 = vpop.permute.xlu2 %2552  ;;  %v2384_v37 = vand.u32 4294901760, %v2383_v39 }
 0x520   :  { %2222 = vmatmul.f32.gmra.mxu3 %v2182_v5 }
 0x521   :  { %v5563_v17 = vpop.eup %5562  ;;  %v2557_v49 = vpop.permute.xlu0 %2556 }
 0x522   :  { %v1770_v59 = vmul.f32 %v5563_v17, %v6407_v28  ;;  %v2564_v21 = vsel %vm867_vm1, %v2557_v49, 0  ;;  %v2618_v28 = vsub.f32 %v2566_v11, %v6480_v31  ;;  %v2419_v17 = vand.u32 4294901760, %v2418_v9 }
 0x523   :  { %v6489_v20 = vand.u32 4294901760, %v2564_v21  ;;  %v2560_v49 = vsel %vm867_vm1, %v2553_v55, 0 }
 0x524   :  { %5341 = vmatmul.msk.f32.gmra.mxu1 %vm1686_vm6, %v1770_v59  ;;  %v2619_v24 = vand.u32 4294901760, %v2618_v28 }
 0x525   :  { %2311 = vmatmul.f32.vlgmr.msra.gmra.mxu2 %v2174_v8 }
 0x528   :  { %2338 = vmatmul.f32.vlgmr.msra.gmra.mxu3 %v2174_v8  ;;  %v2624_v8 = vsub.f32 %v2564_v21, %v6489_v20 }
 0x52a   :  { %v2625_v50 = vand.u32 4294901760, %v2624_v8 }
 0x52c   :  { %2012 = vmatmul.f32.vlgmr.msra.gmra.mxu1 %v6356_v10  ;;  %v2626_v11 = vsub.f32 %v2624_v8, %v2625_v50 }
 0x52d   :  { %2315 = vmatmul.f32.gmra.mxu2 %v2182_v5  ;;  %2272 = vmatpush.xpose.msra.mxu1 %v6386_v51 }
 0x530   :  { %2342 = vmatmul.f32.gmra.mxu3 %v2182_v5  ;;  %v2620_v5 = vsub.f32 %v2618_v28, %v2619_v24 }
 0x531   :  { %2274 = vmatpush.xpose.msra.mxu1 %v6419_v33  ;;  %v2389_v33 = vsub.f32 %v2356_v7, %v6497_v30  ;;  %v2420_v7 = vsub.f32 %v2418_v9, %v2419_v17 }
 0x532   :  { %v2353_v48 = vpop.permute.xlu1 %2352  ;;  %v2621_v59 = vand.u32 4294901760, %v2620_v5 }
 0x533   :  { %v2360_v51 = vsel %vm867_vm1, %v2353_v48, 0  ;;  %v2390_v21 = vand.u32 4294901760, %v2389_v33  ;;  %v2586_v48 = vand.u32 4294901760, %v2560_v49  ;;  %v2421_v39 = vand.u32 4294901760, %v2420_v7 }
 0x534   :  { %v2376_v41 = vand.u32 4294901760, %v2360_v51  ;;  %2016 = vmatmul.f32.gmra.mxu1 %v6400_v63 }
 0x535   :  { %v2391_v5 = vsub.f32 %v2389_v33, %v2390_v21  ;;  %v2587_v55 = vsub.f32 %v2560_v49, %v2586_v48 }
 0x536   :  { %v2412_v56 = vsub.f32 %v2360_v51, %v2376_v41  ;;  %2377 = vmatpush.xpose.msra.mxu0 %v2376_v41  ;;  %2478 = vmatpush.xpose.msrb.mxu3 %v2376_v41  ;;  %v2627_v51 = vand.u32 4294901760, %v2626_v11  ;;  %v6531_v11 = vld [vmem:[#allocation3 + $0x10] sm:$0xff] }
 0x538   :  { %v2413_v45 = vand.u32 4294901760, %v2412_v56  ;;  %2448 = vmatpush.xpose.msrb.mxu2 %v2412_v56 }
 0x53a   :  { %v2414_v6 = vsub.f32 %v2412_v56, %v2413_v45  ;;  %2379 = vmatpush.xpose.msra.mxu0 %v6492_v43  ;;  %2480 = vmatpush.xpose.msrb.mxu3 %v6492_v43  ;;  %v2555_v56 = vpop.permute.xlu0 %2554 }
 0x53c   :  { %v2415_v61 = vand.u32 4294901760, %v2414_v6  ;;  %2132 = vmatmul.f32.vlgmr.msrb.gmra.mxu1 %v6356_v10  ;;  %2451 = vmatpush.xpose.msrb.mxu2 %v2418_v9  ;;  %v2562_v10 = vsel %vm867_vm1, %v2555_v56, 0 }
 0x53d   :  { %2385 = vmatmul.f32.vlgmr.msra.gmra.mxu0 %v2384_v37  ;;  %2484 = vmatmul.f32.vlgmr.msrb.gmra.mxu3 %v2382_v23  ;;  %v2392_v23 = vand.u32 4294901760, %v2391_v5  ;;  %v2594_v9 = vand.u32 4294901760, %v2562_v10 }
 0x53e   :  { %2511 = vmatpush.xpose.msrb.mxu0 %v2413_v45  ;;  %2622 = vmatpush.xpose.msra.mxu3 %v2621_v59 }
 0x53f   :  { %2416 = vmatpush.xpose.msrb.mxu1 %v2415_v61  ;;  %2454 = vmatmul.f32.vlgmr.msrb.gmra.mxu2 %v2381_v19  ;;  %v2588_v19 = vand.u32 4294901760, %v2587_v55 }
 0x540   :  { %2583 = vmatpush.xpose.msra.mxu2 %v6480_v31 }
 0x541   :  { %v2589_v45 = vsub.f32 %v2587_v55, %v2588_v19 }
 0x542   :  { %2515 = vmatpush.xpose.msrb.mxu0 %v2419_v17  ;;  %2628 = vmatpush.xpose.msra.mxu3 %v2627_v51  ;;  %v2595_v17 = vsub.f32 %v2562_v10, %v2594_v9  ;;  %v6534_v51 = vld [vmem:[#allocation3 + $0x18] sm:$0xff] }
 0x543   :  { %2422 = vmatpush.xpose.msrb.mxu1 %v2421_v39 }
 0x544   :  { %2585 = vmatpush.xpose.msra.mxu2 %v6489_v20  ;;  %2136 = vmatmul.f32.gmra.mxu1 %v6400_v63  ;;  %v2590_v63 = vand.u32 4294901760, %v2589_v45 }
 0x545   :  { %2393 = vmatmul.f32.gmra.mxu0 %v2392_v23  ;;  %2490 = vmatmul.f32.gmra.mxu3 %v2390_v21 }
 0x546   :  { %2654 = vmatpush.xpose.msra.mxu0 %v2618_v28  ;;  %2746 = vmatpush.xpose.msrb.mxu3 %v6480_v31  ;;  %v5429_v28 = vpop.permute.xlu1 %5428 }
 0x547   :  { %2459 = vmatmul.f32.gmra.mxu2 %v2389_v33  ;;  %v5431_v59 = vunpack.i.h.bf16 %v5429_v28 }
 0x548   :  { %2717 = vmatpush.xpose.msrb.mxu2 %v2619_v24  ;;  %v2596_v24 = vand.u32 4294901760, %v2595_v17 }
 0x54a   :  { %2657 = vmatpush.xpose.msra.mxu0 %v2624_v8  ;;  %2748 = vmatpush.xpose.msrb.mxu3 %v6489_v20  ;;  %v5430_v8 = vunpack.i.l.bf16 %v5429_v28 }
 0x54c   :  { %2721 = vmatpush.xpose.msrb.mxu2 %v2625_v50  ;;  %2278 = vmatmul.f32.vlgmr.msra.gmra.mxu1 %v2176_v44  ;;  %v2597_v50 = vsub.f32 %v2595_v17, %v2596_v24 }
 0x54d   :  { %2540 = vmatpush.xpose.msra.mxu1 %v2376_v41  ;;  %2517 = vmatmul.f32.vlgmr.msrb.gmra.mxu0 %v6482_v38 }
 0x54e   :  { %2630 = vmatmul.f32.vlgmr.msra.gmra.mxu3 %v2586_v48  ;;  %2872 = vmatpush.msrb.mxu0 %v5431_v59  ;;  %v2598_v40 = vand.u32 4294901760, %v2597_v50 }
 0x54f   :  { %2591 = vmatmul.f32.vlgmr.msra.gmra.mxu2 %v2590_v63 }
 0x550   :  { %2942 = vmatpush.msra.mxu2 %v5430_v8 }
 0x551   :  { %2542 = vmatpush.xpose.msra.mxu1 %v6492_v43 }
 0x554   :  { %2284 = vmatmul.f32.gmra.mxu1 %v2184_v58 }
 0x555   :  { %2521 = vmatmul.f32.gmra.mxu0 %v6497_v30 }
 0x556   :  { %2634 = vmatmul.f32.gmra.mxu3 %v2594_v9 }
 0x557   :  { %2599 = vmatmul.f32.gmra.mxu2 %v2598_v40 }
 0x55c   :  { %2424 = vmatmul.f32.vlgmr.msrb.gmra.mxu1 %v6482_v38 }
 0x55d   :  { %2684 = vmatpush.xpose.msrb.mxu1 %v6480_v31  ;;  %2660 = vmatmul.f32.vlgmr.msra.gmra.mxu0 %v2587_v55 }
 0x55e   :  { %2750 = vmatmul.f32.vlgmr.msrb.gmra.mxu3 %v2586_v48 }
 0x55f   :  { %2723 = vmatmul.f32.vlgmr.msrb.gmra.mxu2 %v2586_v48 }
 0x561   :  { %2686 = vmatpush.xpose.msrb.mxu1 %v6489_v20  ;;  %v1974_v20 = vpop.f32.mrf.mxu0 }
 0x562   :  { %v1975_v21 = vadd.f32 %v1974_v20, %v6531_v11 }
 0x564   :  { %2428 = vmatmul.f32.gmra.mxu1 %v6497_v30 }
 0x565   :  { %2665 = vmatmul.f32.gmra.mxu0 %v2595_v17 }
 0x566   :  { %2754 = vmatmul.f32.gmra.mxu3 %v2594_v9 }
 0x567   :  { %2727 = vmatmul.f32.gmra.mxu2 %v2594_v9 }
 0x56c   :  { %2544 = vmatmul.f32.vlgmr.msra.gmra.mxu1 %v6482_v38  ;;  %v1982_v38 = vpop.f32.mrf.mxu0 }
 0x56d   :  { %v1983_v55 = vadd.f32 %v1982_v38, %v6534_v51 }
 0x574   :  { %2548 = vmatmul.f32.gmra.mxu1 %v6497_v30  ;;  %v2106_v37 = vpop.f32.mrf.mxu0 }
 0x576   :  { %v1880_v13 = vpop.f32.mrf.mxu2 }
 0x577   :  { %1927 = vst.msk [vmem:[#allocation2 + $0x20] sm:$0xff] %vm867_vm1, %v1880_v13 }
 0x57b   :  { %v1917_v44 = vpop.f32.mrf.mxu3 }
 0x57c   :  { %1929 = vst.msk [vmem:[#allocation2 + $0x30] sm:$0xff] %vm867_vm1, %v1917_v44  ;;  %2690 = vmatmul.f32.vlgmr.msrb.gmra.mxu1 %v2588_v19  ;;  %v2110_v56 = vpop.f32.mrf.mxu0 }
 0x57e   :  { %v1883_v58 = vpop.f32.mrf.mxu2 }
 0x57f   :  { %1928 = vst.msk [vmem:[#allocation2 + $0x28] sm:$0xff] %vm867_vm1, %v1883_v58 }
 0x583   :  { %v1920_v31 = vpop.f32.mrf.mxu3 }
 0x584   :  { %1930 = vst.msk [vmem:[#allocation2 + $0x38] sm:$0xff] %vm867_vm1, %v1920_v31  ;;  %2696 = vmatmul.f32.gmra.mxu1 %v2596_v24 }
 0x586   :  { %v2043_v43 = vpop.f32.mrf.mxu2 }
 0x58b   :  { %v2073_v41 = vpop.f32.mrf.mxu3 }
 0x58c   :  { %v2249_v17 = vpop.f32.mrf.mxu0 }
 0x58e   :  { %v2048_v33 = vpop.f32.mrf.mxu2 }
 0x593   :  { %v2079_v6 = vpop.f32.mrf.mxu3 }
 0x594   :  { %v2254_v20 = vpop.f32.mrf.mxu0 }
 0x598   :  { %v2180_v61 = vpop.f32.mrf.mxu2 }
 0x599   :  { %v2181_v40 = vadd.f32 %v2180_v61, %v6531_v11 }
 0x59b   :  { %v2219_v48 = vpop.f32.mrf.mxu3 }
 0x5a0   :  { %v2188_v19 = vpop.f32.mrf.mxu2 }
 0x5a1   :  { %v1846_v30 = vpop.f32.mrf.mxu1  ;;  %v2189_v38 = vadd.f32 %v2188_v19, %v6534_v51 }
 0x5a2   :  { %1926 = vst.msk [vmem:[#allocation2 + $0x18] sm:$0xff] %vm867_vm1, %v1846_v30 }
 0x5a3   :  { %v2223_v9 = vpop.f32.mrf.mxu3 }
 0x5a4   :  { %v2224_v61 = vadd.f32 %v2223_v9, %v2189_v38 }
 0x5a8   :  { %v2312_v50 = vpop.f32.mrf.mxu2 }
 0x5a9   :  { %v2013_v49 = vpop.f32.mrf.mxu1 }
 0x5aa   :  { %v2014_v7 = vadd.f32 %v2013_v49, %v1975_v21 }
 0x5ab   :  { %v2339_v44 = vpop.f32.mrf.mxu3 }
 0x5ac   :  { %v2044_v5 = vadd.f32 %v2043_v43, %v2014_v7  ;;  %v2220_v43 = vadd.f32 %v2219_v48, %v2181_v40 }
 0x5ae   :  { %v2074_v23 = vadd.f32 %v2073_v41, %v2044_v5 }
 0x5b0   :  { %v2107_v45 = vadd.f32 %v2106_v37, %v2074_v23  ;;  %v2316_v30 = vpop.f32.mrf.mxu2 }
 0x5b1   :  { %v2017_v39 = vpop.f32.mrf.mxu1 }
 0x5b2   :  { %v2018_v10 = vadd.f32 %v2017_v39, %v1983_v55 }
 0x5b3   :  { %v2343_v49 = vpop.f32.mrf.mxu3 }
 0x5b4   :  { %v2049_v28 = vadd.f32 %v2048_v33, %v2018_v10  ;;  %v2250_v33 = vadd.f32 %v2249_v17, %v2220_v43 }
 0x5b6   :  { %v2080_v8 = vadd.f32 %v2079_v6, %v2049_v28 }
 0x5b8   :  { %v2111_v13 = vadd.f32 %v2110_v56, %v2080_v8  ;;  %v2255_v56 = vadd.f32 %v2254_v20, %v2224_v61 }
 0x5b9   :  { %v2133_v59 = vpop.f32.mrf.mxu1 }
 0x5ba   :  { %v6537_v63 = vadd.f32 %v2133_v59, %v2107_v45  ;;  %v2386_v21 = vpop.f32.mrf.mxu0 }
 0x5bb   :  { %v2387_v59 = vadd.f32 %v2386_v21, %v6531_v11 }
 0x5bc   :  { %v2758_v24 = vsel %vm1686_vm6, %v6537_v63, -inf }
 0x5bd   :  { %2759 = vmax.xlane.f32.xlu2 %v2758_v24 }
 0x5c0   :  { %v2485_v23 = vpop.f32.mrf.mxu3 }
 0x5c1   :  { %v2137_v58 = vpop.f32.mrf.mxu1 }
 0x5c2   :  { %v6542_v31 = vadd.f32 %v2137_v58, %v2111_v13  ;;  %v2455_v39 = vpop.f32.mrf.mxu2  ;;  %v2394_v28 = vpop.f32.mrf.mxu0 }
 0x5c3   :  { %v2395_v58 = vadd.f32 %v2394_v28, %v6534_v51 }
 0x5c4   :  { %v2761_v41 = vsel %vm1686_vm6, %v6542_v31, -inf }
 0x5c5   :  { %2762 = vmax.xlane.f32.xlu0 %v2761_v41 }
 0x5c9   :  { %v2279_v6 = vpop.f32.mrf.mxu1 }
 0x5ca   :  { %v2280_v37 = vadd.f32 %v2279_v6, %v2250_v33  ;;  %v2460_v24 = vpop.f32.mrf.mxu2  ;;  %v2518_v40 = vpop.f32.mrf.mxu0 }
 0x5cc   :  { %v2313_v7 = vadd.f32 %v2312_v50, %v2280_v37  ;;  %v2491_v50 = vpop.f32.mrf.mxu3 }
 0x5ce   :  { %v6547_v5 = vadd.f32 %v2339_v44, %v2313_v7 }
 0x5d0   :  { %v2764_v48 = vsel %vm1686_vm6, %v6547_v5, -inf }
 0x5d1   :  { %v2285_v55 = vpop.f32.mrf.mxu1  ;;  %2765 = vmax.xlane.f32.xlu1 %v2764_v48 }
 0x5d2   :  { %v2286_v10 = vadd.f32 %v2285_v55, %v2255_v56  ;;  %v2592_v41 = vpop.f32.mrf.mxu2  ;;  %v2522_v6 = vpop.f32.mrf.mxu0 }
 0x5d3   :  { %v2593_v55 = vadd.f32 %v2592_v41, %v6531_v11 }
 0x5d4   :  { %v2317_v19 = vadd.f32 %v2316_v30, %v2286_v10  ;;  %v2631_v38 = vpop.f32.mrf.mxu3 }
 0x5d5   :  { %v2632_v28 = vadd.f32 %v2631_v38, %v2593_v55 }
 0x5d6   :  { %v6551_v45 = vadd.f32 %v2343_v49, %v2317_v19 }
 0x5d8   :  { %v2767_v17 = vsel %vm1686_vm6, %v6551_v45, -inf }
 0x5d9   :  { %v2425_v9 = vpop.f32.mrf.mxu1  ;;  %2768 = vmax.xlane.f32.xlu2 %v2767_v17 }
 0x5da   :  { %v2426_v8 = vadd.f32 %v2425_v9, %v2387_v59  ;;  %v2600_v7 = vpop.f32.mrf.mxu2 }
 0x5dc   :  { %v2456_v13 = vadd.f32 %v2455_v39, %v2426_v8  ;;  %v2635_v48 = vpop.f32.mrf.mxu3 }
 0x5de   :  { %v2486_v43 = vadd.f32 %v2485_v23, %v2456_v13  ;;  %v2661_v23 = vpop.f32.mrf.mxu0 }
 0x5df   :  { %v2662_v17 = vadd.f32 %v2661_v23, %v2632_v28 }
 0x5e0   :  { %v2519_v30 = vadd.f32 %v2518_v40, %v2486_v43 }
 0x5e1   :  { %v2429_v44 = vpop.f32.mrf.mxu1 }
 0x5e2   :  { %v2430_v20 = vadd.f32 %v2429_v44, %v2395_v58  ;;  %v2724_v9 = vpop.f32.mrf.mxu2 }
 0x5e4   :  { %v2461_v33 = vadd.f32 %v2460_v24, %v2430_v20  ;;  %v2601_v24 = vadd.f32 %v2600_v7, %v6534_v51 }
 0x5e6   :  { %v2492_v21 = vadd.f32 %v2491_v50, %v2461_v33  ;;  %v2751_v50 = vpop.f32.mrf.mxu3  ;;  %v2666_v13 = vpop.f32.mrf.mxu0  ;;  %v2636_v44 = vadd.f32 %v2635_v48, %v2601_v24 }
 0x5e8   :  { %v2523_v56 = vadd.f32 %v2522_v6, %v2492_v21  ;;  %v2667_v11 = vadd.f32 %v2666_v13, %v2636_v44 }
 0x5e9   :  { %v2545_v37 = vpop.f32.mrf.mxu1 }
 0x5ea   :  { %v2546_v49 = vadd.f32 %v2545_v37, %v2519_v30  ;;  %v2728_v33 = vpop.f32.mrf.mxu2 }
 0x5ec   :  { %v2770_v61 = vsel %vm1686_vm6, %v2546_v49, -inf }
 0x5ed   :  { %2771 = vmax.xlane.f32.xlu1 %v2770_v61 }
 0x5ee   :  { %v2755_v38 = vpop.f32.mrf.mxu3 }
 0x5f1   :  { %v2549_v39 = vpop.f32.mrf.mxu1 }
 0x5f2   :  { %v6559_v10 = vadd.f32 %v2549_v39, %v2523_v56 }
 0x5f4   :  { %v2773_v19 = vsel %vm1686_vm6, %v6559_v10, -inf }
 0x5f5   :  { %2774 = vmax.xlane.f32.xlu2 %v2773_v19 }
 0x5f9   :  { %v2691_v59 = vpop.f32.mrf.mxu1 }
 0x5fa   :  { %v2692_v8 = vadd.f32 %v2691_v59, %v2662_v17 }
 0x5fc   :  { %v2725_v40 = vadd.f32 %v2724_v9, %v2692_v8 }
 0x5fe   :  { %v2752_v58 = vadd.f32 %v2751_v50, %v2725_v40 }
 0x600   :  { %v2776_v20 = vsel %vm1686_vm6, %v2752_v58, -inf }
 0x601   :  { %v2697_v43 = vpop.f32.mrf.mxu1  ;;  %2777 = vmax.xlane.f32.xlu0 %v2776_v20 }
 0x602   :  { %v2698_v41 = vadd.f32 %v2697_v43, %v2667_v11 }
 0x604   :  { %v2729_v30 = vadd.f32 %v2728_v33, %v2698_v41 }
 0x606   :  { %v2756_v6 = vadd.f32 %v2755_v38, %v2729_v30 }
 0x608   :  { %v2779_v37 = vsel %vm1686_vm6, %v2756_v6, -inf }
 0x609   :  { %2780 = vmax.xlane.f32.xlu1 %v2779_v37 }
 0x630   :  { %v2760_v51 = vpop.xlane.xlu2 %2759 }
 0x631   :  { %v2782_v61 = vsub.f32 %v6537_v63, %v2760_v51 }
 0x633   :  { %v2790_v21 = vmul.f32 1.442695, %v2782_v61 }
 0x635   :  { %5564 = vpow2.f32 %v2790_v21 }
 0x638   :  { %v2763_v7 = vpop.xlane.xlu0 %2762 }
 0x639   :  { %v2783_v56 = vsub.f32 %v6542_v31, %v2763_v7 }
 0x63b   :  { %v6568_v48 = vpop.eup %5564  ;;  %v2792_v39 = vmul.f32 1.442695, %v2783_v56 }
 0x63c   :  { %v2806_v55 = vsel %vm1686_vm6, %v6568_v48, 0.0 }
 0x63d   :  { %5566 = vpow2.f32 %v2792_v39  ;;  %2807 = vadd.xlane.f32.xlu1 %v2806_v55 }
 0x643   :  { %v6572_v23 = vpop.eup %5566 }
 0x644   :  { %v2766_v19 = vpop.xlane.xlu1 %2765  ;;  %v2809_v28 = vsel %vm1686_vm6, %v6572_v23, 0.0 }
 0x645   :  { %v2784_v63 = vsub.f32 %v6547_v5, %v2766_v19  ;;  %2810 = vadd.xlane.f32.xlu2 %v2809_v28 }
 0x647   :  { %v2794_v17 = vmul.f32 1.442695, %v2784_v63 }
 0x649   :  { %5568 = vpow2.f32 %v2794_v17 }
 0x64f   :  { %v6577_v31 = vpop.eup %5568 }
 0x650   :  { %v2812_v9 = vsel %vm1686_vm6, %v6577_v31, 0.0 }
 0x651   :  { %2813 = vadd.xlane.f32.xlu0 %v2812_v9 }
 0x656   :  { %5438 = vrot.lane.b32.xlu1 %v6302_v27, %s5698_s9 }
 0x65d   :  { %5443 = vrot.lane.b32.xlu2 %v6290_v34, %s5698_s9 }
 0x65e   :  { %3036 = vrot.lane.b32.xlu1 %v6035_v12, %s5699_s10 }
 0x660   :  { %v2772_v5 = vpop.xlane.xlu1 %2771 }
 0x661   :  { %v2786_v59 = vsub.f32 %v2546_v49, %v2772_v5  ;;  %v2769_v49 = vpop.xlane.xlu2 %2768 }
 0x662   :  { %v2785_v37 = vsub.f32 %v6551_v45, %v2769_v49 }
 0x663   :  { %v2798_v24 = vmul.f32 1.442695, %v2786_v59 }
 0x664   :  { %v2796_v51 = vmul.f32 1.442695, %v2785_v37 }
 0x665   :  { %5570 = vpow2.f32 %v2798_v24  ;;  %3032 = vrot.lane.b32.xlu2 %v6088_v3, %s5700_s11 }
 0x666   :  { %3034 = vrot.lane.b32.xlu1 %v6046_v15, %s5699_s10 }
 0x669   :  { %v2775_v40 = vpop.xlane.xlu2 %2774 }
 0x66a   :  { %v2787_v13 = vsub.f32 %v6559_v10, %v2775_v40 }
 0x66b   :  { %v6591_v8 = vpop.eup %5570 }
 0x66c   :  { %v2818_v50 = vsel %vm1686_vm6, %v6591_v8, 0.0  ;;  %v2800_v44 = vmul.f32 1.442695, %v2787_v13 }
 0x66d   :  { %2819 = vadd.xlane.f32.xlu0 %v2818_v50  ;;  %3240 = vrot.lane.b32.xlu2 %v6040_v22, %s5699_s10 }
 0x66e   :  { %3030 = vrot.lane.b32.xlu1 %v6071_v0, %s5700_s11  ;;  %5572 = vpow2.f32 %v2800_v44 }
 0x674   :  { %v2778_v11 = vpop.xlane.xlu0 %2777  ;;  %v6610_v33 = vpop.eup %5572 }
 0x675   :  { %v2788_v20 = vsub.f32 %v2752_v58, %v2778_v11  ;;  %v2821_v38 = vsel %vm1686_vm6, %v6610_v33, 0.0 }
 0x676   :  { %3242 = vrot.lane.b32.xlu1 %v6057_v35, %s5699_s10 }
 0x677   :  { %v2802_v43 = vmul.f32 1.442695, %v2788_v20 }
 0x679   :  { %5574 = vpow2.f32 %v2802_v43 }
 0x67c   :  { %v2781_v41 = vpop.xlane.xlu1 %2780 }
 0x67d   :  { %v2789_v30 = vsub.f32 %v2756_v6, %v2781_v41 }
 0x67e   :  { %3236 = vrot.lane.b32.xlu1 %v6115_v62, %s5700_s11 }
 0x67f   :  { %v2804_v10 = vmul.f32 1.442695, %v2789_v30  ;;  %v6617_v58 = vpop.eup %5574 }
 0x680   :  { %v2824_v61 = vsel %vm1686_vm6, %v6617_v58, 0.0 }
 0x681   :  { %5433 = vrot.lane.b32.xlu0 %v6342_v4, %s5698_s9  ;;  %5576 = vpow2.f32 %v2804_v10 }
 0x682   :  { %5578 = vpow2.f32 %v2796_v51 }
 0x686   :  { %3446 = vrot.lane.b32.xlu1 %v6093_v16, %s5699_s10 }
 0x687   :  { %v6621_v6 = vpop.eup %5576 }
 0x688   :  { %v2827_v21 = vsel %vm1686_vm6, %v6621_v6, 0.0  ;;  %v6625_v7 = vpop.eup %5578 }
 0x689   :  { %v2815_v45 = vsel %vm1686_vm6, %v6625_v7, 0.0 }
 0x68e   :  { %3444 = vrot.lane.b32.xlu1 %v6181_v52, %s5700_s11 }
 0x696   :  { %3652 = vrot.lane.b32.xlu1 %v6151_v25, %s5699_s10  ;;  %2822 = vadd.xlane.f32.xlu2 %v2821_v38 }
 0x69e   :  { %2825 = vadd.xlane.f32.xlu2 %v2824_v61 }
 0x6a6   :  { %2828 = vadd.xlane.f32.xlu2 %v2827_v21 }
 0x6ab   :  { %2816 = vadd.xlane.f32.xlu0 %v2815_v45 }
 0x6b0   :  { %v2808_v56 = vpop.xlane.xlu1 %2807 }
 0x6b1   :  { %5580 = vrcp.f32 %v2808_v56 }
 0x6b7   :  { %v5581_v19 = vpop.eup %5580 }
 0x6b8   :  { %v2811_v39 = vpop.xlane.xlu2 %2810  ;;  %v2838_v5 = vmul.f32 %v5581_v19, %v6568_v48 }
 0x6be   :  { %3238 = vrot.lane.b32.xlu2 %v6129_v14, %s5700_s11 }
 0x6bf   :  { %3448 = vrot.lane.b32.xlu0 %v6052_v29, %s5699_s10 }
 0x6c0   :  { %v6637_v28 = vpop.permute.xlu2 %5443 }
 0x6c1   :  { %v5446_v24 = vunpack.i.h.bf16 %v6637_v28 }
 0x6c4   :  { %v2814_v55 = vpop.xlane.xlu0 %2813 }
 0x6c5   :  { %5582 = vrcp.f32 %v2814_v55 }
 0x6c6   :  { %3442 = vrot.lane.b32.xlu2 %v6173_v42, %s5700_s11  ;;  %5584 = vrcp.f32 %v2811_v39 }
 0x6c7   :  { %3648 = vrot.lane.b32.xlu0 %v6190_v2, %s5700_s11 }
 0x6c8   :  { %v5439_v63 = vpop.permute.xlu1 %5438  ;;  %v3033_v10 = vpop.permute.xlu2 %3032 }
 0x6c9   :  { %v5441_v17 = vunpack.i.h.bf16 %v5439_v63  ;;  %v5440_v9 = vunpack.i.l.bf16 %v5439_v63  ;;  %v3040_v51 = vsel %vm867_vm1, %v3033_v10, 0 }
 0x6ca   :  { %v6654_v56 = vand.u32 4294901760, %v3040_v51 }
 0x6cb   :  { %v5583_v59 = vpop.eup %5582  ;;  %2873 = vmatpush.msrb.mxu0 %v5440_v9  ;;  %2907 = vmatpush.msra.mxu1 %v5441_v17 }
 0x6cc   :  { %v2840_v50 = vmul.f32 %v5583_v59, %v6577_v31  ;;  %5346 = vmatmul.msk.f32.vlgmr.msrb.gmra.mxu0 %vm1686_vm6, %v2838_v5  ;;  %v5585_v49 = vpop.eup %5584  ;;  %v6662_v63 = vsub.f32 %v3040_v51, %v6654_v56 }
 0x6cd   :  { %2908 = vmatpush.msra.mxu1 %v5446_v24  ;;  %v2839_v44 = vmul.f32 %v5585_v49, %v6572_v23 }
 0x6ce   :  { %3654 = vrot.lane.b32.xlu2 %v6105_v46, %s5699_s10  ;;  %5348 = vmatmul.msk.f32.vlgmr.msra.gmra.mxu1 %vm1686_vm6, %v2840_v50 }
 0x6d0   :  { %v3037_v40 = vpop.permute.xlu1 %3036  ;;  %v3241_v17 = vpop.permute.xlu2 %3240 }
 0x6d1   :  { %v3044_v13 = vsel %vm867_vm1, %v3037_v40, 0  ;;  %v3248_v24 = vsel %vm867_vm1, %v3241_v17, 0  ;;  %v3074_v40 = vand.u32 4294901760, %v6662_v63 }
 0x6d2   :  { %v3060_v48 = vand.u32 4294901760, %v3044_v13 }
 0x6d4   :  { %v3096_v11 = vsub.f32 %v3044_v13, %v3060_v48  ;;  %5347 = vmatmul.msk.f32.gmra.mxu0 %vm1686_vm6, %v2839_v44 }
 0x6d5   :  { %3061 = vmatpush.xpose.msra.mxu0 %v3060_v48 }
 0x6d6   :  { %v3097_v31 = vand.u32 4294901760, %v3096_v11  ;;  %3650 = vrot.lane.b32.xlu2 %v6202_v32, %s5700_s11 }
 0x6d8   :  { %v3098_v20 = vsub.f32 %v3096_v11, %v3097_v31  ;;  %v3035_v43 = vpop.permute.xlu1 %3034 }
 0x6d9   :  { %v3042_v41 = vsel %vm867_vm1, %v3035_v43, 0  ;;  %v3075_v43 = vsub.f32 %v6662_v63, %v3074_v40 }
 0x6da   :  { %v3099_v30 = vand.u32 4294901760, %v3098_v20  ;;  %v3062_v38 = vand.u32 4294901760, %v3042_v41 }
 0x6db   :  { %v3076_v10 = vand.u32 4294901760, %v3075_v43 }
 0x6dc   :  { %v3102_v37 = vsub.f32 %v3042_v41, %v3062_v38  ;;  %3063 = vmatpush.xpose.msra.mxu0 %v3062_v38  ;;  %3100 = vmatpush.xpose.msrb.mxu1 %v3099_v30 }
 0x6de   :  { %v3103_v23 = vand.u32 4294901760, %v3102_v37 }
 0x6e0   :  { %3195 = vmatpush.xpose.msrb.mxu0 %v3097_v31  ;;  %v3031_v61 = vpop.permute.xlu1 %3030  ;;  %v3104_v21 = vsub.f32 %v3102_v37, %v3103_v23  ;;  %v2820_v50 = vpop.xlane.xlu0 %2819  ;;  %v6673_v31 = vand.u32 4294901760, %v3248_v24 }
 0x6e1   :  { %v3038_v45 = vsel %vm867_vm1, %v3031_v61, 0  ;;  %5586 = vrcp.f32 %v2820_v50 }
 0x6e2   :  { %v6656_v39 = vand.u32 4294901760, %v3038_v45  ;;  %v3105_v55 = vand.u32 4294901760, %v3104_v21  ;;  %v3308_v41 = vsub.f32 %v3248_v24, %v6673_v31 }
 0x6e4   :  { %3199 = vmatpush.xpose.msrb.mxu0 %v3103_v23  ;;  %v6659_v19 = vsub.f32 %v3038_v45, %v6656_v39  ;;  %3106 = vmatpush.xpose.msrb.mxu1 %v3105_v55  ;;  %v5445_v45 = vunpack.i.l.bf16 %v6637_v28 }
 0x6e6   :  { %v3066_v9 = vand.u32 4294901760, %v6659_v19 }
 0x6e7   :  { %v5587_v30 = vpop.eup %5586 }
 0x6e8   :  { %3224 = vmatpush.xpose.msra.mxu1 %v3060_v48  ;;  %v3067_v5 = vsub.f32 %v6659_v19, %v3066_v9  ;;  %v3243_v59 = vpop.permute.xlu1 %3242  ;;  %v2842_v21 = vmul.f32 %v5587_v30, %v6591_v8 }
 0x6e9   :  { %v3250_v49 = vsel %vm867_vm1, %v3243_v59, 0  ;;  %v3309_v59 = vand.u32 4294901760, %v3308_v41 }
 0x6ea   :  { %v3068_v13 = vand.u32 4294901760, %v3067_v5  ;;  %v6671_v44 = vand.u32 4294901760, %v3250_v49 }
 0x6eb   :  { %v3310_v30 = vsub.f32 %v3308_v41, %v3309_v59 }
 0x6ec   :  { %3226 = vmatpush.xpose.msra.mxu1 %v3062_v38  ;;  %v3302_v20 = vsub.f32 %v3250_v49, %v6671_v44  ;;  %3069 = vmatmul.f32.vlgmr.msra.gmra.mxu0 %v3068_v13 }
 0x6ee   :  { %3338 = vmatpush.xpose.msra.mxu0 %v3302_v20  ;;  %v3303_v5 = vand.u32 4294901760, %v3302_v20 }
 0x6f0   :  { %v3237_v55 = vpop.permute.xlu1 %3236  ;;  %v3304_v24 = vsub.f32 %v3302_v20, %v3303_v5 }
 0x6f1   :  { %v3244_v8 = vsel %vm867_vm1, %v3237_v55, 0 }
 0x6f2   :  { %3341 = vmatpush.xpose.msra.mxu0 %v3308_v41  ;;  %v6688_v28 = vand.u32 4294901760, %v3244_v8  ;;  %v3305_v43 = vand.u32 4294901760, %v3304_v24 }
 0x6f3   :  { %v5434_v23 = vpop.permute.xlu0 %5433 }
 0x6f4   :  { %v5436_v51 = vunpack.i.h.bf16 %v5434_v23  ;;  %v5435_v61 = vunpack.i.l.bf16 %v5434_v23  ;;  %3077 = vmatmul.f32.gmra.mxu0 %v3076_v10  ;;  %v3311_v10 = vand.u32 4294901760, %v3310_v30 }
 0x6f6   :  { %2943 = vmatpush.msra.mxu2 %v5435_v61  ;;  %2977 = vmatpush.msra.mxu3 %v5436_v51 }
 0x6f7   :  { %5350 = vmatmul.msk.f32.vlgmr.msra.gmra.mxu2 %vm1686_vm6, %v2842_v21 }
 0x6f8   :  { %3132 = vmatpush.xpose.msrb.mxu2 %v3096_v11  ;;  %2978 = vmatpush.msra.mxu3 %v5445_v45  ;;  %v6691_v11 = vsub.f32 %v3244_v8, %v6688_v28  ;;  %v3447_v41 = vpop.permute.xlu1 %3446 }
 0x6f9   :  { %v3454_v24 = vsel %vm867_vm1, %v3447_v41, 0 }
 0x6fa   :  { %3162 = vmatpush.xpose.msrb.mxu3 %v3060_v48  ;;  %v3272_v20 = vand.u32 4294901760, %v6691_v11 }
 0x6fc   :  { %3135 = vmatpush.xpose.msrb.mxu2 %v3102_v37  ;;  %3201 = vmatmul.f32.vlgmr.msrb.gmra.mxu0 %v6656_v39  ;;  %v3273_v55 = vsub.f32 %v6691_v11, %v3272_v20 }
 0x6fe   :  { %3164 = vmatpush.xpose.msrb.mxu3 %v3062_v38 }
 0x700   :  { %3267 = vmatpush.xpose.msra.mxu2 %v6671_v44 }
 0x704   :  { %3269 = vmatpush.xpose.msra.mxu2 %v6673_v31  ;;  %3205 = vmatmul.f32.gmra.mxu0 %v6654_v56 }
 0x709   :  { %v2823_v17 = vpop.xlane.xlu2 %2822 }
 0x70a   :  { %5588 = vrcp.f32 %v2823_v17 }
 0x70c   :  { %3344 = vmatmul.f32.vlgmr.msra.gmra.mxu0 %v6691_v11 }
 0x710   :  { %v5589_v48 = vpop.eup %5588 }
 0x711   :  { %v2826_v37 = vpop.xlane.xlu2 %2825  ;;  %v2843_v38 = vmul.f32 %v5589_v48, %v6610_v33 }
 0x712   :  { %5590 = vrcp.f32 %v2826_v37 }
 0x713   :  { %5351 = vmatmul.msk.f32.gmra.mxu2 %vm1686_vm6, %v2843_v38 }
 0x718   :  { %v5591_v50 = vpop.eup %5590 }
 0x719   :  { %v2844_v49 = vmul.f32 %v5591_v50, %v6617_v58  ;;  %v2829_v13 = vpop.xlane.xlu2 %2828 }
 0x71a   :  { %5592 = vrcp.f32 %v2829_v13  ;;  %v6733_v13 = vand.u32 4294901760, %v3454_v24 }
 0x71b   :  { %5352 = vmatmul.msk.f32.vlgmr.msra.gmra.mxu3 %vm1686_vm6, %v2844_v49  ;;  %3138 = vmatmul.f32.vlgmr.msrb.gmra.mxu2 %v6659_v19 }
 0x71c   :  { %3306 = vmatpush.xpose.msra.mxu3 %v3305_v43  ;;  %3401 = vmatpush.xpose.msrb.mxu2 %v3303_v5 }
 0x71e   :  { %v2817_v33 = vpop.xlane.xlu0 %2816 }
 0x71f   :  { %5594 = vrcp.f32 %v2817_v33 }
 0x720   :  { %v5593_v23 = vpop.eup %5592  ;;  %3312 = vmatpush.xpose.msra.mxu3 %v3311_v10  ;;  %3405 = vmatpush.xpose.msrb.mxu2 %v3309_v59  ;;  %v3445_v59 = vpop.permute.xlu1 %3444 }
 0x721   :  { %v3239_v51 = vpop.permute.xlu2 %3238  ;;  %v2845_v58 = vmul.f32 %v5593_v23, %v6621_v6  ;;  %v3274_v6 = vand.u32 4294901760, %v3273_v55  ;;  %v3452_v49 = vsel %vm867_vm1, %v3445_v59, 0 }
 0x722   :  { %v3246_v61 = vsel %vm867_vm1, %v3239_v51, 0  ;;  %v6736_v30 = vand.u32 4294901760, %v3452_v49 }
 0x723   :  { %v6702_v21 = vand.u32 4294901760, %v3246_v61  ;;  %5353 = vmatmul.msk.f32.gmra.mxu3 %vm1686_vm6, %v2845_v58  ;;  %3143 = vmatmul.f32.gmra.mxu2 %v6662_v63 }
 0x725   :  { %v5595_v45 = vpop.eup %5594  ;;  %v6710_v8 = vsub.f32 %v3246_v61, %v6702_v21  ;;  %v6749_v61 = vsub.f32 %v3452_v49, %v6736_v30 }
 0x726   :  { %v2841_v17 = vmul.f32 %v5595_v45, %v6625_v7 }
 0x727   :  { %3349 = vmatmul.f32.gmra.mxu0 %v6710_v8  ;;  %v3280_v48 = vand.u32 4294901760, %v6710_v8  ;;  %v3486_v55 = vand.u32 4294901760, %v6749_v61 }
 0x728   :  { %5349 = vmatmul.msk.f32.gmra.mxu1 %vm1686_vm6, %v2841_v17 }
 0x729   :  { %v3443_v37 = vpop.permute.xlu2 %3442  ;;  %v3281_v7 = vsub.f32 %v6710_v8, %v3280_v48 }
 0x72a   :  { %v3450_v38 = vsel %vm867_vm1, %v3443_v37, 0 }
 0x72b   :  { %v6717_v5 = vand.u32 4294901760, %v3450_v38  ;;  %3168 = vmatmul.f32.vlgmr.msrb.gmra.mxu3 %v3066_v9  ;;  %3275 = vmatmul.f32.vlgmr.msra.gmra.mxu2 %v3274_v6  ;;  %v3282_v9 = vand.u32 4294901760, %v3281_v7 }
 0x72c   :  { %3430 = vmatpush.xpose.msrb.mxu3 %v6671_v44 }
 0x72d   :  { %v6727_v50 = vsub.f32 %v3450_v38, %v6717_v5 }
 0x72f   :  { %v3478_v33 = vand.u32 4294901760, %v6727_v50 }
 0x730   :  { %3432 = vmatpush.xpose.msrb.mxu3 %v6673_v31  ;;  %3108 = vmatmul.f32.vlgmr.msrb.gmra.mxu1 %v6656_v39 }
 0x731   :  { %3368 = vmatpush.xpose.msrb.mxu1 %v6671_v44  ;;  %v3449_v19 = vpop.permute.xlu0 %3448  ;;  %v3655_v23 = vpop.permute.xlu2 %3654  ;;  %v3514_v44 = vsub.f32 %v3454_v24, %v6733_v13  ;;  %v3479_v41 = vsub.f32 %v6727_v50, %v3478_v33  ;;  %v3487_v24 = vsub.f32 %v6749_v61, %v3486_v55 }
 0x732   :  { %v3456_v43 = vsel %vm867_vm1, %v3449_v19, 0  ;;  %v3662_v58 = vsel %vm867_vm1, %v3655_v23, 0 }
 0x733   :  { %v6739_v10 = vand.u32 4294901760, %v3456_v43  ;;  %3174 = vmatmul.f32.gmra.mxu3 %v3074_v40  ;;  %3283 = vmatmul.f32.gmra.mxu2 %v3282_v9  ;;  %v3653_v40 = vpop.permute.xlu1 %3652  ;;  %v6755_v45 = vand.u32 4294901760, %v3662_v58  ;;  %v3480_v6 = vand.u32 4294901760, %v3479_v41  ;;  %v3488_v23 = vand.u32 4294901760, %v3487_v24 }
 0x734   :  { %v3660_v17 = vsel %vm867_vm1, %v3653_v40, 0 }
 0x735   :  { %v3508_v51 = vsub.f32 %v3456_v43, %v6739_v10  ;;  %3370 = vmatpush.xpose.msrb.mxu1 %v6673_v31  ;;  %3473 = vmatpush.xpose.msrb.mxu0 %v6739_v10  ;;  %v3515_v31 = vand.u32 4294901760, %v3514_v44  ;;  %v3714_v38 = vsub.f32 %v3662_v58, %v6755_v45  ;;  %v3680_v59 = vand.u32 4294901760, %v3660_v17 }
 0x737   :  { %v3509_v63 = vand.u32 4294901760, %v3508_v51  ;;  %3544 = vmatpush.xpose.msra.mxu2 %v3508_v51  ;;  %v3516_v49 = vsub.f32 %v3514_v44, %v3515_v31  ;;  %v3720_v19 = vsub.f32 %v3660_v17, %v3680_v59  ;;  %v3715_v9 = vand.u32 4294901760, %v3714_v38 }
 0x738   :  { %3112 = vmatmul.f32.gmra.mxu1 %v6654_v56 }
 0x739   :  { %3475 = vmatpush.xpose.msrb.mxu0 %v6733_v13  ;;  %v3510_v37 = vsub.f32 %v3508_v51, %v3509_v63  ;;  %v3649_v43 = vpop.permute.xlu0 %3648  ;;  %v3517_v51 = vand.u32 4294901760, %v3516_v49  ;;  %v3721_v58 = vand.u32 4294901760, %v3720_v19 }
 0x73a   :  { %v3656_v41 = vsel %vm867_vm1, %v3649_v43, 0 }
 0x73b   :  { %3314 = vmatmul.f32.vlgmr.msra.gmra.mxu3 %v6688_v28  ;;  %3407 = vmatmul.f32.vlgmr.msrb.gmra.mxu2 %v6688_v28  ;;  %v3511_v7 = vand.u32 4294901760, %v3510_v37  ;;  %v3722_v40 = vsub.f32 %v3720_v19, %v3721_v58 }
 0x73c   :  { %3547 = vmatpush.xpose.msra.mxu2 %v3514_v44  ;;  %3574 = vmatpush.xpose.msra.mxu3 %v6739_v10  ;;  %v3716_v44 = vsub.f32 %v3714_v38, %v3715_v9 }
 0x73d   :  { %3607 = vmatpush.xpose.msra.mxu0 %v3509_v63  ;;  %v3723_v37 = vand.u32 4294901760, %v3722_v40 }
 0x73e   :  { %3481 = vmatmul.f32.vlgmr.msrb.gmra.mxu0 %v3480_v6  ;;  %v3717_v63 = vand.u32 4294901760, %v3716_v44  ;;  %v6816_v44 = vld [vmem:[#allocation3 + $0x28] sm:$0xff] }
 0x740   :  { %3679 = vmatpush.xpose.msrb.mxu2 %v6755_v45  ;;  %3576 = vmatpush.xpose.msra.mxu3 %v6733_v13 }
 0x741   :  { %3611 = vmatpush.xpose.msra.mxu0 %v3515_v31  ;;  %3228 = vmatmul.f32.vlgmr.msra.gmra.mxu1 %v6656_v39  ;;  %v3682_v39 = vand.u32 4294901760, %v3656_v41  ;;  %v3651_v31 = vpop.permute.xlu2 %3650 }
 0x742   :  { %3512 = vmatpush.xpose.msra.mxu1 %v3511_v7  ;;  %v3658_v6 = vsel %vm867_vm1, %v3651_v31, 0 }
 0x743   :  { %3318 = vmatmul.f32.gmra.mxu3 %v6702_v21  ;;  %3411 = vmatmul.f32.gmra.mxu2 %v6702_v21  ;;  %v3683_v17 = vsub.f32 %v3656_v41, %v3682_v39 }
 0x744   :  { %3681 = vmatpush.xpose.msrb.mxu2 %v3680_v59 }
 0x745   :  { %3750 = vmatpush.xpose.msrb.mxu0 %v3714_v38  ;;  %v3684_v38 = vand.u32 4294901760, %v3683_v17 }
 0x746   :  { %3489 = vmatmul.f32.gmra.mxu0 %v3488_v23  ;;  %3518 = vmatpush.xpose.msra.mxu1 %v3517_v51 }
 0x749   :  { %3753 = vmatpush.xpose.msrb.mxu0 %v3720_v19  ;;  %3232 = vmatmul.f32.gmra.mxu1 %v6654_v56  ;;  %v3690_v56 = vand.u32 4294901760, %v3658_v6 }
 0x74b   :  { %3434 = vmatmul.f32.vlgmr.msrb.gmra.mxu3 %v6688_v28  ;;  %3550 = vmatmul.f32.vlgmr.msra.gmra.mxu2 %v6727_v50  ;;  %v3685_v28 = vsub.f32 %v3683_v17, %v3684_v38  ;;  %v3691_v7 = vsub.f32 %v3658_v6, %v3690_v56 }
 0x74c   :  { %3718 = vmatpush.xpose.msrb.mxu3 %v3717_v63  ;;  %3813 = vmatpush.xpose.msra.mxu2 %v3715_v9 }
 0x74d   :  { %v3686_v24 = vand.u32 4294901760, %v3685_v28  ;;  %v3692_v49 = vand.u32 4294901760, %v3691_v7 }
 0x74e   :  { %3613 = vmatmul.f32.vlgmr.msra.gmra.mxu0 %v6717_v5 }
 0x74f   :  { %v3693_v11 = vsub.f32 %v3691_v7, %v3692_v49 }
 0x750   :  { %3724 = vmatpush.xpose.msrb.mxu3 %v3723_v37  ;;  %3817 = vmatpush.xpose.msra.mxu2 %v3721_v58 }
 0x751   :  { %3374 = vmatmul.f32.vlgmr.msrb.gmra.mxu1 %v3272_v20  ;;  %v3694_v20 = vand.u32 4294901760, %v3693_v11 }
 0x752   :  { %3636 = vmatpush.xpose.msrb.mxu1 %v6739_v10 }
 0x753   :  { %3438 = vmatmul.f32.gmra.mxu3 %v6702_v21  ;;  %3555 = vmatmul.f32.gmra.mxu2 %v6749_v61  ;;  %v6797_v21 = vpop.f32.mrf.mxu0 }
 0x756   :  { %3617 = vmatmul.f32.gmra.mxu0 %v6736_v30  ;;  %3638 = vmatpush.xpose.msrb.mxu1 %v6733_v13 }
 0x759   :  { %3380 = vmatmul.f32.gmra.mxu1 %v3280_v48 }
 0x75b   :  { %3580 = vmatmul.f32.vlgmr.msra.gmra.mxu3 %v3478_v33  ;;  %3687 = vmatmul.f32.vlgmr.msrb.gmra.mxu2 %v3686_v24  ;;  %v6801_v48 = vpop.f32.mrf.mxu0  ;;  %v6805_v33 = vpop.f32.mrf.mxu1 }
 0x75c   :  { %3842 = vmatpush.xpose.msra.mxu3 %v6755_v45 }
 0x75e   :  { %3756 = vmatmul.f32.vlgmr.msrb.gmra.mxu0 %v3683_v17 }
 0x760   :  { %3844 = vmatpush.xpose.msra.mxu3 %v3680_v59 }
 0x761   :  { %3520 = vmatmul.f32.vlgmr.msra.gmra.mxu1 %v6717_v5 }
 0x762   :  { %3780 = vmatpush.xpose.msra.mxu1 %v6755_v45 }
 0x763   :  { %3586 = vmatmul.f32.gmra.mxu3 %v3486_v55  ;;  %3695 = vmatmul.f32.gmra.mxu2 %v3694_v20 }
 0x766   :  { %3761 = vmatmul.f32.gmra.mxu0 %v3691_v7  ;;  %3782 = vmatpush.xpose.msra.mxu1 %v3680_v59  ;;  %v6813_v59 = vld [vmem:[#allocation3 + $0x20] sm:$0xff] }
 0x769   :  { %3524 = vmatmul.f32.gmra.mxu1 %v6736_v30  ;;  %v3070_v13 = vpop.f32.mrf.mxu0 }
 0x76a   :  { %v3071_v43 = vadd.f32 %v3070_v13, %v6813_v59 }
 0x76b   :  { %3726 = vmatmul.f32.vlgmr.msrb.gmra.mxu3 %v3682_v39  ;;  %3819 = vmatmul.f32.vlgmr.msra.gmra.mxu2 %v3682_v39 }
 0x771   :  { %3640 = vmatmul.f32.vlgmr.msrb.gmra.mxu1 %v6717_v5  ;;  %v3078_v61 = vpop.f32.mrf.mxu0 }
 0x772   :  { %v3079_v63 = vadd.f32 %v3078_v61, %v6816_v44 }
 0x773   :  { %3730 = vmatmul.f32.gmra.mxu3 %v3690_v56  ;;  %3823 = vmatmul.f32.gmra.mxu2 %v3690_v56 }
 0x779   :  { %3644 = vmatmul.f32.gmra.mxu1 %v6736_v30  ;;  %v3202_v19 = vpop.f32.mrf.mxu0 }
 0x77a   :  { %v6799_v8 = vpop.f32.mrf.mxu2 }
 0x77b   :  { %3846 = vmatmul.f32.vlgmr.msra.gmra.mxu3 %v3682_v39 }
 0x781   :  { %3786 = vmatmul.f32.vlgmr.msra.gmra.mxu1 %v3684_v38  ;;  %v3206_v31 = vpop.f32.mrf.mxu0 }
 0x783   :  { %3850 = vmatmul.f32.gmra.mxu3 %v3690_v56 }
 0x789   :  { %3792 = vmatmul.f32.gmra.mxu1 %v3692_v49  ;;  %v3345_v20 = vpop.f32.mrf.mxu0 }
 0x796   :  { %v6803_v50 = vpop.f32.mrf.mxu2 }
 0x79e   :  { %v6807_v5 = vpop.f32.mrf.mxu3  ;;  %v3139_v10 = vpop.f32.mrf.mxu2 }
 0x7a5   :  { %v6809_v30 = vpop.f32.mrf.mxu1 }
 0x7a6   :  { %v6811_v45 = vpop.f32.mrf.mxu3  ;;  %v3144_v55 = vpop.f32.mrf.mxu2 }
 0x7ad   :  { %v3109_v9 = vpop.f32.mrf.mxu1 }
 0x7ae   :  { %v3169_v23 = vpop.f32.mrf.mxu3  ;;  %v3276_v51 = vpop.f32.mrf.mxu2  ;;  %v3110_v58 = vadd.f32 %v3109_v9, %v3071_v43 }
 0x7b0   :  { %v3140_v41 = vadd.f32 %v3139_v10, %v3110_v58 }
 0x7b2   :  { %v3170_v6 = vadd.f32 %v3169_v23, %v3140_v41  ;;  %v3277_v23 = vadd.f32 %v3276_v51, %v6813_v59 }
 0x7b4   :  { %v3203_v56 = vadd.f32 %v3202_v19, %v3170_v6  ;;  %v3350_v19 = vpop.f32.mrf.mxu0 }
 0x7b5   :  { %v3113_v39 = vpop.f32.mrf.mxu1 }
 0x7b6   :  { %v3175_v40 = vpop.f32.mrf.mxu3  ;;  %v3284_v17 = vpop.f32.mrf.mxu2  ;;  %v3114_v37 = vadd.f32 %v3113_v39, %v3079_v63 }
 0x7b7   :  { %v3285_v6 = vadd.f32 %v3284_v17, %v6816_v44 }
 0x7b8   :  { %v3145_v38 = vadd.f32 %v3144_v55, %v3114_v37 }
 0x7ba   :  { %v3176_v49 = vadd.f32 %v3175_v40, %v3145_v38 }
 0x7bc   :  { %v3207_v10 = vadd.f32 %v3206_v31, %v3176_v49  ;;  %v3482_v31 = vpop.f32.mrf.mxu0 }
 0x7be   :  { %v3229_v28 = vpop.f32.mrf.mxu1  ;;  %v3315_v24 = vpop.f32.mrf.mxu3 }
 0x7bf   :  { %v6819_v7 = vadd.f32 %v3229_v28, %v3203_v56  ;;  %v3408_v13 = vpop.f32.mrf.mxu2  ;;  %v3316_v58 = vadd.f32 %v3315_v24, %v3277_v23 }
 0x7c1   :  { %v3854_v11 = vsel %vm1686_vm6, %v6819_v7, -inf  ;;  %v3346_v39 = vadd.f32 %v3345_v20, %v3316_v58 }
 0x7c2   :  { %3855 = vmax.xlane.f32.xlu0 %v3854_v11 }
 0x7c4   :  { %v3490_v23 = vpop.f32.mrf.mxu0 }
 0x7c6   :  { %v3233_v61 = vpop.f32.mrf.mxu1  ;;  %v3319_v43 = vpop.f32.mrf.mxu3 }
 0x7c7   :  { %v6823_v9 = vadd.f32 %v3233_v61, %v3207_v10  ;;  %v3412_v41 = vpop.f32.mrf.mxu2  ;;  %v3320_v38 = vadd.f32 %v3319_v43, %v3285_v6 }
 0x7c9   :  { %v3857_v55 = vsel %vm1686_vm6, %v6823_v9, -inf  ;;  %v3351_v51 = vadd.f32 %v3350_v19, %v3320_v38  ;;  %v3483_v19 = vadd.f32 %v3482_v31, %v6813_v59 }
 0x7ca   :  { %3858 = vmax.xlane.f32.xlu0 %v3857_v55 }
 0x7ce   :  { %v3375_v63 = vpop.f32.mrf.mxu1  ;;  %v3435_v40 = vpop.f32.mrf.mxu3 }
 0x7cf   :  { %v3376_v37 = vadd.f32 %v3375_v63, %v3346_v39  ;;  %v3551_v49 = vpop.f32.mrf.mxu2  ;;  %v3614_v63 = vpop.f32.mrf.mxu0 }
 0x7d1   :  { %v3409_v56 = vadd.f32 %v3408_v13, %v3376_v37  ;;  %v3491_v37 = vadd.f32 %v3490_v23, %v6816_v44 }
 0x7d3   :  { %v6829_v28 = vadd.f32 %v3435_v40, %v3409_v56 }
 0x7d5   :  { %v3860_v11 = vsel %vm1686_vm6, %v6829_v28, -inf }
 0x7d6   :  { %v3381_v10 = vpop.f32.mrf.mxu1  ;;  %3861 = vmax.xlane.f32.xlu1 %v3860_v11  ;;  %v3439_v24 = vpop.f32.mrf.mxu3 }
 0x7d7   :  { %v3382_v61 = vadd.f32 %v3381_v10, %v3351_v51  ;;  %v3556_v58 = vpop.f32.mrf.mxu2  ;;  %v3618_v31 = vpop.f32.mrf.mxu0 }
 0x7d9   :  { %v3413_v20 = vadd.f32 %v3412_v41, %v3382_v61 }
 0x7db   :  { %v6833_v55 = vadd.f32 %v3439_v24, %v3413_v20 }
 0x7dd   :  { %v3863_v17 = vsel %vm1686_vm6, %v6833_v55, -inf }
 0x7de   :  { %5453 = vrot.lane.b32.xlu0 %v6342_v4, %s5701_s12  ;;  %v3521_v13 = vpop.f32.mrf.mxu1  ;;  %3864 = vmax.xlane.f32.xlu2 %v3863_v17  ;;  %v3581_v43 = vpop.f32.mrf.mxu3 }
 0x7df   :  { %v3522_v39 = vadd.f32 %v3521_v13, %v3483_v19  ;;  %v3688_v51 = vpop.f32.mrf.mxu2 }
 0x7e0   :  { %v3689_v23 = vadd.f32 %v3688_v51, %v6813_v59 }
 0x7e1   :  { %v3552_v40 = vadd.f32 %v3551_v49, %v3522_v39 }
 0x7e3   :  { %v3582_v38 = vadd.f32 %v3581_v43, %v3552_v40 }
 0x7e5   :  { %v3615_v11 = vadd.f32 %v3614_v63, %v3582_v38  ;;  %v3757_v63 = vpop.f32.mrf.mxu0 }
 0x7e6   :  { %5458 = vrot.lane.b32.xlu0 %v6302_v27, %s5701_s12  ;;  %v3525_v41 = vpop.f32.mrf.mxu1  ;;  %v3587_v6 = vpop.f32.mrf.mxu3 }
 0x7e7   :  { %v3526_v56 = vadd.f32 %v3525_v41, %v3491_v37  ;;  %v3696_v27 = vpop.f32.mrf.mxu2 }
 0x7e8   :  { %v3697_v37 = vadd.f32 %v3696_v27, %v6816_v44 }
 0x7e9   :  { %v3557_v4 = vadd.f32 %v3556_v58, %v3526_v56 }
 0x7eb   :  { %v3588_v20 = vadd.f32 %v3587_v6, %v3557_v4 }
 0x7ed   :  { %v3619_v17 = vadd.f32 %v3618_v31, %v3588_v20  ;;  %v3762_v59 = vpop.f32.mrf.mxu0 }
 0x7ee   :  { %v3641_v10 = vpop.f32.mrf.mxu1  ;;  %v3727_v24 = vpop.f32.mrf.mxu3 }
 0x7ef   :  { %v6843_v61 = vadd.f32 %v3641_v10, %v3615_v11  ;;  %v3728_v58 = vadd.f32 %v3727_v24, %v3689_v23  ;;  %v3820_v41 = vpop.f32.mrf.mxu2 }
 0x7f1   :  { %v3866_v49 = vsel %vm1686_vm6, %v6843_v61, -inf  ;;  %v3758_v40 = vadd.f32 %v3757_v63, %v3728_v58 }
 0x7f2   :  { %3867 = vmax.xlane.f32.xlu1 %v3866_v49 }
 0x7f6   :  { %v3645_v13 = vpop.f32.mrf.mxu1  ;;  %v3731_v19 = vpop.f32.mrf.mxu3 }
 0x7f7   :  { %v6848_v43 = vadd.f32 %v3645_v13, %v3619_v17  ;;  %v3732_v4 = vadd.f32 %v3731_v19, %v3697_v37  ;;  %v3824_v49 = vpop.f32.mrf.mxu2 }
 0x7f9   :  { %v3869_v39 = vsel %vm1686_vm6, %v6848_v43, -inf  ;;  %v3763_v51 = vadd.f32 %v3762_v59, %v3732_v4 }
 0x7fa   :  { %3870 = vmax.xlane.f32.xlu2 %v3869_v39 }
 0x7fe   :  { %v3787_v6 = vpop.f32.mrf.mxu1  ;;  %v3847_v56 = vpop.f32.mrf.mxu3 }
 0x7ff   :  { %v3788_v38 = vadd.f32 %v3787_v6, %v3758_v40 }
 0x801   :  { %v3821_v11 = vadd.f32 %v3820_v41, %v3788_v38 }
 0x803   :  { %v6853_v10 = vadd.f32 %v3847_v56, %v3821_v11 }
 0x805   :  { %v3872_v24 = vsel %vm1686_vm6, %v6853_v10, -inf }
 0x806   :  { %v3793_v31 = vpop.f32.mrf.mxu1  ;;  %3873 = vmax.xlane.f32.xlu2 %v3872_v24  ;;  %v3851_v13 = vpop.f32.mrf.mxu3 }
 0x807   :  { %v3794_v20 = vadd.f32 %v3793_v31, %v3763_v51 }
 0x809   :  { %v3825_v17 = vadd.f32 %v3824_v49, %v3794_v20 }
 0x80b   :  { %v6857_v23 = vadd.f32 %v3851_v13, %v3825_v17 }
 0x80d   :  { %v3875_v44 = vsel %vm1686_vm6, %v6857_v23, -inf }
 0x80e   :  { %3876 = vmax.xlane.f32.xlu1 %v3875_v44 }
 0x81e   :  { %5463 = vrot.lane.b32.xlu2 %v6290_v34, %s5701_s12 }
 0x835   :  { %v3856_v27 = vpop.xlane.xlu0 %3855 }
 0x836   :  { %v3878_v19 = vsub.f32 %v6819_v7, %v3856_v27 }
 0x838   :  { %v3886_v58 = vmul.f32 1.442695, %v3878_v19 }
 0x83a   :  { %5596 = vpow2.f32 %v3886_v58 }
 0x83d   :  { %v3859_v39 = vpop.xlane.xlu0 %3858 }
 0x83e   :  { %v3879_v63 = vsub.f32 %v6823_v9, %v3859_v39 }
 0x840   :  { %v6865_v40 = vpop.eup %5596  ;;  %v3888_v41 = vmul.f32 1.442695, %v3879_v63 }
 0x841   :  { %v3902_v6 = vsel %vm1686_vm6, %v6865_v40, 0.0 }
 0x842   :  { %5598 = vpow2.f32 %v3888_v41  ;;  %3903 = vadd.xlane.f32.xlu1 %v3902_v6 }
 0x848   :  { %v6869_v37 = vpop.eup %5598 }
 0x849   :  { %v3905_v34 = vsel %vm1686_vm6, %v6869_v37, 0.0  ;;  %v3862_v38 = vpop.xlane.xlu1 %3861 }
 0x84a   :  { %3906 = vadd.xlane.f32.xlu2 %v3905_v34  ;;  %v3880_v7 = vsub.f32 %v6829_v28, %v3862_v38 }
 0x84c   :  { %v3890_v56 = vmul.f32 1.442695, %v3880_v7 }
 0x84e   :  { %5600 = vpow2.f32 %v3890_v56 }
 0x850   :  { %v6874_v9 = vpop.permute.xlu0 %5453 }
 0x851   :  { %v5456_v4 = vunpack.i.h.bf16 %v6874_v9  ;;  %v3865_v28 = vpop.xlane.xlu2 %3864 }
 0x852   :  { %v3881_v20 = vsub.f32 %v6833_v55, %v3865_v28 }
 0x853   :  { %4073 = vmatpush.msrb.mxu3 %v5456_v4 }
 0x854   :  { %v6877_v11 = vpop.eup %5600 }
 0x855   :  { %v3908_v59 = vsel %vm1686_vm6, %v6877_v11, 0.0 }
 0x856   :  { %3909 = vadd.xlane.f32.xlu0 %v3908_v59 }
 0x858   :  { %v6881_v51 = vpop.permute.xlu0 %5458 }
 0x859   :  { %v5461_v24 = vunpack.i.h.bf16 %v6881_v51 }
 0x85b   :  { %5448 = vrot.lane.b32.xlu1 %v6160_v53, %s5701_s12  ;;  %4003 = vmatpush.msrb.mxu1 %v5461_v24  ;;  %v3892_v53 = vmul.f32 1.442695, %v3881_v20  ;;  %v5460_v24 = vunpack.i.l.bf16 %v6881_v51 }
 0x85d   :  { %5602 = vpow2.f32 %v3892_v53 }
 0x862   :  { %4128 = vrot.lane.b32.xlu2 %v6088_v3, %s5702_s13 }
 0x863   :  { %v6898_v17 = vpop.eup %5602 }
 0x865   :  { %v3868_v55 = vpop.xlane.xlu1 %3867 }
 0x86a   :  { %4336 = vrot.lane.b32.xlu2 %v6040_v22, %s5703_s14  ;;  %4132 = vrot.lane.b32.xlu0 %v6035_v12, %s5703_s14 }
 0x86d   :  { %v3871_v31 = vpop.xlane.xlu2 %3870 }
 0x86e   :  { %v3883_v3 = vsub.f32 %v6848_v43, %v3871_v31 }
 0x870   :  { %v3896_v12 = vmul.f32 1.442695, %v3883_v3 }
 0x872   :  { %4130 = vrot.lane.b32.xlu0 %v6046_v15, %s5703_s14  ;;  %v3911_v15 = vsel %vm1686_vm6, %v6898_v17, 0.0  ;;  %5604 = vpow2.f32 %v3896_v12 }
 0x878   :  { %v6905_v19 = vpop.eup %5604 }
 0x879   :  { %v3874_v49 = vpop.xlane.xlu2 %3873 }
 0x87a   :  { %4126 = vrot.lane.b32.xlu0 %v6071_v0, %s5702_s13  ;;  %v3884_v0 = vsub.f32 %v6853_v10, %v3874_v49  ;;  %v3882_v10 = vsub.f32 %v6843_v61, %v3868_v55 }
 0x87c   :  { %v3898_v43 = vmul.f32 1.442695, %v3884_v0  ;;  %v3894_v34 = vmul.f32 1.442695, %v3882_v10 }
 0x87e   :  { %5606 = vpow2.f32 %v3898_v43 }
 0x881   :  { %v5464_v22 = vpop.permute.xlu2 %5463  ;;  %v3877_v27 = vpop.xlane.xlu1 %3876 }
 0x882   :  { %v5466_v13 = vunpack.i.h.bf16 %v5464_v22  ;;  %v5465_v44 = vunpack.i.l.bf16 %v5464_v22  ;;  %4338 = vrot.lane.b32.xlu0 %v6057_v35, %s5703_s14  ;;  %v3885_v58 = vsub.f32 %v6857_v23, %v3877_v27  ;;  %v3917_v35 = vsel %vm1686_vm6, %v6905_v19, 0.0 }
 0x884   :  { %4004 = vmatpush.msrb.mxu1 %v5466_v13  ;;  %4074 = vmatpush.msrb.mxu3 %v5465_v44  ;;  %v3900_v39 = vmul.f32 1.442695, %v3885_v58  ;;  %v6910_v63 = vpop.eup %5606 }
 0x885   :  { %3912 = vadd.xlane.f32.xlu1 %v3911_v15  ;;  %v3920_v41 = vsel %vm1686_vm6, %v6910_v63, 0.0 }
 0x886   :  { %5608 = vpow2.f32 %v3900_v39 }
 0x887   :  { %5610 = vpow2.f32 %v3894_v34 }
 0x88c   :  { %v6915_v6 = vpop.eup %5608 }
 0x88d   :  { %v3923_v23 = vsel %vm1686_vm6, %v6915_v6, 0.0  ;;  %v6923_v38 = vpop.eup %5610 }
 0x88e   :  { %v3914_v61 = vsel %vm1686_vm6, %v6923_v38, 0.0 }
 0x893   :  { %3918 = vadd.xlane.f32.xlu2 %v3917_v35 }
 0x89b   :  { %3921 = vadd.xlane.f32.xlu2 %v3920_v41 }
 0x89e   :  { %4544 = vrot.lane.b32.xlu1 %v6052_v29, %s5703_s14 }
 0x8a3   :  { %3924 = vadd.xlane.f32.xlu2 %v3923_v23 }
 0x8a6   :  { %4746 = vrot.lane.b32.xlu1 %v6202_v32, %s5702_s13 }
 0x8ac   :  { %3915 = vadd.xlane.f32.xlu0 %v3914_v61 }
 0x8b5   :  { %v3904_v29 = vpop.xlane.xlu1 %3903 }
 0x8b6   :  { %5612 = vrcp.f32 %v3904_v29 }
 0x8bb   :  { %4334 = vrot.lane.b32.xlu2 %v6129_v14, %s5702_s13 }
 0x8bc   :  { %v5613_v4 = vpop.eup %5612 }
 0x8bd   :  { %v3907_v7 = vpop.xlane.xlu2 %3906 }
 0x8c0   :  { %4332 = vrot.lane.b32.xlu0 %v6115_v62, %s5702_s13  ;;  %v5455_v62 = vunpack.i.l.bf16 %v6874_v9 }
 0x8c3   :  { %4538 = vrot.lane.b32.xlu2 %v6173_v42, %s5702_s13 }
 0x8c8   :  { %4542 = vrot.lane.b32.xlu0 %v6093_v16, %s5703_s14  ;;  %v3934_v16 = vmul.f32 %v5613_v4, %v6865_v40 }
 0x8c9   :  { %v3910_v32 = vpop.xlane.xlu0 %3909 }
 0x8ca   :  { %5614 = vrcp.f32 %v3910_v32 }
 0x8cb   :  { %4750 = vrot.lane.b32.xlu2 %v6105_v46, %s5703_s14  ;;  %5616 = vrcp.f32 %v3907_v7 }
 0x8cd   :  { %v5449_v56 = vpop.permute.xlu1 %5448 }
 0x8ce   :  { %v5451_v14 = vunpack.i.h.bf16 %v5449_v56  ;;  %v5450_v59 = vunpack.i.l.bf16 %v5449_v56 }
 0x8d0   :  { %3968 = vmatpush.msra.mxu0 %v5451_v14  ;;  %4038 = vmatpush.msrb.mxu2 %v5450_v59  ;;  %v5615_v42 = vpop.eup %5614 }
 0x8d1   :  { %4540 = vrot.lane.b32.xlu0 %v6181_v52, %s5702_s13  ;;  %v3936_v46 = vmul.f32 %v5615_v42, %v6877_v11  ;;  %v5617_v9 = vpop.eup %5616 }
 0x8d2   :  { %3969 = vmatpush.msra.mxu0 %v5460_v24  ;;  %4039 = vmatpush.msrb.mxu2 %v5455_v62  ;;  %v3935_v40 = vmul.f32 %v5617_v9, %v6869_v37 }
 0x8d3   :  { %4744 = vrot.lane.b32.xlu2 %v6190_v2, %s5702_s13  ;;  %5354 = vmatmul.msk.f32.vlgmr.msra.gmra.mxu0 %vm1686_vm6, %v3934_v16 }
 0x8d4   :  { %5356 = vmatmul.msk.f32.vlgmr.msrb.gmra.mxu1 %vm1686_vm6, %v3936_v46 }
 0x8d9   :  { %4748 = vrot.lane.b32.xlu0 %v6151_v25, %s5703_s14  ;;  %v4129_v25 = vpop.permute.xlu2 %4128 }
 0x8da   :  { %v4136_v13 = vsel %vm867_vm1, %v4129_v25, 0 }
 0x8db   :  { %5355 = vmatmul.msk.f32.gmra.mxu0 %vm1686_vm6, %v3935_v40  ;;  %v6955_v55 = vand.u32 4294901760, %v4136_v13 }
 0x8dc   :  { %v4133_v52 = vpop.permute.xlu0 %4132 }
 0x8dd   :  { %v4140_v11 = vsel %vm867_vm1, %v4133_v52, 0  ;;  %v6960_v58 = vsub.f32 %v4136_v13, %v6955_v55 }
 0x8de   :  { %v4156_v51 = vand.u32 4294901760, %v4140_v11 }
 0x8df   :  { %v4170_v61 = vand.u32 4294901760, %v6960_v58 }
 0x8e0   :  { %v4192_v28 = vsub.f32 %v4140_v11, %v4156_v51  ;;  %4157 = vmatpush.xpose.msrb.mxu0 %v4156_v51  ;;  %4258 = vmatpush.xpose.msra.mxu3 %v4156_v51 }
 0x8e1   :  { %v4337_v35 = vpop.permute.xlu2 %4336  ;;  %v4171_v14 = vsub.f32 %v6960_v58, %v4170_v61 }
 0x8e2   :  { %v4193_v2 = vand.u32 4294901760, %v4192_v28  ;;  %4228 = vmatpush.xpose.msra.mxu2 %v4192_v28  ;;  %v4344_v34 = vsel %vm867_vm1, %v4337_v35, 0 }
 0x8e3   :  { %v4364_v7 = vand.u32 4294901760, %v4344_v34  ;;  %v4172_v62 = vand.u32 4294901760, %v4171_v14 }
 0x8e4   :  { %v4194_v31 = vsub.f32 %v4192_v28, %v4193_v2  ;;  %v4131_v20 = vpop.permute.xlu0 %4130 }
 0x8e5   :  { %v4138_v53 = vsel %vm867_vm1, %v4131_v20, 0  ;;  %v6975_v59 = vsub.f32 %v4344_v34, %v4364_v7 }
 0x8e6   :  { %v4195_v49 = vand.u32 4294901760, %v4194_v31  ;;  %v4158_v3 = vand.u32 4294901760, %v4138_v53 }
 0x8e7   :  { %v4405_v11 = vand.u32 4294901760, %v6975_v59 }
 0x8e8   :  { %v4198_v22 = vsub.f32 %v4138_v53, %v4158_v3  ;;  %4159 = vmatpush.xpose.msrb.mxu0 %v4158_v3  ;;  %4196 = vmatpush.xpose.msra.mxu1 %v4195_v49 }
 0x8e9   :  { %4260 = vmatpush.xpose.msra.mxu3 %v4158_v3 }
 0x8ea   :  { %4231 = vmatpush.xpose.msra.mxu2 %v4198_v22  ;;  %v4199_v37 = vand.u32 4294901760, %v4198_v22 }
 0x8ec   :  { %4291 = vmatpush.xpose.msra.mxu0 %v4193_v2  ;;  %v4127_v44 = vpop.permute.xlu0 %4126  ;;  %v4200_v12 = vsub.f32 %v4198_v22, %v4199_v37 }
 0x8ed   :  { %v4134_v15 = vsel %vm867_vm1, %v4127_v44, 0 }
 0x8ee   :  { %v4160_v0 = vand.u32 4294901760, %v4134_v15  ;;  %v4201_v43 = vand.u32 4294901760, %v4200_v12 }
 0x8f0   :  { %4295 = vmatpush.xpose.msra.mxu0 %v4199_v37  ;;  %v6957_v27 = vsub.f32 %v4134_v15, %v4160_v0  ;;  %4202 = vmatpush.xpose.msra.mxu1 %v4201_v43 }
 0x8f2   :  { %v4162_v39 = vand.u32 4294901760, %v6957_v27 }
 0x8f4   :  { %4320 = vmatpush.xpose.msrb.mxu1 %v4156_v51  ;;  %v4163_v41 = vsub.f32 %v6957_v27, %v4162_v39  ;;  %v4339_v10 = vpop.permute.xlu0 %4338 }
 0x8f5   :  { %v4346_v23 = vsel %vm867_vm1, %v4339_v10, 0 }
 0x8f6   :  { %v4164_v29 = vand.u32 4294901760, %v4163_v41  ;;  %v4362_v32 = vand.u32 4294901760, %v4346_v23 }
 0x8f8   :  { %4322 = vmatpush.xpose.msrb.mxu1 %v4158_v3  ;;  %v6969_v56 = vsub.f32 %v4346_v23, %v4362_v32  ;;  %v3913_v4 = vpop.xlane.xlu1 %3912  ;;  %4165 = vmatmul.f32.vlgmr.msrb.gmra.mxu0 %v4164_v29  ;;  %v4406_v3 = vsub.f32 %v6975_v59, %v4405_v11 }
 0x8f9   :  { %5618 = vrcp.f32 %v3913_v4 }
 0x8fa   :  { %4434 = vmatpush.xpose.msrb.mxu0 %v6969_v56  ;;  %v4399_v9 = vand.u32 4294901760, %v6969_v56  ;;  %v4407_v37 = vand.u32 4294901760, %v4406_v3 }
 0x8fe   :  { %4437 = vmatpush.xpose.msrb.mxu0 %v6975_v59 }
 0x8ff   :  { %v5619_v24 = vpop.eup %5618 }
 0x900   :  { %4173 = vmatmul.f32.gmra.mxu0 %v4172_v62  ;;  %v3937_v42 = vmul.f32 %v5619_v24, %v6898_v17  ;;  %v4400_v17 = vsub.f32 %v6969_v56, %v4399_v9 }
 0x902   :  { %5357 = vmatmul.msk.f32.gmra.mxu1 %vm1686_vm6, %v3937_v42  ;;  %v4401_v53 = vand.u32 4294901760, %v4400_v17 }
 0x906   :  { %v3919_v16 = vpop.xlane.xlu2 %3918 }
 0x908   :  { %4297 = vmatmul.f32.vlgmr.msra.gmra.mxu0 %v4160_v0 }
 0x90a   :  { %4204 = vmatmul.f32.vlgmr.msra.gmra.mxu1 %v4160_v0 }
 0x90b   :  { %4464 = vmatpush.xpose.msra.mxu1 %v4362_v32 }
 0x90e   :  { %v3922_v46 = vpop.xlane.xlu2 %3921 }
 0x90f   :  { %5620 = vrcp.f32 %v3922_v46  ;;  %4466 = vmatpush.xpose.msra.mxu1 %v4364_v7 }
 0x910   :  { %v4545_v40 = vpop.permute.xlu1 %4544  ;;  %4301 = vmatmul.f32.gmra.mxu0 %v6955_v55 }
 0x911   :  { %v4552_v52 = vsel %vm867_vm1, %v4545_v40, 0 }
 0x912   :  { %v6987_v51 = vand.u32 4294901760, %v4552_v52  ;;  %4208 = vmatmul.f32.gmra.mxu1 %v6955_v55 }
 0x914   :  { %v6991_v2 = vsub.f32 %v4552_v52, %v6987_v51  ;;  %4569 = vmatpush.xpose.msra.mxu0 %v6987_v51 }
 0x915   :  { %v5621_v28 = vpop.eup %5620 }
 0x916   :  { %v3940_v31 = vmul.f32 %v5621_v28, %v6910_v63  ;;  %v3925_v20 = vpop.xlane.xlu2 %3924  ;;  %v4605_v49 = vand.u32 4294901760, %v6991_v2 }
 0x917   :  { %5622 = vrcp.f32 %v3925_v20 }
 0x918   :  { %5360 = vmatmul.msk.f32.vlgmr.msrb.gmra.mxu3 %vm1686_vm6, %v3940_v31  ;;  %v4606_v25 = vsub.f32 %v6991_v2, %v4605_v49 }
 0x919   :  { %4402 = vmatpush.xpose.msrb.mxu3 %v4401_v53 }
 0x91a   :  { %v4607_v22 = vand.u32 4294901760, %v4606_v25  ;;  %4324 = vmatmul.f32.vlgmr.msrb.gmra.mxu1 %v4160_v0 }
 0x91c   :  { %4608 = vmatpush.xpose.msrb.mxu1 %v4607_v22 }
 0x91d   :  { %v5623_v13 = vpop.eup %5622  ;;  %4408 = vmatpush.xpose.msrb.mxu3 %v4407_v37 }
 0x91e   :  { %v4335_v63 = vpop.permute.xlu2 %4334  ;;  %v3941_v44 = vmul.f32 %v5623_v13, %v6915_v6 }
 0x91f   :  { %v3916_v12 = vpop.xlane.xlu0 %3915  ;;  %v4342_v23 = vsel %vm867_vm1, %v4335_v63, 0 }
 0x920   :  { %5361 = vmatmul.msk.f32.gmra.mxu3 %vm1686_vm6, %v3941_v44  ;;  %5624 = vrcp.f32 %v3916_v12 }
 0x921   :  { %5626 = vrcp.f32 %v3919_v16 }
 0x922   :  { %4328 = vmatmul.f32.gmra.mxu1 %v6955_v55 }
 0x926   :  { %v5625_v15 = vpop.eup %5624  ;;  %v4539_v35 = vpop.permute.xlu2 %4538 }
 0x927   :  { %v3938_v43 = vmul.f32 %v5625_v15, %v6923_v38  ;;  %v5627_v0 = vpop.eup %5626  ;;  %v4546_v41 = vsel %vm867_vm1, %v4539_v35, 0 }
 0x928   :  { %4264 = vmatmul.f32.vlgmr.msra.gmra.mxu3 %v4162_v39  ;;  %v3939_v6 = vmul.f32 %v5627_v0, %v6905_v19  ;;  %v7018_v29 = vand.u32 4294901760, %v4546_v41  ;;  %v7024_v19 = vand.u32 4294901760, %v4342_v23 }
 0x929   :  { %4526 = vmatpush.xpose.msra.mxu3 %v4362_v32  ;;  %5358 = vmatmul.msk.f32.vlgmr.msrb.gmra.mxu2 %vm1686_vm6, %v3938_v43 }
 0x92a   :  { %4363 = vmatpush.xpose.msrb.mxu2 %v4362_v32  ;;  %v7029_v4 = vsub.f32 %v4546_v41, %v7018_v29  ;;  %v4375_v42 = vsub.f32 %v4342_v23, %v7024_v19  ;;  %v4747_v41 = vpop.permute.xlu1 %4746 }
 0x92c   :  { %v4574_v46 = vand.u32 4294901760, %v7029_v4  ;;  %v4376_v56 = vand.u32 4294901760, %v4375_v42 }
 0x92d   :  { %4528 = vmatpush.xpose.msra.mxu3 %v4364_v7 }
 0x92e   :  { %4365 = vmatpush.xpose.msrb.mxu2 %v4364_v7  ;;  %v4751_v55 = vpop.permute.xlu2 %4750  ;;  %v4575_v52 = vsub.f32 %v7029_v4, %v4574_v46  ;;  %v4377_v44 = vsub.f32 %v4375_v42, %v4376_v56 }
 0x92f   :  { %v4758_v10 = vsel %vm867_vm1, %v4751_v55, 0 }
 0x930   :  { %4270 = vmatmul.f32.gmra.mxu3 %v4170_v61  ;;  %v7021_v32 = vand.u32 4294901760, %v4758_v10  ;;  %v4378_v35 = vand.u32 4294901760, %v4377_v44 }
 0x931   :  { %5359 = vmatmul.msk.f32.gmra.mxu2 %vm1686_vm6, %v3939_v6 }
 0x932   :  { %v4333_v38 = vpop.permute.xlu0 %4332  ;;  %v7034_v62 = vsub.f32 %v4758_v10, %v7021_v32  ;;  %v4754_v10 = vsel %vm867_vm1, %v4747_v41, 0 }
 0x933   :  { %v4340_v39 = vsel %vm867_vm1, %v4333_v38, 0  ;;  %v4786_v23 = vand.u32 4294901760, %v4754_v10 }
 0x934   :  { %v7015_v34 = vand.u32 4294901760, %v4340_v39 }
 0x936   :  { %v4367_v61 = vsub.f32 %v4340_v39, %v7015_v34  ;;  %v4745_v6 = vpop.permute.xlu2 %4744 }
 0x937   :  { %v4752_v55 = vsel %vm867_vm1, %v4745_v6, 0 }
 0x938   :  { %4410 = vmatmul.f32.vlgmr.msrb.gmra.mxu3 %v7015_v34  ;;  %v4368_v7 = vand.u32 4294901760, %v4367_v61  ;;  %4440 = vmatmul.f32.vlgmr.msrb.gmra.mxu0 %v4367_v61  ;;  %v4778_v38 = vand.u32 4294901760, %v4752_v55 }
 0x939   :  { %4670 = vmatpush.xpose.msrb.mxu3 %v6987_v51  ;;  %4234 = vmatmul.f32.vlgmr.msra.gmra.mxu2 %v6957_v27  ;;  %v4811_v27 = vand.u32 4294901760, %v7034_v62 }
 0x93a   :  { %4497 = vmatpush.xpose.msra.mxu2 %v4399_v9  ;;  %v4543_v14 = vpop.permute.xlu0 %4542  ;;  %4470 = vmatmul.f32.vlgmr.msra.gmra.mxu1 %v4368_v7  ;;  %v4369_v31 = vsub.f32 %v4367_v61, %v4368_v7  ;;  %v4779_v39 = vsub.f32 %v4752_v55, %v4778_v38 }
 0x93b   :  { %v4550_v24 = vsel %vm867_vm1, %v4543_v14, 0  ;;  %v4812_v59 = vsub.f32 %v7034_v62, %v4811_v27 }
 0x93c   :  { %v4570_v16 = vand.u32 4294901760, %v4550_v24  ;;  %v4370_v25 = vand.u32 4294901760, %v4369_v31  ;;  %v7089_v31 = vld [vmem:[#allocation3 + $0x30] sm:$0xff] }
 0x93e   :  { %v4610_v40 = vsub.f32 %v4550_v24, %v4570_v16  ;;  %4501 = vmatpush.xpose.msra.mxu2 %v4405_v11  ;;  %4571 = vmatpush.xpose.msra.mxu0 %v4570_v16 }
 0x93f   :  { %4672 = vmatpush.xpose.msrb.mxu3 %v4570_v16 }
 0x940   :  { %4414 = vmatmul.f32.gmra.mxu3 %v7024_v19  ;;  %4445 = vmatmul.f32.gmra.mxu0 %v4375_v42  ;;  %v4611_v9 = vand.u32 4294901760, %v4610_v40 }
 0x941   :  { %4239 = vmatmul.f32.gmra.mxu2 %v6960_v58  ;;  %v4813_v58 = vand.u32 4294901760, %v4812_v59 }
 0x942   :  { %4703 = vmatpush.xpose.msrb.mxu0 %v4605_v49  ;;  %4476 = vmatmul.f32.gmra.mxu1 %v4376_v56  ;;  %v4612_v28 = vsub.f32 %v4610_v40, %v4611_v9  ;;  %v4576_v49 = vand.u32 4294901760, %v4575_v52 }
 0x943   :  { %v4541_v17 = vpop.permute.xlu0 %4540 }
 0x944   :  { %v4548_v11 = vsel %vm867_vm1, %v4541_v17, 0  ;;  %v4613_v53 = vand.u32 4294901760, %v4612_v28 }
 0x945   :  { %v4580_v20 = vand.u32 4294901760, %v4548_v11 }
 0x946   :  { %4707 = vmatpush.xpose.msrb.mxu0 %v4611_v9  ;;  %4614 = vmatpush.xpose.msrb.mxu1 %v4613_v53 }
 0x947   :  { %v7049_v3 = vsub.f32 %v4548_v11, %v4580_v20 }
 0x948   :  { %4530 = vmatmul.f32.vlgmr.msra.gmra.mxu3 %v7015_v34  ;;  %4577 = vmatmul.f32.vlgmr.msra.gmra.mxu0 %v4576_v49 }
 0x949   :  { %v4582_v22 = vand.u32 4294901760, %v7049_v3  ;;  %4814 = vmatpush.xpose.msra.mxu3 %v4813_v58  ;;  %4371 = vmatmul.f32.vlgmr.msrb.gmra.mxu2 %v4370_v25 }
 0x94a   :  { %4732 = vmatpush.xpose.msra.mxu1 %v6987_v51  ;;  %4846 = vmatpush.xpose.msra.mxu0 %v7034_v62 }
 0x94b   :  { %v4749_v37 = vpop.permute.xlu0 %4748  ;;  %4616 = vmatmul.f32.vlgmr.msrb.gmra.mxu1 %v7018_v29  ;;  %v4583_v13 = vsub.f32 %v7049_v3, %v4582_v22  ;;  %4640 = vmatpush.xpose.msrb.mxu2 %v6991_v2 }
 0x94c   :  { %v4756_v63 = vsel %vm867_vm1, %v4749_v37, 0  ;;  %vm3018_vm1 = vcmask 130112  }
 0x94d   :  { %v4776_v51 = vand.u32 4294901760, %v4756_v63  ;;  %v4584_v15 = vand.u32 4294901760, %v4583_v13 }
 0x94e   :  { %4734 = vmatpush.xpose.msra.mxu1 %v4570_v16 }
 0x94f   :  { %v4816_v12 = vsub.f32 %v4756_v63, %v4776_v51  ;;  %4643 = vmatpush.xpose.msrb.mxu2 %v4610_v40 }
 0x950   :  { %4534 = vmatmul.f32.gmra.mxu3 %v7024_v19  ;;  %4585 = vmatmul.f32.gmra.mxu0 %v4584_v15 }
 0x951   :  { %v4817_v43 = vand.u32 4294901760, %v4816_v12  ;;  %4849 = vmatpush.xpose.msra.mxu0 %v4816_v12  ;;  %4379 = vmatmul.f32.gmra.mxu2 %v4378_v35  ;;  %v7075_v62 = vpop.f32.mrf.mxu1 }
 0x952   :  { %4876 = vmatpush.xpose.msrb.mxu1 %v7021_v32 }
 0x953   :  { %4620 = vmatmul.f32.gmra.mxu1 %v4580_v20  ;;  %v4818_v2 = vsub.f32 %v4816_v12, %v4817_v43 }
 0x955   :  { %v4819_v0 = vand.u32 4294901760, %v4818_v2 }
 0x956   :  { %4878 = vmatpush.xpose.msrb.mxu1 %v4776_v51 }
 0x957   :  { %4820 = vmatpush.xpose.msra.mxu3 %v4819_v0 }
 0x958   :  { %4676 = vmatmul.f32.vlgmr.msrb.gmra.mxu3 %v4574_v46  ;;  %4709 = vmatmul.f32.vlgmr.msrb.gmra.mxu0 %v7018_v29 }
 0x959   :  { %4503 = vmatmul.f32.vlgmr.msra.gmra.mxu2 %v7015_v34  ;;  %v4780_v34 = vand.u32 4294901760, %v4779_v39 }
 0x95a   :  { %4775 = vmatpush.xpose.msra.mxu2 %v7021_v32 }
 0x95b   :  { %4938 = vmatpush.xpose.msrb.mxu3 %v7021_v32  ;;  %4736 = vmatmul.f32.vlgmr.msra.gmra.mxu1 %v7018_v29  ;;  %v4787_v29 = vsub.f32 %v4754_v10, %v4786_v23  ;;  %v4781_v32 = vsub.f32 %v4779_v39, %v4780_v34 }
 0x95d   :  { %v4788_v61 = vand.u32 4294901760, %v4787_v29 }
 0x95e   :  { %4777 = vmatpush.xpose.msra.mxu2 %v4776_v51 }
 0x95f   :  { %4940 = vmatpush.xpose.msrb.mxu3 %v4776_v51  ;;  %v4789_v7 = vsub.f32 %v4787_v29, %v4788_v61 }
 0x960   :  { %4682 = vmatmul.f32.gmra.mxu3 %v4582_v22  ;;  %4713 = vmatmul.f32.gmra.mxu0 %v4580_v20  ;;  %v7092_v22 = vld [vmem:[#allocation3 + $0x38] sm:$0xff] }
 0x961   :  { %4507 = vmatmul.f32.gmra.mxu2 %v7024_v19  ;;  %v4782_v19 = vand.u32 4294901760, %v4781_v32  ;;  %v4790_v14 = vand.u32 4294901760, %v4789_v7 }
 0x963   :  { %4740 = vmatmul.f32.gmra.mxu1 %v4580_v20 }
 0x968   :  { %4822 = vmatmul.f32.vlgmr.msra.gmra.mxu3 %v4778_v38  ;;  %4852 = vmatmul.f32.vlgmr.msra.gmra.mxu0 %v4779_v39 }
 0x969   :  { %4646 = vmatmul.f32.vlgmr.msrb.gmra.mxu2 %v7029_v4  ;;  %v7073_v4 = vpop.f32.mrf.mxu0 }
 0x96a   :  { %4909 = vmatpush.xpose.msrb.mxu2 %v4811_v27 }
 0x96b   :  { %4882 = vmatmul.f32.vlgmr.msrb.gmra.mxu1 %v4780_v34 }
 0x96e   :  { %4913 = vmatpush.xpose.msrb.mxu2 %v4817_v43 }
 0x970   :  { %4826 = vmatmul.f32.gmra.mxu3 %v4786_v23  ;;  %4857 = vmatmul.f32.gmra.mxu0 %v4787_v29 }
 0x971   :  { %4651 = vmatmul.f32.gmra.mxu2 %v7049_v3  ;;  %v7077_v24 = vpop.f32.mrf.mxu0 }
 0x973   :  { %4888 = vmatmul.f32.gmra.mxu1 %v4788_v61 }
 0x978   :  { %4942 = vmatmul.f32.vlgmr.msrb.gmra.mxu3 %v4778_v38 }
 0x979   :  { %4783 = vmatmul.f32.vlgmr.msra.gmra.mxu2 %v4782_v19  ;;  %v4166_v46 = vpop.f32.mrf.mxu0 }
 0x97a   :  { %v4167_v53 = vadd.f32 %v4166_v46, %v7089_v31 }
 0x97f   :  { %v7079_v42 = vpop.f32.mrf.mxu1 }
 0x980   :  { %4946 = vmatmul.f32.gmra.mxu3 %v4786_v23 }
 0x981   :  { %4791 = vmatmul.f32.gmra.mxu2 %v4790_v14  ;;  %v4174_v56 = vpop.f32.mrf.mxu0 }
 0x982   :  { %v4175_v63 = vadd.f32 %v4174_v56, %v7092_v22 }
 0x987   :  { %v4205_v27 = vpop.f32.mrf.mxu1 }
 0x988   :  { %v4206_v49 = vadd.f32 %v4205_v27, %v4167_v53 }
 0x989   :  { %4915 = vmatmul.f32.vlgmr.msrb.gmra.mxu2 %v4778_v38  ;;  %v4298_v59 = vpop.f32.mrf.mxu0 }
 0x98f   :  { %v4209_v17 = vpop.f32.mrf.mxu1 }
 0x990   :  { %v4210_v12 = vadd.f32 %v4209_v17, %v4175_v63 }
 0x991   :  { %4919 = vmatmul.f32.gmra.mxu2 %v4786_v23  ;;  %v4302_v37 = vpop.f32.mrf.mxu0 }
 0x997   :  { %v4325_v20 = vpop.f32.mrf.mxu1 }
 0x99b   :  { %v7081_v16 = vpop.f32.mrf.mxu3 }
 0x99f   :  { %v4329_v51 = vpop.f32.mrf.mxu1 }
 0x9a3   :  { %v7083_v40 = vpop.f32.mrf.mxu3 }
 0x9ab   :  { %v4265_v9 = vpop.f32.mrf.mxu3 }
 0x9ac   :  { %v7085_v52 = vpop.f32.mrf.mxu2 }
 0x9b3   :  { %v4271_v28 = vpop.f32.mrf.mxu3 }
 0x9b4   :  { %v7087_v11 = vpop.f32.mrf.mxu2 }
 0x9b5   :  { %v4441_v0 = vpop.f32.mrf.mxu0 }
 0x9b7   :  { %v4471_v38 = vpop.f32.mrf.mxu1 }
 0x9bb   :  { %v4411_v58 = vpop.f32.mrf.mxu3 }
 0x9bc   :  { %v4235_v3 = vpop.f32.mrf.mxu2 }
 0x9bd   :  { %v4236_v25 = vadd.f32 %v4235_v3, %v4206_v49  ;;  %v4446_v34 = vpop.f32.mrf.mxu0 }
 0x9bf   :  { %v4266_v13 = vadd.f32 %v4265_v9, %v4236_v25  ;;  %v4477_v32 = vpop.f32.mrf.mxu1 }
 0x9c1   :  { %v4299_v44 = vadd.f32 %v4298_v59, %v4266_v13 }
 0x9c3   :  { %v7095_v15 = vadd.f32 %v4325_v20, %v4299_v44  ;;  %v4415_v6 = vpop.f32.mrf.mxu3 }
 0x9c4   :  { %v4240_v43 = vpop.f32.mrf.mxu2 }
 0x9c5   :  { %v4241_v35 = vadd.f32 %v4240_v43, %v4210_v12  ;;  %v4950_v2 = vsel %vm1686_vm6, %v7095_v15, -inf  ;;  %v4578_v27 = vpop.f32.mrf.mxu0 }
 0x9c6   :  { %4951 = vmax.xlane.f32.xlu0 %v4950_v2  ;;  %v4579_v44 = vadd.f32 %v4578_v27, %v7089_v31 }
 0x9c7   :  { %v4272_v55 = vadd.f32 %v4271_v28, %v4241_v35 }
 0x9c8   :  { %v4617_v28 = vpop.f32.mrf.mxu1 }
 0x9c9   :  { %v4303_v41 = vadd.f32 %v4302_v37, %v4272_v55  ;;  %v4618_v35 = vadd.f32 %v4617_v28, %v4579_v44 }
 0x9cb   :  { %v7099_v39 = vadd.f32 %v4329_v51, %v4303_v41  ;;  %v4531_v61 = vpop.f32.mrf.mxu3 }
 0x9cc   :  { %v4372_v10 = vpop.f32.mrf.mxu2 }
 0x9cd   :  { %v4953_v23 = vsel %vm1686_vm6, %v7099_v39, -inf  ;;  %v4373_v29 = vadd.f32 %v4372_v10, %v7089_v31  ;;  %v4586_v25 = vpop.f32.mrf.mxu0 }
 0x9ce   :  { %4954 = vmax.xlane.f32.xlu2 %v4953_v23 }
 0x9cf   :  { %v4412_v19 = vadd.f32 %v4411_v58, %v4373_v29 }
 0x9d0   :  { %v4621_v51 = vpop.f32.mrf.mxu1 }
 0x9d1   :  { %v4442_v46 = vadd.f32 %v4441_v0, %v4412_v19 }
 0x9d3   :  { %v4535_v56 = vpop.f32.mrf.mxu3  ;;  %v4472_v17 = vadd.f32 %v4471_v38, %v4442_v46  ;;  %v4587_v38 = vadd.f32 %v4586_v25, %v7092_v22 }
 0x9d4   :  { %v4380_v7 = vpop.f32.mrf.mxu2 }
 0x9d5   :  { %v4381_v14 = vadd.f32 %v4380_v7, %v7092_v22 }
 0x9d7   :  { %v4416_v9 = vadd.f32 %v4415_v6, %v4381_v14  ;;  %v4710_v6 = vpop.f32.mrf.mxu0 }
 0x9d8   :  { %v4737_v10 = vpop.f32.mrf.mxu1 }
 0x9d9   :  { %v4447_v49 = vadd.f32 %v4446_v34, %v4416_v9  ;;  %v4622_v34 = vadd.f32 %v4621_v51, %v4587_v38 }
 0x9db   :  { %v4478_v58 = vadd.f32 %v4477_v32, %v4447_v49  ;;  %v4677_v37 = vpop.f32.mrf.mxu3 }
 0x9dc   :  { %v4504_v59 = vpop.f32.mrf.mxu2 }
 0x9dd   :  { %v4505_v20 = vadd.f32 %v4504_v59, %v4472_v17 }
 0x9df   :  { %v7105_v53 = vadd.f32 %v4531_v61, %v4505_v20  ;;  %v4714_v14 = vpop.f32.mrf.mxu0 }
 0x9e1   :  { %v4956_v3 = vsel %vm1686_vm6, %v7105_v53, -inf }
 0x9e2   :  { %4957 = vmax.xlane.f32.xlu1 %v4956_v3 }
 0x9e3   :  { %v4683_v55 = vpop.f32.mrf.mxu3 }
 0x9e4   :  { %v4508_v13 = vpop.f32.mrf.mxu2 }
 0x9e5   :  { %v4509_v63 = vadd.f32 %v4508_v13, %v4478_v58 }
 0x9e7   :  { %v7110_v12 = vadd.f32 %v4535_v56, %v4509_v63  ;;  %v4741_v56 = vpop.f32.mrf.mxu1  ;;  %v4853_v3 = vpop.f32.mrf.mxu0 }
 0x9e9   :  { %v4959_v43 = vsel %vm1686_vm6, %v7110_v12, -inf }
 0x9ea   :  { %4960 = vmax.xlane.f32.xlu0 %v4959_v43 }
 0x9eb   :  { %v4823_v46 = vpop.f32.mrf.mxu3 }
 0x9ec   :  { %v4647_v2 = vpop.f32.mrf.mxu2 }
 0x9ed   :  { %v4648_v0 = vadd.f32 %v4647_v2, %v4618_v35 }
 0x9ef   :  { %v4678_v41 = vadd.f32 %v4677_v37, %v4648_v0  ;;  %v4883_v13 = vpop.f32.mrf.mxu1  ;;  %v4858_v2 = vpop.f32.mrf.mxu0 }
 0x9f1   :  { %v4711_v23 = vadd.f32 %v4710_v6, %v4678_v41 }
 0x9f3   :  { %v7115_v29 = vadd.f32 %v4737_v10, %v4711_v23  ;;  %v4827_v20 = vpop.f32.mrf.mxu3 }
 0x9f4   :  { %v4652_v61 = vpop.f32.mrf.mxu2 }
 0x9f5   :  { %v4653_v32 = vadd.f32 %v4652_v61, %v4622_v34  ;;  %v4962_v19 = vsel %vm1686_vm6, %v7115_v29, -inf  ;;  %v5467_v61 = vpack.i.bf16 %v5960_v54, %v5967_v1 }
 0x9f6   :  { %4963 = vmax.xlane.f32.xlu2 %v4962_v19 }
 0x9f7   :  { %v4684_v7 = vadd.f32 %v4683_v55, %v4653_v32  ;;  %v4889_v55 = vpop.f32.mrf.mxu1 }
 0x9f9   :  { %v4715_v27 = vadd.f32 %v4714_v14, %v4684_v7 }
 0x9fb   :  { %v7119_v9 = vadd.f32 %v4741_v56, %v4715_v27  ;;  %v4943_v44 = vpop.f32.mrf.mxu3 }
 0x9fc   :  { %v4784_v17 = vpop.f32.mrf.mxu2 }
 0x9fd   :  { %v4965_v28 = vsel %vm1686_vm6, %v7119_v9, -inf  ;;  %v4785_v59 = vadd.f32 %v4784_v17, %v7089_v31 }
 0x9fe   :  { %4966 = vmax.xlane.f32.xlu1 %v4965_v28 }
 0x9ff   :  { %v4824_v49 = vadd.f32 %v4823_v46, %v4785_v59 }
 0xa01   :  { %v4854_v37 = vadd.f32 %v4853_v3, %v4824_v49 }
 0xa03   :  { %v4884_v51 = vadd.f32 %v4883_v13, %v4854_v37 }
 0xa04   :  { %v4792_v25 = vpop.f32.mrf.mxu2 }
 0xa05   :  { %v4793_v58 = vadd.f32 %v4792_v25, %v7092_v22  ;;  %v4947_v22 = vpop.f32.mrf.mxu3 }
 0xa07   :  { %v4828_v63 = vadd.f32 %v4827_v20, %v4793_v58  ;;  %v5472_v58 = vpack.i.bf16 %v5976_v18, %v5984_v26 }
 0xa09   :  { %v4859_v6 = vadd.f32 %v4858_v2, %v4828_v63 }
 0xa0b   :  { %v4890_v38 = vadd.f32 %v4889_v55, %v4859_v6 }
 0xa0c   :  { %v4916_v43 = vpop.f32.mrf.mxu2 }
 0xa0d   :  { %v4917_v35 = vadd.f32 %v4916_v43, %v4884_v51 }
 0xa0f   :  { %v7125_v0 = vadd.f32 %v4943_v44, %v4917_v35  ;;  %v5477_v35 = vpack.i.bf16 %v5991_v36, %v6000_v47  ;;  %v5660_v36 = vld [vmem:[%s7319_s1 + $0x10] sm:$0xff]  ;;  %v5661_v47 = vld [vmem:[%s7319_s1] sm:$0xff] }
 0xa11   :  { %v4968_v31 = vsel %vm1686_vm6, %v7125_v0, -inf }
 0xa12   :  { %4969 = vmax.xlane.f32.xlu0 %v4968_v31 }
 0xa14   :  { %v4920_v41 = vpop.f32.mrf.mxu2 }
 0xa15   :  { %v4921_v10 = vadd.f32 %v4920_v41, %v4890_v38 }
 0xa17   :  { %v4948_v23 = vadd.f32 %v4947_v22, %v4921_v10 }
 0xa19   :  { %v4971_v34 = vsel %vm1686_vm6, %v4948_v23, -inf }
 0xa1a   :  { %4972 = vmax.xlane.f32.xlu2 %v4971_v34 }
 0xa26   :  { %5468 = vrot.lane.b32.xlu0 %v5467_v61, %s5704_s15 }
 0xa39   :  { %v4952_v32 = vpop.xlane.xlu0 %4951 }
 0xa3a   :  { %v4974_v19 = vsub.f32 %v7095_v15, %v4952_v32 }
 0xa3c   :  { %v4982_v7 = vmul.f32 1.442695, %v4974_v19 }
 0xa3e   :  { %5628 = vpow2.f32 %v4982_v7 }
 0xa41   :  { %v4955_v14 = vpop.xlane.xlu2 %4954 }
 0xa42   :  { %v4975_v46 = vsub.f32 %v7099_v39, %v4955_v14  ;;  %v5662_v14 = vld [vmem:[%s7319_s1 + $0x30] sm:$0xff] }
 0xa44   :  { %v7135_v27 = vpop.eup %5628  ;;  %v4984_v56 = vmul.f32 1.442695, %v4975_v46 }
 0xa45   :  { %v4998_v17 = vsel %vm1686_vm6, %v7135_v27, 0.0 }
 0xa46   :  { %5630 = vpow2.f32 %v4984_v56  ;;  %4999 = vadd.xlane.f32.xlu1 %v4998_v17 }
 0xa4c   :  { %v7139_v54 = vpop.eup %5630 }
 0xa4d   :  { %v5001_v1 = vsel %vm1686_vm6, %v7139_v54, 0.0 }
 0xa4e   :  { %5002 = vadd.xlane.f32.xlu2 %v5001_v1 }
 0xa55   :  { %v4958_v15 = vpop.xlane.xlu1 %4957 }
 0xa56   :  { %v4976_v28 = vsub.f32 %v7105_v53, %v4958_v15 }
 0xa58   :  { %v4986_v59 = vmul.f32 1.442695, %v4976_v28 }
 0xa5a   :  { %5632 = vpow2.f32 %v4986_v59 }
 0xa5d   :  { %v4961_v39 = vpop.xlane.xlu0 %4960 }
 0xa5e   :  { %v4977_v20 = vsub.f32 %v7110_v12, %v4961_v39 }
 0xa60   :  { %v7145_v49 = vpop.eup %5632  ;;  %v4988_v3 = vmul.f32 1.442695, %v4977_v20 }
 0xa61   :  { %v5004_v25 = vsel %vm1686_vm6, %v7145_v49, 0.0 }
 0xa62   :  { %5634 = vpow2.f32 %v4988_v3  ;;  %5005 = vadd.xlane.f32.xlu1 %v5004_v25 }
 0xa66   :  { %5473 = vrot.lane.b32.xlu2 %v5472_v58, %s5704_s15 }
 0xa68   :  { %v7152_v37 = vpop.eup %5634 }
 0xa69   :  { %v4964_v53 = vpop.xlane.xlu2 %4963  ;;  %v5007_v13 = vsel %vm1686_vm6, %v7152_v37, 0.0 }
 0xa6a   :  { %v4978_v12 = vsub.f32 %v7115_v29, %v4964_v53  ;;  %5008 = vadd.xlane.f32.xlu1 %v5007_v13  ;;  %v5482_v29 = vpack.i.bf16 %v6009_v57, %v6015_v60  ;;  %v5492_v57 = vpack.i.bf16 %v5661_v47, %v5660_v36 }
 0xa6c   :  { %v4990_v63 = vmul.f32 1.442695, %v4978_v12 }
 0xa6e   :  { %5636 = vpow2.f32 %v4990_v63 }
 0xa71   :  { %v4967_v18 = vpop.xlane.xlu1 %4966 }
 0xa72   :  { %v4979_v26 = vsub.f32 %v7119_v9, %v4967_v18 }
 0xa74   :  { %v7157_v51 = vpop.eup %5636  ;;  %v4992_v43 = vmul.f32 1.442695, %v4979_v26 }
 0xa75   :  { %v5010_v44 = vsel %vm1686_vm6, %v7157_v51, 0.0 }
 0xa76   :  { %5011 = vadd.xlane.f32.xlu0 %v5010_v44  ;;  %5638 = vpow2.f32 %v4992_v43 }
 0xa7c   :  { %v7167_v2 = vpop.eup %5638 }
 0xa7d   :  { %v5013_v31 = vsel %vm1686_vm6, %v7167_v2, 0.0 }
 0xa83   :  { %5478 = vrot.lane.b32.xlu1 %v5477_v35, %s5704_s15 }
 0xa85   :  { %v4970_v9 = vpop.xlane.xlu0 %4969 }
 0xa8a   :  { %5483 = vrot.lane.b32.xlu0 %v5482_v29, %s5704_s15 }
 0xa8d   :  { %v4973_v6 = vpop.xlane.xlu2 %4972 }
 0xa8e   :  { %v4981_v55 = vsub.f32 %v4948_v23, %v4973_v6 }
 0xa8f   :  { %5014 = vadd.xlane.f32.xlu2 %v5013_v31 }
 0xa90   :  { %v4996_v38 = vmul.f32 1.442695, %v4981_v55 }
 0xa92   :  { %5640 = vpow2.f32 %v4996_v38  ;;  %2994 = vrot.lane.b32.xlu0 %v6797_v21, %s5692_s21  ;;  %v4980_v21 = vsub.f32 %v7125_v0, %v4970_v9 }
 0xa94   :  { %v4994_v34 = vmul.f32 1.442695, %v4980_v21 }
 0xa96   :  { %5642 = vpow2.f32 %v4994_v34 }
 0xa98   :  { %v7180_v60 = vpop.eup %5640  ;;  %v5469_v41 = vpop.permute.xlu0 %5468 }
 0xa99   :  { %v5470_v10 = vunpack.i.l.bf16 %v5469_v41  ;;  %v5019_v22 = vsel %vm1686_vm6, %v7180_v60, 0.0  ;;  %v5471_v23 = vunpack.i.h.bf16 %v5469_v41 }
 0xa9a   :  { %5020 = vadd.xlane.f32.xlu2 %v5019_v22  ;;  %5493 = vrot.lane.b32.xlu0 %v5492_v57, %s5694_s29 }
 0xa9b   :  { %5064 = vmatpush.msrb.mxu0 %v5470_v10 }
 0xa9c   :  { %v7188_v61 = vpop.eup %5642 }
 0xa9d   :  { %5065 = vmatpush.msrb.mxu0 %v5471_v23  ;;  %v5016_v32 = vsel %vm1686_vm6, %v7188_v61, 0.0 }
 0xaa2   :  { %2996 = vrot.lane.b32.xlu0 %v6801_v48, %s5692_s21 }
 0xaad   :  { %5017 = vadd.xlane.f32.xlu1 %v5016_v32 }
 0xab2   :  { %4090 = vrot.lane.b32.xlu2 %v7073_v4, %s5705_s19  ;;  %v5663_v4 = vld [vmem:[%s7319_s1 + $0x20] sm:$0xff]  ;;  %s5706_s1 = smov 24  }
 0xab3   :  { %v5487_v46 = vpack.i.bf16 %v5663_v4, %v5662_v14 }
 0xab9   :  { %v5000_v19 = vpop.xlane.xlu1 %4999 }
 0xaba   :  { %5644 = vrcp.f32 %v5000_v19  ;;  %4092 = vrot.lane.b32.xlu2 %v7077_v24, %s5705_s19 }
 0xac0   :  { %v5645_v0 = vpop.eup %5644 }
 0xac1   :  { %v5030_v7 = vmul.f32 %v5645_v0, %v7135_v27  ;;  %v5003_v48 = vpop.xlane.xlu2 %5002 }
 0xac2   :  { %5646 = vrcp.f32 %v5003_v48  ;;  %4094 = vrot.lane.b32.xlu2 %v7075_v62, %s5705_s19 }
 0xac3   :  { %5362 = vmatmul.msk.f32.vlgmr.msrb.gmra.mxu0 %vm1686_vm6, %v5030_v7 }
 0xac6   :  { %5488 = vrot.lane.b32.xlu1 %v5487_v46, %s5694_s29 }
 0xac8   :  { %v5647_v24 = vpop.eup %5646 }
 0xac9   :  { %v5474_v27 = vpop.permute.xlu2 %5473  ;;  %v5031_v56 = vmul.f32 %v5647_v24, %v7139_v54 }
 0xaca   :  { %v5475_v17 = vunpack.i.l.bf16 %v5474_v27  ;;  %4096 = vrot.lane.b32.xlu2 %v7079_v42, %s5705_s19  ;;  %v5476_v62 = vunpack.i.h.bf16 %v5474_v27 }
 0xacb   :  { %5363 = vmatmul.msk.f32.gmra.mxu0 %vm1686_vm6, %v5031_v56 }
 0xacc   :  { %5099 = vmatpush.msra.mxu1 %v5475_v17 }
 0xace   :  { %5100 = vmatpush.msra.mxu1 %v5476_v62  ;;  %2998 = vrot.lane.b32.xlu1 %v6805_v33, %s5692_s21 }
 0xad2   :  { %4098 = vrot.lane.b32.xlu2 %v7085_v52, %s5705_s19 }
 0xad5   :  { %v5006_v1 = vpop.xlane.xlu1 %5005 }
 0xad6   :  { %5648 = vrcp.f32 %v5006_v1  ;;  %3000 = vrot.lane.b32.xlu1 %v6809_v30, %s5692_s21 }
 0xada   :  { %4100 = vrot.lane.b32.xlu2 %v7087_v11, %s5705_s19 }
 0xadc   :  { %v5649_v42 = vpop.eup %5648 }
 0xadd   :  { %v5032_v54 = vmul.f32 %v5649_v42, %v7145_v49  ;;  %v5009_v15 = vpop.xlane.xlu1 %5008 }
 0xade   :  { %5650 = vrcp.f32 %v5009_v15  ;;  %3002 = vrot.lane.b32.xlu1 %v6799_v8, %s5692_s21 }
 0xadf   :  { %5364 = vmatmul.msk.f32.vlgmr.msra.gmra.mxu1 %vm1686_vm6, %v5032_v54 }
 0xae2   :  { %4102 = vrot.lane.b32.xlu2 %v7081_v16, %s5705_s19 }
 0xae4   :  { %v5651_v33 = vpop.eup %5650 }
 0xae5   :  { %v5033_v52 = vmul.f32 %v5651_v33, %v7152_v37 }
 0xae6   :  { %3004 = vrot.lane.b32.xlu1 %v6803_v50, %s5692_s21 }
 0xae7   :  { %5365 = vmatmul.msk.f32.gmra.mxu1 %vm1686_vm6, %v5033_v52 }
 0xae9   :  { %v5012_v30 = vpop.xlane.xlu0 %5011 }
 0xaea   :  { %4104 = vrot.lane.b32.xlu2 %v7083_v40, %s5705_s19  ;;  %5652 = vrcp.f32 %v5012_v30  ;;  %v5499_v30 = vld [vmem:[%s7320_s2 + $0x2] ss:$0 sm:$0xff] }
 0xaee   :  { %3006 = vrot.lane.b32.xlu1 %v6807_v5, %s5692_s21 }
 0xaf0   :  { %v5653_v11 = vpop.eup %5652 }
 0xaf1   :  { %v5034_v50 = vmul.f32 %v5653_v11, %v7157_v51 }
 0xaf5   :  { %v5479_v8 = vpop.permute.xlu1 %5478 }
 0xaf6   :  { %v5480_v28 = vunpack.i.l.bf16 %v5479_v8  ;;  %3008 = vrot.lane.b32.xlu1 %v6811_v45, %s5692_s21  ;;  %v5481_v16 = vunpack.i.h.bf16 %v5479_v8 }
 0xaf8   :  { %5134 = vmatpush.msra.mxu2 %v5480_v28 }
 0xafa   :  { %5135 = vmatpush.msra.mxu2 %v5481_v16 }
 0xafb   :  { %5366 = vmatmul.msk.f32.vlgmr.msra.gmra.mxu2 %vm1686_vm6, %v5034_v50 }
 0xafc   :  { %v5484_v59 = vpop.permute.xlu0 %5483 }
 0xafd   :  { %v5485_v40 = vunpack.i.l.bf16 %v5484_v59  ;;  %v5486_v39 = vunpack.i.h.bf16 %v5484_v59 }
 0xaff   :  { %5169 = vmatpush.msra.mxu3 %v5485_v40 }
 0xb01   :  { %5170 = vmatpush.msra.mxu3 %v5486_v39 }
 0xb02   :  { %v5015_v5 = vpop.xlane.xlu2 %5014 }
 0xb03   :  { %5654 = vrcp.f32 %v5015_v5 }
 0xb04   :  { %v2995_v20 = vpop.permute.xlu0 %2994 }
 0xb05   :  { %3019 = vst.msk [vmem:[#allocation2] sm:$0xff] %vm3018_vm1, %v2995_v20 }
 0xb09   :  { %v5655_v49 = vpop.eup %5654 }
 0xb0a   :  { %v5035_v45 = vmul.f32 %v5655_v49, %v7167_v2 }
 0xb0c   :  { %5367 = vmatmul.msk.f32.gmra.mxu2 %vm1686_vm6, %v5035_v45  ;;  %v5494_v3 = vpop.permute.xlu0 %5493 }
 0xb0d   :  { %v5021_v25 = vpop.xlane.xlu2 %5020  ;;  %v5495_v29 = vunpack.i.l.bf16 %v5494_v3  ;;  %v5496_v2 = vunpack.i.h.bf16 %v5494_v3 }
 0xb14   :  { %v2997_v58 = vpop.permute.xlu0 %2996 }
 0xb15   :  { %3020 = vst.msk [vmem:[#allocation2 + $0x8] sm:$0xff] %vm3018_vm1, %v2997_v58  ;;  %v4091_v37 = vpop.permute.xlu2 %4090 }
 0xb16   :  { %4115 = vst.msk [vmem:[#allocation2] sm:$0xff] %vm4114_vm7, %v4091_v37 }
 0xb1d   :  { %v4093_v53 = vpop.permute.xlu2 %4092 }
 0xb1e   :  { %4116 = vst.msk [vmem:[#allocation2 + $0x8] sm:$0xff] %vm4114_vm7, %v4093_v53 }
 0xb20   :  { %v5018_v13 = vpop.xlane.xlu1 %5017 }
 0xb21   :  { %5656 = vrcp.f32 %v5018_v13 }
 0xb22   :  { %5658 = vrcp.f32 %v5021_v25 }
 0xb25   :  { %v4095_v18 = vpop.permute.xlu2 %4094 }
 0xb27   :  { %v5657_v12 = vpop.eup %5656 }
 0xb28   :  { %v5036_v63 = vmul.f32 %v5657_v12, %v7188_v61  ;;  %v5659_v51 = vpop.eup %5658 }
 0xb29   :  { %v5037_v44 = vmul.f32 %v5659_v51, %v7180_v60 }
 0xb2a   :  { %5368 = vmatmul.msk.f32.vlgmr.msra.gmra.mxu3 %vm1686_vm6, %v5036_v63 }
 0xb2d   :  { %v4097_v55 = vpop.permute.xlu2 %4096 }
 0xb32   :  { %5369 = vmatmul.msk.f32.gmra.mxu3 %vm1686_vm6, %v5037_v44 }
 0xb35   :  { %v4099_v36 = vpop.permute.xlu2 %4098 }
 0xb38   :  { %v5489_v26 = vpop.permute.xlu1 %5488 }
 0xb39   :  { %v5491_v43 = vunpack.i.h.bf16 %v5489_v26  ;;  %v5490_v35 = vunpack.i.l.bf16 %v5489_v26 }
 0xb3b   :  { %5280 = vmatpush.msra.mxu0 %v5490_v35 }
 0xb3d   :  { %5281 = vmatpush.msra.mxu0 %v5491_v43  ;;  %v4101_v57 = vpop.permute.xlu2 %4100 }
 0xb3f   :  { %5282 = vmatpush.msra.mxu0 %v5495_v29 }
 0xb40   :  { %v5067_v6 = vpop.f32.mrf.mxu0  ;;  %v2999_v31 = vpop.permute.xlu1 %2998 }
 0xb41   :  { %5186 = vrot.lane.b32.xlu0 %v5067_v6, %s5706_s1  ;;  %3021 = vst.msk [vmem:[#allocation2 + $0x10] sm:$0xff] %vm3018_vm1, %v2999_v31  ;;  %5283 = vmatpush.msra.mxu0 %v5496_v2 }
 0xb42   :  { %4117 = vst.msk [vmem:[#allocation2 + $0x10] sm:$0xff] %vm4114_vm7, %v4095_v18 }
 0xb45   :  { %v4103_v10 = vpop.permute.xlu2 %4102 }
 0xb48   :  { %v5070_v9 = vpop.f32.mrf.mxu0  ;;  %v3001_v38 = vpop.permute.xlu1 %3000 }
 0xb49   :  { %5188 = vrot.lane.b32.xlu0 %v5070_v9, %s5706_s1  ;;  %3022 = vst.msk [vmem:[#allocation2 + $0x18] sm:$0xff] %vm3018_vm1, %v3001_v38 }
 0xb4a   :  { %4118 = vst.msk [vmem:[#allocation2 + $0x18] sm:$0xff] %vm4114_vm7, %v4097_v55 }
 0xb4d   :  { %v4105_v34 = vpop.permute.xlu2 %4104 }
 0xb50   :  { %v3003_v47 = vpop.permute.xlu1 %3002 }
 0xb51   :  { %3023 = vst.msk [vmem:[#allocation2 + $0x20] sm:$0xff] %vm3018_vm1, %v3003_v47 }
 0xb52   :  { %4119 = vst.msk [vmem:[#allocation2 + $0x20] sm:$0xff] %vm4114_vm7, %v4099_v36 }
 0xb58   :  { %v3005_v60 = vpop.permute.xlu1 %3004 }
 0xb59   :  { %3024 = vst.msk [vmem:[#allocation2 + $0x28] sm:$0xff] %vm3018_vm1, %v3005_v60 }
 0xb5a   :  { %4120 = vst.msk [vmem:[#allocation2 + $0x28] sm:$0xff] %vm4114_vm7, %v4101_v57 }
 0xb5c   :  { %v5102_v41 = vpop.f32.mrf.mxu1 }
 0xb5d   :  { %5190 = vrot.lane.b32.xlu0 %v5102_v41, %s5706_s1 }
 0xb60   :  { %v3007_v22 = vpop.permute.xlu1 %3006 }
 0xb61   :  { %3025 = vst.msk [vmem:[#allocation2 + $0x30] sm:$0xff] %vm3018_vm1, %v3007_v22 }
 0xb62   :  { %4121 = vst.msk [vmem:[#allocation2 + $0x30] sm:$0xff] %vm4114_vm7, %v4103_v10 }
 0xb64   :  { %v5105_v21 = vpop.f32.mrf.mxu1 }
 0xb65   :  { %5192 = vrot.lane.b32.xlu0 %v5105_v21, %s5706_s1 }
 0xb68   :  { %v3009_v23 = vpop.permute.xlu1 %3008 }
 0xb69   :  { %3026 = vst.msk [vmem:[#allocation2 + $0x38] sm:$0xff] %vm3018_vm1, %v3009_v23 }
 0xb6a   :  { %4122 = vst.msk [vmem:[#allocation2 + $0x38] sm:$0xff] %vm4114_vm7, %v4105_v34 }
 0xb7e   :  { %v5137_v61 = vpop.f32.mrf.mxu2 }
 0xb7f   :  { %5194 = vrot.lane.b32.xlu0 %v5137_v61, %s5706_s1 }
 0xb8f   :  { %v5140_v32 = vpop.f32.mrf.mxu2 }
 0xb90   :  { %5196 = vrot.lane.b32.xlu0 %v5140_v32, %s5706_s1 }
 0xbad   :  { %v5172_v19 = vpop.f32.mrf.mxu3 }
 0xbae   :  { %5198 = vrot.lane.b32.xlu0 %v5172_v19, %s5706_s1 }
 0xbb3   :  { %v5187_v0 = vpop.permute.xlu0 %5186 }
 0xbb4   :  { %5211 = vst.msk [vmem:[#allocation2] sm:$0xff] %vm5210_vm8, %v5187_v0 }
 0xbb5   :  { %v5175_v7 = vpop.f32.mrf.mxu3 }
 0xbb6   :  { %5200 = vrot.lane.b32.xlu0 %v5175_v7, %s5706_s1 }
 0xbbb   :  { %v5189_v48 = vpop.permute.xlu0 %5188  ;;  %v5219_v14 = vld [vmem:[#allocation2] sm:$0xff] }
 0xbbc   :  { %5212 = vst.msk [vmem:[#allocation2 + $0x8] sm:$0xff] %vm5210_vm8, %v5189_v48  ;;  %5370 = vmatmul.msk.f32.vlgmr.msra.gmra.mxu0 %vm53_vm0, %v5219_v14 }
 0xbc3   :  { %v5220_v4 = vld [vmem:[#allocation2 + $0x8] sm:$0xff] }
 0xbc4   :  { %5371 = vmatmul.msk.f32.gmra.mxu0 %vm53_vm0, %v5220_v4 }
 0xbcf   :  { %v5191_v46 = vpop.permute.xlu0 %5190 }
 0xbd0   :  { %5213 = vst.msk [vmem:[#allocation2 + $0x10] sm:$0xff] %vm5210_vm8, %v5191_v46 }
 0xbd7   :  { %v5193_v24 = vpop.permute.xlu0 %5192  ;;  %v5221_v27 = vld [vmem:[#allocation2 + $0x10] sm:$0xff] }
 0xbd8   :  { %5214 = vst.msk [vmem:[#allocation2 + $0x18] sm:$0xff] %vm5210_vm8, %v5193_v24  ;;  %5372 = vmatmul.msk.f32.gmra.mxu0 %vm53_vm0, %v5221_v27 }
 0xbdf   :  { %v5222_v56 = vld [vmem:[#allocation2 + $0x18] sm:$0xff] }
 0xbe0   :  { %5373 = vmatmul.msk.f32.gmra.mxu0 %vm53_vm0, %v5222_v56 }
 0xbf1   :  { %v5195_v17 = vpop.permute.xlu0 %5194 }
 0xbf2   :  { %5215 = vst.msk [vmem:[#allocation2 + $0x20] sm:$0xff] %vm5210_vm8, %v5195_v17 }
 0xbf9   :  { %v5223_v62 = vld [vmem:[#allocation2 + $0x20] sm:$0xff] }
 0xbfa   :  { %5374 = vmatmul.msk.f32.gmra.mxu0 %vm53_vm0, %v5223_v62 }
 0xc02   :  { %v5197_v1 = vpop.permute.xlu0 %5196 }
 0xc03   :  { %5216 = vst.msk [vmem:[#allocation2 + $0x28] sm:$0xff] %vm5210_vm8, %v5197_v1 }
 0xc0a   :  { %v5224_v42 = vld [vmem:[#allocation2 + $0x28] sm:$0xff] }
 0xc0b   :  { %5375 = vmatmul.msk.f32.gmra.mxu0 %vm53_vm0, %v5224_v42 }
 0xc20   :  { %v5199_v54 = vpop.permute.xlu0 %5198 }
 0xc21   :  { %5217 = vst.msk [vmem:[#allocation2 + $0x30] sm:$0xff] %vm5210_vm8, %v5199_v54 }
 0xc28   :  { %v5201_v15 = vpop.permute.xlu0 %5200  ;;  %v5225_v33 = vld [vmem:[#allocation2 + $0x30] sm:$0xff] }
 0xc29   :  { %5218 = vst.msk [vmem:[#allocation2 + $0x38] sm:$0xff] %vm5210_vm8, %v5201_v15  ;;  %5376 = vmatmul.msk.f32.gmra.mxu0 %vm53_vm0, %v5225_v33 }
 0xc30   :  { %v5226_v52 = vld [vmem:[#allocation2 + $0x38] sm:$0xff] }
 0xc31   :  { %5377 = vmatmul.msk.f32.gmra.mxu0 %vm53_vm0, %v5226_v52 }
 0xc39   :  { %v5285_v8 = vpop.f32.mrf.mxu0 }
 0xc3a   :  { %v5286_v11 = vadd.f32 %v5499_v30, %v5285_v8 }
 0xc3c   :  { %5309 = vst.msk [vmem:[%s7322_s4] sm:$0xff] %vm53_vm0, %v5286_v11 }
 0xc41   :  { %v5288_v28 = vpop.f32.mrf.mxu0 }
 0xc42   :  { %v5289_v16 = vadd.f32 %v5499_v30, %v5288_v28 }
 0xc44   :  { %5310 = vst.msk [vmem:[%s7322_s4 + $0x8] sm:$0xff] %vm53_vm0, %v5289_v16 }
 0xc55   :  { %v5291_v50 = vpop.f32.mrf.mxu0 }
 0xc56   :  { %v5292_v59 = vadd.f32 %v5499_v30, %v5291_v50 }
 0xc58   :  { %5311 = vst.msk [vmem:[%s7322_s4 + $0x10] sm:$0xff] %vm53_vm0, %v5292_v59 }
 0xc5d   :  { %v5294_v40 = vpop.f32.mrf.mxu0 }
 0xc5e   :  { %v5295_v39 = vadd.f32 %v5499_v30, %v5294_v40 }
 0xc60   :  { %5312 = vst.msk [vmem:[%s7322_s4 + $0x18] sm:$0xff] %vm53_vm0, %v5295_v39 }
 0xc77   :  { %v5297_v5 = vpop.f32.mrf.mxu0 }
 0xc78   :  { %v5298_v20 = vadd.f32 %v5499_v30, %v5297_v5 }
 0xc7a   :  { %5313 = vst.msk [vmem:[%s7322_s4 + $0x20] sm:$0xff] %vm53_vm0, %v5298_v20 }
 0xc88   :  { %v5300_v49 = vpop.f32.mrf.mxu0 }
 0xc89   :  { %v5301_v45 = vadd.f32 %v5499_v30, %v5300_v49 }
 0xc8b   :  { %5314 = vst.msk [vmem:[%s7322_s4 + $0x28] sm:$0xff] %vm53_vm0, %v5301_v45 }
 0xca6   :  { %v5303_v3 = vpop.f32.mrf.mxu0 }
 0xca7   :  { %v5304_v25 = vadd.f32 %v5499_v30, %v5303_v3 }
 0xca9   :  { %5315 = vst.msk [vmem:[%s7322_s4 + $0x30] sm:$0xff] %vm53_vm0, %v5304_v25 }
 0xcae   :  { %v5306_v58 = vpop.f32.mrf.mxu0 }
 0xcaf   :  { %v5307_v37 = vadd.f32 %v5499_v30, %v5306_v58 }
 0xcb1   :  { %5316 = vst.msk [vmem:[%s7322_s4 + $0x38] sm:$0xff] %vm53_vm0, %v5307_v37 }
 0xcb2   :  { %5321 = vsyncpa [#allocation4], 1 }

</bundles_post_ra>
